<compile_context>
chip_gen: v7x
topology: tpu7x:2x2x1
jax: 0.10.0
libtpu: 0.0.40
codegen_flags: <defaults>
</compile_context>

<pallas_src>
import functools

import jax
import jax.numpy as jnp
from jax.experimental import pallas as pl
from jax.experimental.pallas import tpu as pltpu

LANE = 128
VMEM_LIMIT = 32 * 1024 * 1024  # safe on v5e/v6e/v7x


def _round_up(x, m):
    return (x + m - 1) // m * m


def _pad_k_dim(k):
    kp = _round_up(k, LANE)
    if kp > 512:
        kp = _round_up(kp, 512)
    return kp


# --------------------------------------------------------------------------
# Tiled matmul + bias (+ReLU) kernel: bf16 inputs, f32 accumulation.
# --------------------------------------------------------------------------
def _matmul_bias_kernel(x_ref, w_ref, b_ref, o_ref, acc_ref, *, relu):
    @pl.when(pl.program_id(1) == 0)
    def _():
        acc_ref[...] = jnp.zeros_like(acc_ref)

    acc_ref[...] += jnp.dot(x_ref[...], w_ref[...],
                            preferred_element_type=jnp.float32)

    @pl.when(pl.program_id(1) == pl.num_programs(1) - 1)
    def _():
        out = acc_ref[...] + b_ref[...]
        if relu:
            out = jnp.maximum(out, 0.0)
        o_ref[...] = out.astype(o_ref.dtype)


def pallas_matmul_bias(x, w, b, *, relu, out_dtype, tm, tk=512):
    """x: (Mp, Kp) bf16, w: (Kp, Np) bf16, b: (1, Np) f32.  Mp%tm==0, Np%128==0."""
    mp, kp = x.shape
    kp2, np_ = w.shape
    assert kp == kp2 and np_ % LANE == 0 and mp % tm == 0
    tk_eff = min(tk, kp)
    assert kp % tk_eff == 0
    grid = (mp // tm, kp // tk_eff)
    return pl.pallas_call(
        functools.partial(_matmul_bias_kernel, relu=relu),
        out_shape=jax.ShapeDtypeStruct((mp, np_), out_dtype),
        grid_spec=pltpu.PrefetchScalarGridSpec(
            num_scalar_prefetch=0,
            grid=grid,
            in_specs=[
                pl.BlockSpec((tm, tk_eff), lambda i, k: (i, k)),
                pl.BlockSpec((tk_eff, np_), lambda i, k: (k, 0)),
                pl.BlockSpec((1, np_), lambda i, k: (0, 0)),
            ],
            out_specs=pl.BlockSpec((tm, np_), lambda i, k: (i, 0)),
            scratch_shapes=[pltpu.VMEM((tm, np_), jnp.float32)],
        ),
        compiler_params=pltpu.CompilerParams(
            dimension_semantics=("parallel", "arbitrary"),
            vmem_limit_bytes=VMEM_LIMIT,
        ),
    )(x, w, b)


def _run_matmul(x2d, prep, relu, out_dtype, tm=512):
    """Pad (M, K) activations to the prepared weight's (Kp, Np) tiling and run."""
    m, k = x2d.shape
    w_pad, b_pad = prep["w"], prep["b"]
    kp, _ = w_pad.shape
    if m <= tm:
        mp = _round_up(m, 8)
        tm_eff = mp
    else:
        mp = _round_up(m, tm)
        tm_eff = tm
    xb = x2d.astype(jnp.bfloat16)
    if (mp, kp) != (m, k):
        xb = jnp.pad(xb, ((0, mp - m), (0, kp - k)))
    out = pallas_matmul_bias(xb, w_pad, b_pad, relu=relu,
                             out_dtype=out_dtype, tm=tm_eff)
    return out[:m, :prep["cout"]]


# --------------------------------------------------------------------------
# Vector quantizer kernel (row-tiled, online loss accumulation).
# --------------------------------------------------------------------------
def _vq_kernel(x_ref, e_ref, q_ref, ls_ref, *, tile_rows, rows_valid, k_valid):
    i = pl.program_id(0)

    @pl.when(i == 0)
    def _():
        ls_ref[...] = jnp.zeros_like(ls_ref)

    x = x_ref[...]                         # (TR, Dp) f32 (zero-padded cols)
    e = e_ref[...]                         # (Dp, Ke) f32 (zero-padded rows)
    tr, _ = x.shape
    ke = e.shape[1]

    # Distance for argmin; the per-row ||x||^2 term is constant and dropped.
    e2 = jnp.sum(e * e, axis=0, keepdims=True)                       # (1, Ke)
    xe = jnp.dot(x.astype(jnp.bfloat16), e.astype(jnp.bfloat16),
                 preferred_element_type=jnp.float32)                 # (TR, Ke)
    dist = e2 - 2.0 * xe
    col = jax.lax.broadcasted_iota(jnp.int32, (tr, ke), 1)
    if ke > k_valid:
        dist = jnp.where(col < k_valid, dist, 1e30)

    # First-occurrence argmin (matches torch.argmin tie-breaking).
    minval = jnp.min(dist, axis=1, keepdims=True)
    idx = jnp.min(jnp.where(dist <= minval, col, ke), axis=1)        # (TR,)
    onehot = (col == idx[:, None]).astype(jnp.float32)               # (TR, Ke)

    # quantized = onehot @ e.T  (f32 codebook lookup)
    q = jax.lax.dot_general(onehot, e, (((1,), (1,)), ((), ())),
                            preferred_element_type=jnp.float32)      # (TR, Dp)
    q_ref[...] = q

    # Partial sum of squared diff (mask padded rows; padded cols are 0 in both).
    row = i * tile_rows + jax.lax.broadcasted_iota(jnp.int32, (tr, 1), 0)
    mask = (row < rows_valid).astype(jnp.float32)
    diff = (q - x) * mask
    ls_ref[...] = ls_ref[...] + jnp.sum(diff * diff)


def pallas_vq(flat_x, emb_pad, num_embeddings, d):
    n, d_in = flat_x.shape
    dp, ke = emb_pad.shape
    tr_max = 256
    if n <= tr_max:
        np_rows = _round_up(n, 8)
        tr = np_rows
    else:
        np_rows = _round_up(n, tr_max)
        tr = tr_max
    xp = jnp.pad(flat_x.astype(jnp.float32), ((0, np_rows - n), (0, dp - d_in)))
    grid_rows = np_rows // tr

    q_pad, ls = pl.pallas_call(
        functools.partial(_vq_kernel, tile_rows=tr, rows_valid=n,
                          k_valid=num_embeddings),
        out_shape=(jax.ShapeDtypeStruct((np_rows, dp), jnp.float32),
                   jax.ShapeDtypeStruct((1, LANE), jnp.float32)),
        grid_spec=pltpu.PrefetchScalarGridSpec(
            num_scalar_prefetch=0,
            grid=(grid_rows,),
            in_specs=[pl.BlockSpec((tr, dp), lambda i: (i, 0)),
                      pl.BlockSpec((dp, ke), lambda i: (0, 0))],
            out_specs=[pl.BlockSpec((tr, dp), lambda i: (i, 0)),
                       pl.BlockSpec((1, LANE), lambda i: (0, 0))],
        ),
        compiler_params=pltpu.CompilerParams(
            dimension_semantics=("arbitrary",),
            vmem_limit_bytes=VMEM_LIMIT,
        ),
    )(xp, emb_pad)

    # beta*e_latent_loss + q_latent_loss == 1.25 * mean((q - x)^2)
    loss = 1.25 * ls[0, 0] / (n * d)
    return q_pad[:n, :d], loss


# --------------------------------------------------------------------------
# Conv / ConvTranspose glue (patch extraction in JAX, matmul in Pallas).
# TODO(synk): fuse patch extraction into the kernel (halo DMA) to avoid the
# k*k im2col expansion in HBM for large images.
# --------------------------------------------------------------------------
def _im2col(x_nhwc, k, stride, pad):
    b, h, w, c = x_nhwc.shape
    xp = jnp.pad(x_nhwc, ((0, 0), (pad, pad), (pad, pad), (0, 0)))
    hout = (h + 2 * pad - k) // stride + 1
    wout = (w + 2 * pad - k) // stride + 1
    cols = []
    for ki in range(k):
        for kj in range(k):
            cols.append(xp[:, ki:ki + (hout - 1) * stride + 1:stride,
                           kj:kj + (wout - 1) * stride + 1:stride, :])
    patches = jnp.concatenate(cols, axis=-1)         # (B, Hout, Wout, k*k*C)
    return patches.reshape(b * hout * wout, k * k * c), hout, wout


def conv2d(x_nhwc, layer, stride, pad, relu, out_dtype):
    b = x_nhwc.shape[0]
    patches, hout, wout = _im2col(x_nhwc.astype(jnp.bfloat16),
                                  layer["k"], stride, pad)
    out = _run_matmul(patches, layer, relu, out_dtype)
    return out.reshape(b, hout, wout, layer["cout"])


# Sub-pixel decomposition of ConvTranspose2d(k=3, stride=2, pad=1, out_pad=1):
# output phase (r, c) = sum over taps (dh, dw, kh, kw) of x[i+dh, j+dw] @ W_t[:,:,kh,kw]
_PHASE_TAPS = (
    ((0, 0, 1, 1),),
    ((0, 0, 1, 2), (0, 1, 1, 0)),
    ((0, 0, 2, 1), (1, 0, 0, 1)),
    ((0, 0, 2, 2), (0, 1, 2, 0), (1, 0, 0, 2), (1, 1, 0, 0)),
)


def conv_transpose2d_s2(x_nhwc, layer, relu, out_dtype):
    b, h, w, _ = x_nhwc.shape
    cout = layer["cout"]
    xb = x_nhwc.astype(jnp.bfloat16)
    xp = jnp.pad(xb, ((0, 0), (0, 1), (0, 1), (0, 0)))   # high-side halo
    outs = []
    for taps, prep in zip(_PHASE_TAPS, layer["phases"]):
        pats = jnp.concatenate(
            [xp[:, dh:dh + h, dw:dw + w, :] for (dh, dw, _, _) in taps], axis=-1)
        o = _run_matmul(pats.reshape(b * h * w, -1), prep, relu, out_dtype)
        outs.append(o.reshape(b, h, w, cout))
    y00, y01, y10, y11 = outs
    row0 = jnp.stack([y00, y01], axis=3)                 # (b, h, w, 2, c)
    row1 = jnp.stack([y10, y11], axis=3)
    return jnp.stack([row0, row1], axis=2).reshape(b, 2 * h, 2 * w, cout)


# --------------------------------------------------------------------------
# Parameter prep (transpose / pad / cast once, outside the forward pass).
# --------------------------------------------------------------------------
def _prep_conv(weight, bias):
    # weight: (Cout, Cin, kH, kW) — PyTorch Conv2d layout.
    cout, cin, kh, kw = weight.shape
    kdim = kh * kw * cin
    w_mat = jnp.transpose(weight, (2, 3, 1, 0)).reshape(kdim, cout)
    kp = _pad_k_dim(kdim)
    np_ = _round_up(cout, LANE)
    return {
        "w": jnp.pad(w_mat, ((0, kp - kdim), (0, np_ - cout))).astype(jnp.bfloat16),
        "b": jnp.pad(bias, (0, np_ - cout)).reshape(1, np_).astype(jnp.float32),
        "cout": cout,
        "k": kh,
    }


def _prep_deconv(weight_t, bias):
    # weight_t: (Cin, Cout, 3, 3) — PyTorch ConvTranspose2d layout.
    cin, cout, kh, kw = weight_t.shape
    assert kh == 3 and kw == 3
    np_ = _round_up(cout, LANE)
    b_pad = jnp.pad(bias, (0, np_ - cout)).reshape(1, np_).astype(jnp.float32)
    phases = []
    for taps in _PHASE_TAPS:
        wm = jnp.concatenate([weight_t[:, :, t[2], t[3]] for t in taps], axis=0)
        kdim = wm.shape[0]
        kp = _pad_k_dim(kdim)
        phases.append({
            "w": jnp.pad(wm, ((0, kp - kdim), (0, np_ - cout))).astype(jnp.bfloat16),
            "b": b_pad,
            "cout": cout,
        })
    return {"phases": phases, "cout": cout}


def _prep_codebook(emb):
    d, k = emb.shape
    dp = _round_up(d, LANE)
    kp = _round_up(k, LANE)
    return jnp.pad(emb.astype(jnp.float32), ((0, dp - d), (0, kp - k)))


def prepare_params(raw, num_embeddings):
    return {
        "enc1": _prep_conv(raw["ew1"], raw["eb1"]),
        "enc2": _prep_conv(raw["ew2"], raw["eb2"]),
        "enc3": _prep_conv(raw["ew3"], raw["eb3"]),
        "emb": _prep_codebook(raw["emb"]),
        "num_embeddings": num_embeddings,
        "dec1": _prep_deconv(raw["dw1"], raw["db1"]),
        "dec2": _prep_deconv(raw["dw2"], raw["db2"]),
        "dec3": _prep_conv(raw["dw3"], raw["db3"]),
    }


# --------------------------------------------------------------------------
# VQVAE forward
# --------------------------------------------------------------------------
def vqvae_forward(x_nchw, params, latent_dim=16):
    x = jnp.transpose(x_nchw, (0, 2, 3, 1))  # NCHW -> NHWC

    # Encoder
    h1 = conv2d(x, params["enc1"], stride=2, pad=1, relu=True, out_dtype=jnp.bfloat16)
    h2 = conv2d(h1, params["enc2"], stride=2, pad=1, relu=True, out_dtype=jnp.bfloat16)
    z = conv2d(h2, params["enc3"], stride=1, pad=0, relu=False, out_dtype=jnp.float32)

    # VectorQuantizer — replicate PyTorch's contiguous `x.view(-1, embedding_dim)`
    # on the NCHW latent (faithful to the reference, shape-consistent because
    # H/4 * W/4 == latent_dim for this configuration).
    z_nchw = jnp.transpose(z, (0, 3, 1, 2))
    flat = z_nchw.reshape(-1, latent_dim)
    q_flat, vq_loss = pallas_vq(flat, params["emb"], params["num_embeddings"], latent_dim)
    # quantized = x + (quantized - x).detach()  (value-wise == quantized; forward only)
    zq = jnp.transpose(q_flat.reshape(z_nchw.shape), (0, 2, 3, 1))

    # Decoder
    d1 = conv_transpose2d_s2(zq, params["dec1"], relu=True, out_dtype=jnp.bfloat16)
    d2 = conv_transpose2d_s2(d1, params["dec2"], relu=True, out_dtype=jnp.bfloat16)
    recon = conv2d(d2, params["dec3"], stride=1, pad=1, relu=False, out_dtype=jnp.float32)

    return jnp.transpose(recon, (0, 3, 1, 2)), vq_loss  # back to NCHW


def init_params(key, latent_dim=16, num_embeddings=1024):
    ks = jax.random.split(key, 8)

    def w(k, shape, scale=0.1):
        return scale * jax.random.normal(k, shape, jnp.float32)

    return {
        # Encoder (Conv2d weights: (Cout, Cin, kH, kW))
        "ew1": w(ks[0], (32, 3, 3, 3)),          "eb1": jnp.zeros((32,), jnp.float32),
        "ew2": w(ks[1], (64, 32, 3, 3)),         "eb2": jnp.zeros((64,), jnp.float32),
        "ew3": w(ks[2], (latent_dim, 64, 1, 1)), "eb3": jnp.zeros((latent_dim,), jnp.float32),
        # VQ codebook (embedding_dim, num_embeddings) ~ randn
        "emb": jax.random.normal(ks[3], (latent_dim, num_embeddings), jnp.float32),
        # Decoder (ConvTranspose2d weights: (Cin, Cout, kH, kW))
        "dw1": w(ks[4], (latent_dim, 64, 3, 3)), "db1": jnp.zeros((64,), jnp.float32),
        "dw2": w(ks[5], (64, 32, 3, 3)),         "db2": jnp.zeros((32,), jnp.float32),
        # Final Conv2d: (Cout, Cin, kH, kW)
        "dw3": w(ks[6], (3, 32, 3, 3)),          "db3": jnp.zeros((3,), jnp.float32),
    }


if __name__ == "__main__":
    key = jax.random.PRNGKey(0)
    pkey, xkey = jax.random.split(key)

    latent_dim, num_embeddings = 16, 1024
    raw = init_params(pkey, latent_dim=latent_dim, num_embeddings=num_embeddings)
    params = prepare_params(raw, num_embeddings)

    # B=2, C=3, H=W=16 (H/4 * W/4 == embedding_dim == 16, so the PyTorch
    # view(-1, 16) in the VQ layer is shape-consistent).
    x = jax.random.normal(xkey, (2, 3, 16, 16), jnp.float32)

    fwd = jax.jit(lambda xin: vqvae_forward(xin, params, latent_dim=latent_dim))
    recon, vq_loss = fwd(x)
    jax.block_until_ready((recon, vq_loss))

    assert recon.shape == (2, 3, 16, 16), recon.shape
    assert vq_loss.shape == (), vq_loss.shape
    assert bool(jnp.all(jnp.isfinite(recon))) and bool(jnp.isfinite(vq_loss))
    print("KERNEL_OK")
</pallas_src>

<mosaic_0001>
module attributes {stable_mosaic.version = 11 : i64} {
  func.func @_matmul_bias_kernel(%arg0: i32, %arg1: i32, %arg2: memref<128x128xbf16, #tpu.memory_space<vmem>>, %arg3: memref<128x128xbf16, #tpu.memory_space<vmem>>, %arg4: memref<1x128xf32, #tpu.memory_space<vmem>>, %arg5: memref<128x128xbf16, #tpu.memory_space<vmem>>, %arg6: memref<128x128xf32, #tpu.memory_space<vmem>>) attributes {dimension_semantics = [#tpu.dimension_semantics<parallel>, #tpu.dimension_semantics<arbitrary>], iteration_bounds = array<i64: 1, 1>, scalar_prefetch = 0 : i64, scratch_operands = 1 : i64, tpu.core_type = #tpu.core_type<tc>, window_params = [{transform_indices = @transform_0, window_bounds = array<i64: 128, 128>}, {transform_indices = @transform_1, window_bounds = array<i64: 128, 128>}, {pipeline_mode = #tpu.pipeline_mode<synchronous>, transform_indices = @transform_2, window_bounds = array<i64: 1, 128>}, {transform_indices = @transform_3, window_bounds = array<i64: 128, 128>}]} {
    %c0_i32 = arith.constant 0 : i32
    %0 = arith.cmpi eq, %arg1, %c0_i32 : i32
    %1 = arith.extui %0 : i1 to i32
    %c0_i32_0 = arith.constant 0 : i32
    %2 = arith.cmpi ne, %1, %c0_i32_0 : i32
    scf.if %2 {
      %cst_10 = arith.constant 0.000000e+00 : f32
      %12 = vector.broadcast %cst_10 : f32 to vector<128x128xf32>
      %c0_11 = arith.constant 0 : index
      %c0_12 = arith.constant 0 : index
      %13 = vector.load %arg6[%c0_11, %c0_12] : memref<128x128xf32, #tpu.memory_space<vmem>>, vector<128x128xf32>
      tpu.vector_store %arg6[%c0_11, %c0_12], %12 {strides = array<i32>} : memref<128x128xf32, #tpu.memory_space<vmem>>, vector<128x128xf32>,
    } else {
    }
    %c0 = arith.constant 0 : index
    %c0_1 = arith.constant 0 : index
    %3 = vector.load %arg6[%c0, %c0_1] : memref<128x128xf32, #tpu.memory_space<vmem>>, vector<128x128xf32>
    %c0_2 = arith.constant 0 : index
    %c0_3 = arith.constant 0 : index
    %4 = vector.load %arg2[%c0_2, %c0_3] : memref<128x128xbf16, #tpu.memory_space<vmem>>, vector<128x128xbf16>
    %c0_4 = arith.constant 0 : index
    %c0_5 = arith.constant 0 : index
    %5 = vector.load %arg3[%c0_4, %c0_5] : memref<128x128xbf16, #tpu.memory_space<vmem>>, vector<128x128xbf16>
    %cst = arith.constant dense<0.000000e+00> : vector<128x128xf32>
    %6 = tpu.matmul %4, %5, %cst {dimension_numbers = #tpu.dot_dimension_numbers<[1], [0], [0], [1], [0, 0, 1, 1], [], []>} : vector<128x128xbf16>, vector<128x128xbf16>, vector<128x128xf32> -> vector<128x128xf32>
    %7 = arith.addf %3, %6 : vector<128x128xf32>
    %c0_6 = arith.constant 0 : index
    %c0_7 = arith.constant 0 : index
    %8 = vector.load %arg6[%c0_6, %c0_7] : memref<128x128xf32, #tpu.memory_space<vmem>>, vector<128x128xf32>
    tpu.vector_store %arg6[%c0_6, %c0_7], %7 {strides = array<i32>} : memref<128x128xf32, #tpu.memory_space<vmem>>, vector<128x128xf32>,
    %c0_i32_8 = arith.constant 0 : i32
    %9 = arith.cmpi eq, %arg1, %c0_i32_8 : i32
    %10 = arith.extui %9 : i1 to i32
    %c0_i32_9 = arith.constant 0 : i32
    %11 = arith.cmpi ne, %10, %c0_i32_9 : i32
    scf.if %11 {
      %c0_10 = arith.constant 0 : index
      %c0_11 = arith.constant 0 : index
      %12 = vector.load %arg6[%c0_10, %c0_11] : memref<128x128xf32, #tpu.memory_space<vmem>>, vector<128x128xf32>
      %c0_12 = arith.constant 0 : index
      %c0_13 = arith.constant 0 : index
      %13 = vector.load %arg4[%c0_12, %c0_13] : memref<1x128xf32, #tpu.memory_space<vmem>>, vector<1x128xf32>
      %14 = vector.broadcast %13 : vector<1x128xf32> to vector<128x128xf32>
      %15 = arith.addf %12, %14 : vector<128x128xf32>
      %cst_14 = arith.constant 0.000000e+00 : f32
      %16 = vector.broadcast %cst_14 : f32 to vector<128x128xf32>
      %17 = arith.maximumf %15, %16 : vector<128x128xf32>
      %18 = arith.truncf %17 : vector<128x128xf32> to vector<128x128xbf16>
      %c0_15 = arith.constant 0 : index
      %c0_16 = arith.constant 0 : index
      %19 = vector.load %arg5[%c0_15, %c0_16] : memref<128x128xbf16, #tpu.memory_space<vmem>>, vector<128x128xbf16>
      tpu.vector_store %arg5[%c0_15, %c0_16], %18 {strides = array<i32>} : memref<128x128xbf16, #tpu.memory_space<vmem>>, vector<128x128xbf16>,
    } else {
    }
    return
  }
  func.func @transform_0(%arg0: i32, %arg1: i32) -> (i32, i32) {
    %c0_i32 = arith.constant 0 : i32
    return %arg0, %arg1 : i32, i32
  }
  func.func @transform_1(%arg0: i32, %arg1: i32) -> (i32, i32) {
    %c0_i32 = arith.constant 0 : i32
    %c0_i32_0 = arith.constant 0 : i32
    return %arg1, %c0_i32 : i32, i32
  }
  func.func @transform_2(%arg0: i32, %arg1: i32) -> (i32, i32) {
    %c0_i32 = arith.constant 0 : i32
    %c0_i32_0 = arith.constant 0 : i32
    %c0_i32_1 = arith.constant 0 : i32
    return %c0_i32, %c0_i32_0 : i32, i32
  }
  func.func @transform_3(%arg0: i32, %arg1: i32) -> (i32, i32) {
    %c0_i32 = arith.constant 0 : i32
    %c0_i32_0 = arith.constant 0 : i32
    return %arg0, %c0_i32 : i32, i32
  }
}

module attributes {stable_mosaic.version = 11 : i64} {
  func.func @_matmul_bias_kernel(%arg0: i32, %arg1: i32, %arg2: memref<32x384xbf16, #tpu.memory_space<vmem>>, %arg3: memref<384x128xbf16, #tpu.memory_space<vmem>>, %arg4: memref<1x128xf32, #tpu.memory_space<vmem>>, %arg5: memref<32x128xbf16, #tpu.memory_space<vmem>>, %arg6: memref<32x128xf32, #tpu.memory_space<vmem>>) attributes {dimension_semantics = [#tpu.dimension_semantics<parallel>, #tpu.dimension_semantics<arbitrary>], iteration_bounds = array<i64: 1, 1>, scalar_prefetch = 0 : i64, scratch_operands = 1 : i64, tpu.core_type = #tpu.core_type<tc>, window_params = [{transform_indices = @transform_0, window_bounds = array<i64: 32, 384>}, {transform_indices = @transform_1, window_bounds = array<i64: 384, 128>}, {pipeline_mode = #tpu.pipeline_mode<synchronous>, transform_indices = @transform_2, window_bounds = array<i64: 1, 128>}, {transform_indices = @transform_3, window_bounds = array<i64: 32, 128>}]} {
    %c0_i32 = arith.constant 0 : i32
    %0 = arith.cmpi eq, %arg1, %c0_i32 : i32
    %1 = arith.extui %0 : i1 to i32
    %c0_i32_0 = arith.constant 0 : i32
    %2 = arith.cmpi ne, %1, %c0_i32_0 : i32
    scf.if %2 {
      %cst_10 = arith.constant 0.000000e+00 : f32
      %12 = vector.broadcast %cst_10 : f32 to vector<32x128xf32>
      %c0_11 = arith.constant 0 : index
      %c0_12 = arith.constant 0 : index
      %13 = vector.load %arg6[%c0_11, %c0_12] : memref<32x128xf32, #tpu.memory_space<vmem>>, vector<32x128xf32>
      tpu.vector_store %arg6[%c0_11, %c0_12], %12 {strides = array<i32>} : memref<32x128xf32, #tpu.memory_space<vmem>>, vector<32x128xf32>,
    } else {
    }
    %c0 = arith.constant 0 : index
    %c0_1 = arith.constant 0 : index
    %3 = vector.load %arg6[%c0, %c0_1] : memref<32x128xf32, #tpu.memory_space<vmem>>, vector<32x128xf32>
    %c0_2 = arith.constant 0 : index
    %c0_3 = arith.constant 0 : index
    %4 = vector.load %arg2[%c0_2, %c0_3] : memref<32x384xbf16, #tpu.memory_space<vmem>>, vector<32x384xbf16>
    %c0_4 = arith.constant 0 : index
    %c0_5 = arith.constant 0 : index
    %5 = vector.load %arg3[%c0_4, %c0_5] : memref<384x128xbf16, #tpu.memory_space<vmem>>, vector<384x128xbf16>
    %cst = arith.constant dense<0.000000e+00> : vector<32x128xf32>
    %6 = tpu.matmul %4, %5, %cst {dimension_numbers = #tpu.dot_dimension_numbers<[1], [0], [0], [1], [0, 0, 1, 1], [], []>} : vector<32x384xbf16>, vector<384x128xbf16>, vector<32x128xf32> -> vector<32x128xf32>
    %7 = arith.addf %3, %6 : vector<32x128xf32>
    %c0_6 = arith.constant 0 : index
    %c0_7 = arith.constant 0 : index
    %8 = vector.load %arg6[%c0_6, %c0_7] : memref<32x128xf32, #tpu.memory_space<vmem>>, vector<32x128xf32>
    tpu.vector_store %arg6[%c0_6, %c0_7], %7 {strides = array<i32>} : memref<32x128xf32, #tpu.memory_space<vmem>>, vector<32x128xf32>,
    %c0_i32_8 = arith.constant 0 : i32
    %9 = arith.cmpi eq, %arg1, %c0_i32_8 : i32
    %10 = arith.extui %9 : i1 to i32
    %c0_i32_9 = arith.constant 0 : i32
    %11 = arith.cmpi ne, %10, %c0_i32_9 : i32
    scf.if %11 {
      %c0_10 = arith.constant 0 : index
      %c0_11 = arith.constant 0 : index
      %12 = vector.load %arg6[%c0_10, %c0_11] : memref<32x128xf32, #tpu.memory_space<vmem>>, vector<32x128xf32>
      %c0_12 = arith.constant 0 : index
      %c0_13 = arith.constant 0 : index
      %13 = vector.load %arg4[%c0_12, %c0_13] : memref<1x128xf32, #tpu.memory_space<vmem>>, vector<1x128xf32>
      %14 = vector.broadcast %13 : vector<1x128xf32> to vector<32x128xf32>
      %15 = arith.addf %12, %14 : vector<32x128xf32>
      %cst_14 = arith.constant 0.000000e+00 : f32
      %16 = vector.broadcast %cst_14 : f32 to vector<32x128xf32>
      %17 = arith.maximumf %15, %16 : vector<32x128xf32>
      %18 = arith.truncf %17 : vector<32x128xf32> to vector<32x128xbf16>
      %c0_15 = arith.constant 0 : index
      %c0_16 = arith.constant 0 : index
      %19 = vector.load %arg5[%c0_15, %c0_16] : memref<32x128xbf16, #tpu.memory_space<vmem>>, vector<32x128xbf16>
      tpu.vector_store %arg5[%c0_15, %c0_16], %18 {strides = array<i32>} : memref<32x128xbf16, #tpu.memory_space<vmem>>, vector<32x128xbf16>,
    } else {
    }
    return
  }
  func.func @transform_0(%arg0: i32, %arg1: i32) -> (i32, i32) {
    %c0_i32 = arith.constant 0 : i32
    return %arg0, %arg1 : i32, i32
  }
  func.func @transform_1(%arg0: i32, %arg1: i32) -> (i32, i32) {
    %c0_i32 = arith.constant 0 : i32
    %c0_i32_0 = arith.constant 0 : i32
    return %arg1, %c0_i32 : i32, i32
  }
  func.func @transform_2(%arg0: i32, %arg1: i32) -> (i32, i32) {
    %c0_i32 = arith.constant 0 : i32
    %c0_i32_0 = arith.constant 0 : i32
    %c0_i32_1 = arith.constant 0 : i32
    return %c0_i32, %c0_i32_0 : i32, i32
  }
  func.func @transform_3(%arg0: i32, %arg1: i32) -> (i32, i32) {
    %c0_i32 = arith.constant 0 : i32
    %c0_i32_0 = arith.constant 0 : i32
    return %arg0, %c0_i32 : i32, i32
  }
}

module attributes {stable_mosaic.version = 11 : i64} {
  func.func @_matmul_bias_kernel(%arg0: i32, %arg1: i32, %arg2: memref<32x128xbf16, #tpu.memory_space<vmem>>, %arg3: memref<128x128xbf16, #tpu.memory_space<vmem>>, %arg4: memref<1x128xf32, #tpu.memory_space<vmem>>, %arg5: memref<32x128xf32, #tpu.memory_space<vmem>>, %arg6: memref<32x128xf32, #tpu.memory_space<vmem>>) attributes {dimension_semantics = [#tpu.dimension_semantics<parallel>, #tpu.dimension_semantics<arbitrary>], iteration_bounds = array<i64: 1, 1>, scalar_prefetch = 0 : i64, scratch_operands = 1 : i64, tpu.core_type = #tpu.core_type<tc>, window_params = [{transform_indices = @transform_0, window_bounds = array<i64: 32, 128>}, {transform_indices = @transform_1, window_bounds = array<i64: 128, 128>}, {pipeline_mode = #tpu.pipeline_mode<synchronous>, transform_indices = @transform_2, window_bounds = array<i64: 1, 128>}, {transform_indices = @transform_3, window_bounds = array<i64: 32, 128>}]} {
    %c0_i32 = arith.constant 0 : i32
    %0 = arith.cmpi eq, %arg1, %c0_i32 : i32
    %1 = arith.extui %0 : i1 to i32
    %c0_i32_0 = arith.constant 0 : i32
    %2 = arith.cmpi ne, %1, %c0_i32_0 : i32
    scf.if %2 {
      %cst_10 = arith.constant 0.000000e+00 : f32
      %12 = vector.broadcast %cst_10 : f32 to vector<32x128xf32>
      %c0_11 = arith.constant 0 : index
      %c0_12 = arith.constant 0 : index
      %13 = vector.load %arg6[%c0_11, %c0_12] : memref<32x128xf32, #tpu.memory_space<vmem>>, vector<32x128xf32>
      tpu.vector_store %arg6[%c0_11, %c0_12], %12 {strides = array<i32>} : memref<32x128xf32, #tpu.memory_space<vmem>>, vector<32x128xf32>,
    } else {
    }
    %c0 = arith.constant 0 : index
    %c0_1 = arith.constant 0 : index
    %3 = vector.load %arg6[%c0, %c0_1] : memref<32x128xf32, #tpu.memory_space<vmem>>, vector<32x128xf32>
    %c0_2 = arith.constant 0 : index
    %c0_3 = arith.constant 0 : index
    %4 = vector.load %arg2[%c0_2, %c0_3] : memref<32x128xbf16, #tpu.memory_space<vmem>>, vector<32x128xbf16>
    %c0_4 = arith.constant 0 : index
    %c0_5 = arith.constant 0 : index
    %5 = vector.load %arg3[%c0_4, %c0_5] : memref<128x128xbf16, #tpu.memory_space<vmem>>, vector<128x128xbf16>
    %cst = arith.constant dense<0.000000e+00> : vector<32x128xf32>
    %6 = tpu.matmul %4, %5, %cst {dimension_numbers = #tpu.dot_dimension_numbers<[1], [0], [0], [1], [0, 0, 1, 1], [], []>} : vector<32x128xbf16>, vector<128x128xbf16>, vector<32x128xf32> -> vector<32x128xf32>
    %7 = arith.addf %3, %6 : vector<32x128xf32>
    %c0_6 = arith.constant 0 : index
    %c0_7 = arith.constant 0 : index
    %8 = vector.load %arg6[%c0_6, %c0_7] : memref<32x128xf32, #tpu.memory_space<vmem>>, vector<32x128xf32>
    tpu.vector_store %arg6[%c0_6, %c0_7], %7 {strides = array<i32>} : memref<32x128xf32, #tpu.memory_space<vmem>>, vector<32x128xf32>,
    %c0_i32_8 = arith.constant 0 : i32
    %9 = arith.cmpi eq, %arg1, %c0_i32_8 : i32
    %10 = arith.extui %9 : i1 to i32
    %c0_i32_9 = arith.constant 0 : i32
    %11 = arith.cmpi ne, %10, %c0_i32_9 : i32
    scf.if %11 {
      %c0_10 = arith.constant 0 : index
      %c0_11 = arith.constant 0 : index
      %12 = vector.load %arg6[%c0_10, %c0_11] : memref<32x128xf32, #tpu.memory_space<vmem>>, vector<32x128xf32>
      %c0_12 = arith.constant 0 : index
      %c0_13 = arith.constant 0 : index
      %13 = vector.load %arg4[%c0_12, %c0_13] : memref<1x128xf32, #tpu.memory_space<vmem>>, vector<1x128xf32>
      %14 = vector.broadcast %13 : vector<1x128xf32> to vector<32x128xf32>
      %15 = arith.addf %12, %14 : vector<32x128xf32>
      %c0_14 = arith.constant 0 : index
      %c0_15 = arith.constant 0 : index
      %16 = vector.load %arg5[%c0_14, %c0_15] : memref<32x128xf32, #tpu.memory_space<vmem>>, vector<32x128xf32>
      tpu.vector_store %arg5[%c0_14, %c0_15], %15 {strides = array<i32>} : memref<32x128xf32, #tpu.memory_space<vmem>>, vector<32x128xf32>,
    } else {
    }
    return
  }
  func.func @transform_0(%arg0: i32, %arg1: i32) -> (i32, i32) {
    %c0_i32 = arith.constant 0 : i32
    return %arg0, %arg1 : i32, i32
  }
  func.func @transform_1(%arg0: i32, %arg1: i32) -> (i32, i32) {
    %c0_i32 = arith.constant 0 : i32
    %c0_i32_0 = arith.constant 0 : i32
    return %arg1, %c0_i32 : i32, i32
  }
  func.func @transform_2(%arg0: i32, %arg1: i32) -> (i32, i32) {
    %c0_i32 = arith.constant 0 : i32
    %c0_i32_0 = arith.constant 0 : i32
    %c0_i32_1 = arith.constant 0 : i32
    return %c0_i32, %c0_i32_0 : i32, i32
  }
  func.func @transform_3(%arg0: i32, %arg1: i32) -> (i32, i32) {
    %c0_i32 = arith.constant 0 : i32
    %c0_i32_0 = arith.constant 0 : i32
    return %arg0, %c0_i32 : i32, i32
  }
}

module attributes {stable_mosaic.version = 11 : i64} {
  func.func @_vq_kernel(%arg0: i32, %arg1: memref<32x128xf32, #tpu.memory_space<vmem>>, %arg2: memref<128x1024xf32, #tpu.memory_space<vmem>>, %arg3: memref<32x128xf32, #tpu.memory_space<vmem>>, %arg4: memref<1x128xf32, #tpu.memory_space<vmem>>) attributes {dimension_semantics = [#tpu.dimension_semantics<arbitrary>], iteration_bounds = array<i64: 1>, scalar_prefetch = 0 : i64, scratch_operands = 0 : i64, tpu.core_type = #tpu.core_type<tc>, window_params = [{transform_indices = @transform_0, window_bounds = array<i64: 32, 128>}, {pipeline_mode = #tpu.pipeline_mode<synchronous>, transform_indices = @transform_1, window_bounds = array<i64: 128, 1024>}, {transform_indices = @transform_2, window_bounds = array<i64: 32, 128>}, {pipeline_mode = #tpu.pipeline_mode<synchronous>, transform_indices = @transform_3, window_bounds = array<i64: 1, 128>}]} {
    %c0_i32 = arith.constant 0 : i32
    %0 = arith.cmpi eq, %arg0, %c0_i32 : i32
    %1 = arith.extui %0 : i1 to i32
    %c0_i32_0 = arith.constant 0 : i32
    %2 = arith.cmpi ne, %1, %c0_i32_0 : i32
    scf.if %2 {
      %cst_17 = arith.constant 0.000000e+00 : f32
      %50 = vector.broadcast %cst_17 : f32 to vector<1x128xf32>
      %c0_18 = arith.constant 0 : index
      %c0_19 = arith.constant 0 : index
      %51 = vector.load %arg4[%c0_18, %c0_19] : memref<1x128xf32, #tpu.memory_space<vmem>>, vector<1x128xf32>
      tpu.vector_store %arg4[%c0_18, %c0_19], %50 {strides = array<i32>} : memref<1x128xf32, #tpu.memory_space<vmem>>, vector<1x128xf32>,
    } else {
    }
    %c0 = arith.constant 0 : index
    %c0_1 = arith.constant 0 : index
    %3 = vector.load %arg1[%c0, %c0_1] : memref<32x128xf32, #tpu.memory_space<vmem>>, vector<32x128xf32>
    %c0_2 = arith.constant 0 : index
    %c0_3 = arith.constant 0 : index
    %4 = vector.load %arg2[%c0_2, %c0_3] : memref<128x1024xf32, #tpu.memory_space<vmem>>, vector<128x1024xf32>
    %5 = arith.mulf %4, %4 : vector<128x1024xf32>
    %cst = arith.constant dense<0.000000e+00> : vector<1024xf32>
    %6 = vector.multi_reduction <add>, %5, %cst [0] : vector<128x1024xf32> to vector<1024xf32>
    %7 = vector.shape_cast %6 : vector<1024xf32> to vector<1x1024xf32>
    %8 = arith.truncf %3 : vector<32x128xf32> to vector<32x128xbf16>
    %9 = arith.truncf %4 : vector<128x1024xf32> to vector<128x1024xbf16>
    %cst_4 = arith.constant dense<0.000000e+00> : vector<32x1024xf32>
    %10 = tpu.matmul %8, %9, %cst_4 {dimension_numbers = #tpu.dot_dimension_numbers<[1], [0], [0], [1], [0, 0, 1, 1], [], []>} : vector<32x128xbf16>, vector<128x1024xbf16>, vector<32x1024xf32> -> vector<32x1024xf32>
    %cst_5 = arith.constant 2.000000e+00 : f32
    %11 = vector.broadcast %cst_5 : f32 to vector<32x1024xf32>
    %12 = arith.mulf %11, %10 : vector<32x1024xf32>
    %13 = vector.broadcast %7 : vector<1x1024xf32> to vector<32x1024xf32>
    %14 = arith.subf %13, %12 : vector<32x1024xf32>
    %15 = tpu.iota {dimensions = array<i32: 1>} : vector<32x1024xi32>
    %cst_6 = arith.constant dense<0x7F800000> : vector<32xf32>
    %16 = vector.multi_reduction <minimumf>, %14, %cst_6 [1] : vector<32x1024xf32> to vector<32xf32>
    %17 = vector.shape_cast %16 : vector<32xf32> to vector<32x1xf32>
    %18 = vector.broadcast %17 : vector<32x1xf32> to vector<32x1024xf32>
    %19 = arith.cmpf ole, %14, %18 : vector<32x1024xf32>
    %c1024_i32 = arith.constant 1024 : i32
    %20 = vector.broadcast %c1024_i32 : i32 to vector<32x1024xi32>
    %21 = arith.select %19, %15, %20 : vector<32x1024xi1>, vector<32x1024xi32>
    %cst_7 = arith.constant dense<2147483647> : vector<32xi32>
    %22 = vector.multi_reduction <minsi>, %21, %cst_7 [1] : vector<32x1024xi32> to vector<32xi32>
    %23 = vector.shape_cast %22 : vector<32xi32> to vector<32x1xi32>
    %24 = vector.broadcast %23 : vector<32x1xi32> to vector<32x1024xi32>
    %25 = arith.cmpi eq, %15, %24 : vector<32x1024xi32>
    %26 = arith.extui %25 : vector<32x1024xi1> to vector<32x1024xi32>
    %27 = arith.sitofp %26 : vector<32x1024xi32> to vector<32x1024xf32>
    %cst_8 = arith.constant dense<0.000000e+00> : vector<32x128xf32>
    %28 = tpu.matmul %27, %4, %cst_8 {dimension_numbers = #tpu.dot_dimension_numbers<[1], [1], [0], [0], [0, 0, 1, 0], [], []>} : vector<32x1024xf32>, vector<128x1024xf32>, vector<32x128xf32> -> vector<32x128xf32>
    %c0_9 = arith.constant 0 : index
    %c0_10 = arith.constant 0 : index
    %29 = vector.load %arg3[%c0_9, %c0_10] : memref<32x128xf32, #tpu.memory_space<vmem>>, vector<32x128xf32>
    tpu.vector_store %arg3[%c0_9, %c0_10], %28 {strides = array<i32>} : memref<32x128xf32, #tpu.memory_space<vmem>>, vector<32x128xf32>,
    %c32_i32 = arith.constant 32 : i32
    %30 = arith.muli %arg0, %c32_i32 : i32
    %31 = tpu.iota {dimensions = array<i32: 0>} : vector<32x1xi32>
    %32 = vector.broadcast %30 : i32 to vector<32x1xi32>
    %33 = arith.addi %32, %31 : vector<32x1xi32>
    %c32_i32_11 = arith.constant 32 : i32
    %34 = vector.broadcast %c32_i32_11 : i32 to vector<32x1xi32>
    %35 = arith.cmpi slt, %33, %34 : vector<32x1xi32>
    %36 = arith.extui %35 : vector<32x1xi1> to vector<32x1xi32>
    %37 = arith.sitofp %36 : vector<32x1xi32> to vector<32x1xf32>
    %38 = arith.subf %28, %3 : vector<32x128xf32>
    %39 = vector.broadcast %37 : vector<32x1xf32> to vector<32x128xf32>
    %40 = arith.mulf %38, %39 : vector<32x128xf32>
    %c0_12 = arith.constant 0 : index
    %c0_13 = arith.constant 0 : index
    %41 = vector.load %arg4[%c0_12, %c0_13] : memref<1x128xf32, #tpu.memory_space<vmem>>, vector<1x128xf32>
    %42 = arith.mulf %40, %40 : vector<32x128xf32>
    %43 = vector.shape_cast %42 : vector<32x128xf32> to vector<1x32x128xf32>
    %cst_14 = arith.constant dense<0.000000e+00> : vector<1xf32>
    %44 = vector.multi_reduction <add>, %43, %cst_14 [1, 2] : vector<1x32x128xf32> to vector<1xf32>
    %45 = vector.shape_cast %44 : vector<1xf32> to vector<1x1x1xf32>
    %46 = vector.extract %45[0, 0, 0] : f32 from vector<1x1x1xf32>
    %47 = vector.broadcast %46 : f32 to vector<1x128xf32>
    %48 = arith.addf %41, %47 : vector<1x128xf32>
    %c0_15 = arith.constant 0 : index
    %c0_16 = arith.constant 0 : index
    %49 = vector.load %arg4[%c0_15, %c0_16] : memref<1x128xf32, #tpu.memory_space<vmem>>, vector<1x128xf32>
    tpu.vector_store %arg4[%c0_15, %c0_16], %48 {strides = array<i32>} : memref<1x128xf32, #tpu.memory_space<vmem>>, vector<1x128xf32>,
    return
  }
  func.func @transform_0(%arg0: i32) -> (i32, i32) {
    %c0_i32 = arith.constant 0 : i32
    %c0_i32_0 = arith.constant 0 : i32
    return %arg0, %c0_i32 : i32, i32
  }
  func.func @transform_1(%arg0: i32) -> (i32, i32) {
    %c0_i32 = arith.constant 0 : i32
    %c0_i32_0 = arith.constant 0 : i32
    %c0_i32_1 = arith.constant 0 : i32
    return %c0_i32, %c0_i32_0 : i32, i32
  }
  func.func @transform_2(%arg0: i32) -> (i32, i32) {
    %c0_i32 = arith.constant 0 : i32
    %c0_i32_0 = arith.constant 0 : i32
    return %arg0, %c0_i32 : i32, i32
  }
  func.func @transform_3(%arg0: i32) -> (i32, i32) {
    %c0_i32 = arith.constant 0 : i32
    %c0_i32_0 = arith.constant 0 : i32
    %c0_i32_1 = arith.constant 0 : i32
    return %c0_i32, %c0_i32_0 : i32, i32
  }
}

module attributes {stable_mosaic.version = 11 : i64} {
  func.func @_matmul_bias_kernel(%arg0: i32, %arg1: i32, %arg2: memref<32x128xbf16, #tpu.memory_space<vmem>>, %arg3: memref<128x128xbf16, #tpu.memory_space<vmem>>, %arg4: memref<1x128xf32, #tpu.memory_space<vmem>>, %arg5: memref<32x128xbf16, #tpu.memory_space<vmem>>, %arg6: memref<32x128xf32, #tpu.memory_space<vmem>>) attributes {dimension_semantics = [#tpu.dimension_semantics<parallel>, #tpu.dimension_semantics<arbitrary>], iteration_bounds = array<i64: 1, 1>, scalar_prefetch = 0 : i64, scratch_operands = 1 : i64, tpu.core_type = #tpu.core_type<tc>, window_params = [{transform_indices = @transform_0, window_bounds = array<i64: 32, 128>}, {transform_indices = @transform_1, window_bounds = array<i64: 128, 128>}, {pipeline_mode = #tpu.pipeline_mode<synchronous>, transform_indices = @transform_2, window_bounds = array<i64: 1, 128>}, {transform_indices = @transform_3, window_bounds = array<i64: 32, 128>}]} {
    %c0_i32 = arith.constant 0 : i32
    %0 = arith.cmpi eq, %arg1, %c0_i32 : i32
    %1 = arith.extui %0 : i1 to i32
    %c0_i32_0 = arith.constant 0 : i32
    %2 = arith.cmpi ne, %1, %c0_i32_0 : i32
    scf.if %2 {
      %cst_10 = arith.constant 0.000000e+00 : f32
      %12 = vector.broadcast %cst_10 : f32 to vector<32x128xf32>
      %c0_11 = arith.constant 0 : index
      %c0_12 = arith.constant 0 : index
      %13 = vector.load %arg6[%c0_11, %c0_12] : memref<32x128xf32, #tpu.memory_space<vmem>>, vector<32x128xf32>
      tpu.vector_store %arg6[%c0_11, %c0_12], %12 {strides = array<i32>} : memref<32x128xf32, #tpu.memory_space<vmem>>, vector<32x128xf32>,
    } else {
    }
    %c0 = arith.constant 0 : index
    %c0_1 = arith.constant 0 : index
    %3 = vector.load %arg6[%c0, %c0_1] : memref<32x128xf32, #tpu.memory_space<vmem>>, vector<32x128xf32>
    %c0_2 = arith.constant 0 : index
    %c0_3 = arith.constant 0 : index
    %4 = vector.load %arg2[%c0_2, %c0_3] : memref<32x128xbf16, #tpu.memory_space<vmem>>, vector<32x128xbf16>
    %c0_4 = arith.constant 0 : index
    %c0_5 = arith.constant 0 : index
    %5 = vector.load %arg3[%c0_4, %c0_5] : memref<128x128xbf16, #tpu.memory_space<vmem>>, vector<128x128xbf16>
    %cst = arith.constant dense<0.000000e+00> : vector<32x128xf32>
    %6 = tpu.matmul %4, %5, %cst {dimension_numbers = #tpu.dot_dimension_numbers<[1], [0], [0], [1], [0, 0, 1, 1], [], []>} : vector<32x128xbf16>, vector<128x128xbf16>, vector<32x128xf32> -> vector<32x128xf32>
    %7 = arith.addf %3, %6 : vector<32x128xf32>
    %c0_6 = arith.constant 0 : index
    %c0_7 = arith.constant 0 : index
    %8 = vector.load %arg6[%c0_6, %c0_7] : memref<32x128xf32, #tpu.memory_space<vmem>>, vector<32x128xf32>
    tpu.vector_store %arg6[%c0_6, %c0_7], %7 {strides = array<i32>} : memref<32x128xf32, #tpu.memory_space<vmem>>, vector<32x128xf32>,
    %c0_i32_8 = arith.constant 0 : i32
    %9 = arith.cmpi eq, %arg1, %c0_i32_8 : i32
    %10 = arith.extui %9 : i1 to i32
    %c0_i32_9 = arith.constant 0 : i32
    %11 = arith.cmpi ne, %10, %c0_i32_9 : i32
    scf.if %11 {
      %c0_10 = arith.constant 0 : index
      %c0_11 = arith.constant 0 : index
      %12 = vector.load %arg6[%c0_10, %c0_11] : memref<32x128xf32, #tpu.memory_space<vmem>>, vector<32x128xf32>
      %c0_12 = arith.constant 0 : index
      %c0_13 = arith.constant 0 : index
      %13 = vector.load %arg4[%c0_12, %c0_13] : memref<1x128xf32, #tpu.memory_space<vmem>>, vector<1x128xf32>
      %14 = vector.broadcast %13 : vector<1x128xf32> to vector<32x128xf32>
      %15 = arith.addf %12, %14 : vector<32x128xf32>
      %cst_14 = arith.constant 0.000000e+00 : f32
      %16 = vector.broadcast %cst_14 : f32 to vector<32x128xf32>
      %17 = arith.maximumf %15, %16 : vector<32x128xf32>
      %18 = arith.truncf %17 : vector<32x128xf32> to vector<32x128xbf16>
      %c0_15 = arith.constant 0 : index
      %c0_16 = arith.constant 0 : index
      %19 = vector.load %arg5[%c0_15, %c0_16] : memref<32x128xbf16, #tpu.memory_space<vmem>>, vector<32x128xbf16>
      tpu.vector_store %arg5[%c0_15, %c0_16], %18 {strides = array<i32>} : memref<32x128xbf16, #tpu.memory_space<vmem>>, vector<32x128xbf16>,
    } else {
    }
    return
  }
  func.func @transform_0(%arg0: i32, %arg1: i32) -> (i32, i32) {
    %c0_i32 = arith.constant 0 : i32
    return %arg0, %arg1 : i32, i32
  }
  func.func @transform_1(%arg0: i32, %arg1: i32) -> (i32, i32) {
    %c0_i32 = arith.constant 0 : i32
    %c0_i32_0 = arith.constant 0 : i32
    return %arg1, %c0_i32 : i32, i32
  }
  func.func @transform_2(%arg0: i32, %arg1: i32) -> (i32, i32) {
    %c0_i32 = arith.constant 0 : i32
    %c0_i32_0 = arith.constant 0 : i32
    %c0_i32_1 = arith.constant 0 : i32
    return %c0_i32, %c0_i32_0 : i32, i32
  }
  func.func @transform_3(%arg0: i32, %arg1: i32) -> (i32, i32) {
    %c0_i32 = arith.constant 0 : i32
    %c0_i32_0 = arith.constant 0 : i32
    return %arg0, %c0_i32 : i32, i32
  }
}

module attributes {stable_mosaic.version = 11 : i64} {
  func.func @_matmul_bias_kernel(%arg0: i32, %arg1: i32, %arg2: memref<128x256xbf16, #tpu.memory_space<vmem>>, %arg3: memref<256x128xbf16, #tpu.memory_space<vmem>>, %arg4: memref<1x128xf32, #tpu.memory_space<vmem>>, %arg5: memref<128x128xbf16, #tpu.memory_space<vmem>>, %arg6: memref<128x128xf32, #tpu.memory_space<vmem>>) attributes {dimension_semantics = [#tpu.dimension_semantics<parallel>, #tpu.dimension_semantics<arbitrary>], iteration_bounds = array<i64: 1, 1>, scalar_prefetch = 0 : i64, scratch_operands = 1 : i64, tpu.core_type = #tpu.core_type<tc>, window_params = [{transform_indices = @transform_0, window_bounds = array<i64: 128, 256>}, {transform_indices = @transform_1, window_bounds = array<i64: 256, 128>}, {pipeline_mode = #tpu.pipeline_mode<synchronous>, transform_indices = @transform_2, window_bounds = array<i64: 1, 128>}, {transform_indices = @transform_3, window_bounds = array<i64: 128, 128>}]} {
    %c0_i32 = arith.constant 0 : i32
    %0 = arith.cmpi eq, %arg1, %c0_i32 : i32
    %1 = arith.extui %0 : i1 to i32
    %c0_i32_0 = arith.constant 0 : i32
    %2 = arith.cmpi ne, %1, %c0_i32_0 : i32
    scf.if %2 {
      %cst_10 = arith.constant 0.000000e+00 : f32
      %12 = vector.broadcast %cst_10 : f32 to vector<128x128xf32>
      %c0_11 = arith.constant 0 : index
      %c0_12 = arith.constant 0 : index
      %13 = vector.load %arg6[%c0_11, %c0_12] : memref<128x128xf32, #tpu.memory_space<vmem>>, vector<128x128xf32>
      tpu.vector_store %arg6[%c0_11, %c0_12], %12 {strides = array<i32>} : memref<128x128xf32, #tpu.memory_space<vmem>>, vector<128x128xf32>,
    } else {
    }
    %c0 = arith.constant 0 : index
    %c0_1 = arith.constant 0 : index
    %3 = vector.load %arg6[%c0, %c0_1] : memref<128x128xf32, #tpu.memory_space<vmem>>, vector<128x128xf32>
    %c0_2 = arith.constant 0 : index
    %c0_3 = arith.constant 0 : index
    %4 = vector.load %arg2[%c0_2, %c0_3] : memref<128x256xbf16, #tpu.memory_space<vmem>>, vector<128x256xbf16>
    %c0_4 = arith.constant 0 : index
    %c0_5 = arith.constant 0 : index
    %5 = vector.load %arg3[%c0_4, %c0_5] : memref<256x128xbf16, #tpu.memory_space<vmem>>, vector<256x128xbf16>
    %cst = arith.constant dense<0.000000e+00> : vector<128x128xf32>
    %6 = tpu.matmul %4, %5, %cst {dimension_numbers = #tpu.dot_dimension_numbers<[1], [0], [0], [1], [0, 0, 1, 1], [], []>} : vector<128x256xbf16>, vector<256x128xbf16>, vector<128x128xf32> -> vector<128x128xf32>
    %7 = arith.addf %3, %6 : vector<128x128xf32>
    %c0_6 = arith.constant 0 : index
    %c0_7 = arith.constant 0 : index
    %8 = vector.load %arg6[%c0_6, %c0_7] : memref<128x128xf32, #tpu.memory_space<vmem>>, vector<128x128xf32>
    tpu.vector_store %arg6[%c0_6, %c0_7], %7 {strides = array<i32>} : memref<128x128xf32, #tpu.memory_space<vmem>>, vector<128x128xf32>,
    %c0_i32_8 = arith.constant 0 : i32
    %9 = arith.cmpi eq, %arg1, %c0_i32_8 : i32
    %10 = arith.extui %9 : i1 to i32
    %c0_i32_9 = arith.constant 0 : i32
    %11 = arith.cmpi ne, %10, %c0_i32_9 : i32
    scf.if %11 {
      %c0_10 = arith.constant 0 : index
      %c0_11 = arith.constant 0 : index
      %12 = vector.load %arg6[%c0_10, %c0_11] : memref<128x128xf32, #tpu.memory_space<vmem>>, vector<128x128xf32>
      %c0_12 = arith.constant 0 : index
      %c0_13 = arith.constant 0 : index
      %13 = vector.load %arg4[%c0_12, %c0_13] : memref<1x128xf32, #tpu.memory_space<vmem>>, vector<1x128xf32>
      %14 = vector.broadcast %13 : vector<1x128xf32> to vector<128x128xf32>
      %15 = arith.addf %12, %14 : vector<128x128xf32>
      %cst_14 = arith.constant 0.000000e+00 : f32
      %16 = vector.broadcast %cst_14 : f32 to vector<128x128xf32>
      %17 = arith.maximumf %15, %16 : vector<128x128xf32>
      %18 = arith.truncf %17 : vector<128x128xf32> to vector<128x128xbf16>
      %c0_15 = arith.constant 0 : index
      %c0_16 = arith.constant 0 : index
      %19 = vector.load %arg5[%c0_15, %c0_16] : memref<128x128xbf16, #tpu.memory_space<vmem>>, vector<128x128xbf16>
      tpu.vector_store %arg5[%c0_15, %c0_16], %18 {strides = array<i32>} : memref<128x128xbf16, #tpu.memory_space<vmem>>, vector<128x128xbf16>,
    } else {
    }
    return
  }
  func.func @transform_0(%arg0: i32, %arg1: i32) -> (i32, i32) {
    %c0_i32 = arith.constant 0 : i32
    return %arg0, %arg1 : i32, i32
  }
  func.func @transform_1(%arg0: i32, %arg1: i32) -> (i32, i32) {
    %c0_i32 = arith.constant 0 : i32
    %c0_i32_0 = arith.constant 0 : i32
    return %arg1, %c0_i32 : i32, i32
  }
  func.func @transform_2(%arg0: i32, %arg1: i32) -> (i32, i32) {
    %c0_i32 = arith.constant 0 : i32
    %c0_i32_0 = arith.constant 0 : i32
    %c0_i32_1 = arith.constant 0 : i32
    return %c0_i32, %c0_i32_0 : i32, i32
  }
  func.func @transform_3(%arg0: i32, %arg1: i32) -> (i32, i32) {
    %c0_i32 = arith.constant 0 : i32
    %c0_i32_0 = arith.constant 0 : i32
    return %arg0, %c0_i32 : i32, i32
  }
}

module attributes {stable_mosaic.version = 11 : i64} {
  func.func @_matmul_bias_kernel(%arg0: i32, %arg1: i32, %arg2: memref<512x384xbf16, #tpu.memory_space<vmem>>, %arg3: memref<384x128xbf16, #tpu.memory_space<vmem>>, %arg4: memref<1x128xf32, #tpu.memory_space<vmem>>, %arg5: memref<512x128xf32, #tpu.memory_space<vmem>>, %arg6: memref<512x128xf32, #tpu.memory_space<vmem>>) attributes {dimension_semantics = [#tpu.dimension_semantics<parallel>, #tpu.dimension_semantics<arbitrary>], iteration_bounds = array<i64: 1, 1>, scalar_prefetch = 0 : i64, scratch_operands = 1 : i64, tpu.core_type = #tpu.core_type<tc>, window_params = [{transform_indices = @transform_0, window_bounds = array<i64: 512, 384>}, {transform_indices = @transform_1, window_bounds = array<i64: 384, 128>}, {pipeline_mode = #tpu.pipeline_mode<synchronous>, transform_indices = @transform_2, window_bounds = array<i64: 1, 128>}, {transform_indices = @transform_3, window_bounds = array<i64: 512, 128>}]} {
    %c0_i32 = arith.constant 0 : i32
    %0 = arith.cmpi eq, %arg1, %c0_i32 : i32
    %1 = arith.extui %0 : i1 to i32
    %c0_i32_0 = arith.constant 0 : i32
    %2 = arith.cmpi ne, %1, %c0_i32_0 : i32
    scf.if %2 {
      %cst_10 = arith.constant 0.000000e+00 : f32
      %12 = vector.broadcast %cst_10 : f32 to vector<512x128xf32>
      %c0_11 = arith.constant 0 : index
      %c0_12 = arith.constant 0 : index
      %13 = vector.load %arg6[%c0_11, %c0_12] : memref<512x128xf32, #tpu.memory_space<vmem>>, vector<512x128xf32>
      tpu.vector_store %arg6[%c0_11, %c0_12], %12 {strides = array<i32>} : memref<512x128xf32, #tpu.memory_space<vmem>>, vector<512x128xf32>,
    } else {
    }
    %c0 = arith.constant 0 : index
    %c0_1 = arith.constant 0 : index
    %3 = vector.load %arg6[%c0, %c0_1] : memref<512x128xf32, #tpu.memory_space<vmem>>, vector<512x128xf32>
    %c0_2 = arith.constant 0 : index
    %c0_3 = arith.constant 0 : index
    %4 = vector.load %arg2[%c0_2, %c0_3] : memref<512x384xbf16, #tpu.memory_space<vmem>>, vector<512x384xbf16>
    %c0_4 = arith.constant 0 : index
    %c0_5 = arith.constant 0 : index
    %5 = vector.load %arg3[%c0_4, %c0_5] : memref<384x128xbf16, #tpu.memory_space<vmem>>, vector<384x128xbf16>
    %cst = arith.constant dense<0.000000e+00> : vector<512x128xf32>
    %6 = tpu.matmul %4, %5, %cst {dimension_numbers = #tpu.dot_dimension_numbers<[1], [0], [0], [1], [0, 0, 1, 1], [], []>} : vector<512x384xbf16>, vector<384x128xbf16>, vector<512x128xf32> -> vector<512x128xf32>
    %7 = arith.addf %3, %6 : vector<512x128xf32>
    %c0_6 = arith.constant 0 : index
    %c0_7 = arith.constant 0 : index
    %8 = vector.load %arg6[%c0_6, %c0_7] : memref<512x128xf32, #tpu.memory_space<vmem>>, vector<512x128xf32>
    tpu.vector_store %arg6[%c0_6, %c0_7], %7 {strides = array<i32>} : memref<512x128xf32, #tpu.memory_space<vmem>>, vector<512x128xf32>,
    %c0_i32_8 = arith.constant 0 : i32
    %9 = arith.cmpi eq, %arg1, %c0_i32_8 : i32
    %10 = arith.extui %9 : i1 to i32
    %c0_i32_9 = arith.constant 0 : i32
    %11 = arith.cmpi ne, %10, %c0_i32_9 : i32
    scf.if %11 {
      %c0_10 = arith.constant 0 : index
      %c0_11 = arith.constant 0 : index
      %12 = vector.load %arg6[%c0_10, %c0_11] : memref<512x128xf32, #tpu.memory_space<vmem>>, vector<512x128xf32>
      %c0_12 = arith.constant 0 : index
      %c0_13 = arith.constant 0 : index
      %13 = vector.load %arg4[%c0_12, %c0_13] : memref<1x128xf32, #tpu.memory_space<vmem>>, vector<1x128xf32>
      %14 = vector.broadcast %13 : vector<1x128xf32> to vector<512x128xf32>
      %15 = arith.addf %12, %14 : vector<512x128xf32>
      %c0_14 = arith.constant 0 : index
      %c0_15 = arith.constant 0 : index
      %16 = vector.load %arg5[%c0_14, %c0_15] : memref<512x128xf32, #tpu.memory_space<vmem>>, vector<512x128xf32>
      tpu.vector_store %arg5[%c0_14, %c0_15], %15 {strides = array<i32>} : memref<512x128xf32, #tpu.memory_space<vmem>>, vector<512x128xf32>,
    } else {
    }
    return
  }
  func.func @transform_0(%arg0: i32, %arg1: i32) -> (i32, i32) {
    %c0_i32 = arith.constant 0 : i32
    return %arg0, %arg1 : i32, i32
  }
  func.func @transform_1(%arg0: i32, %arg1: i32) -> (i32, i32) {
    %c0_i32 = arith.constant 0 : i32
    %c0_i32_0 = arith.constant 0 : i32
    return %arg1, %c0_i32 : i32, i32
  }
  func.func @transform_2(%arg0: i32, %arg1: i32) -> (i32, i32) {
    %c0_i32 = arith.constant 0 : i32
    %c0_i32_0 = arith.constant 0 : i32
    %c0_i32_1 = arith.constant 0 : i32
    return %c0_i32, %c0_i32_0 : i32, i32
  }
  func.func @transform_3(%arg0: i32, %arg1: i32) -> (i32, i32) {
    %c0_i32 = arith.constant 0 : i32
    %c0_i32_0 = arith.constant 0 : i32
    return %arg0, %c0_i32 : i32, i32
  }
}

</mosaic_0001>

<bundles_post_ra>
// kernel: _lambda_.13
= control target key start
LH: loop header
LB: loop body
LE: loop exit
PB: predicated region body
PF: predicated region fallthrough
CT: control target
= control target key end

     0   :  { %s721_s1 = inlined_call_operand.vmem [shape: bf16[128,128], index: 1, kind: input, shape index: {}]   ;;  %s722_s0 = inlined_call_operand.vmem [shape: bf16[128,128], index: 0, kind: input, shape index: {}]   ;;  %s723_s2 = inlined_call_operand.vmem [shape: f32[1,128], index: 2, kind: input, shape index: {}]   ;;  %s724_s3 = inlined_call_operand.vmem [shape: bf16[128,128], index: 3, kind: output, shape index: {}]  }
   0x1   :  { %v610_v0 = vld [vmem:[%s721_s1] sm:$0xff]   ;;  %v611_v1 = vld [vmem:[%s721_s1 + $0x8] sm:$0xff]   ;;  %v612_v2 = vld [vmem:[%s721_s1 + $0x10] sm:$0xff]  }
   0x2   :  { %562 = vmatprep.subr.bf16.mxu0 %v610_v0  ;;  %594 = vmatprep.subr.bf16.mxu1 %v610_v0  ;;  %v613_v3 = vld [vmem:[%s721_s1 + $0x18] sm:$0xff]   ;;  %v618_v4 = vld [vmem:[%s722_s0] sm:$0xff]   ;;  %v615_v7 = vld [vmem:[%s721_s1 + $0x28] sm:$0xff]  }
   0x3   :  { %563 = vmatpush3.bf16.msra.mxu0 %v610_v0  ;;  %602 = vmatpush3.bf16.msra.mxu1 %v610_v0  ;;  %v619_v5 = vld [vmem:[%s722_s0 + $0x20] sm:$0xff]   ;;  %v616_v8 = vld [vmem:[%s721_s1 + $0x30] sm:$0xff]   ;;  %v617_v9 = vld [vmem:[%s721_s1 + $0x38] sm:$0xff]  }
   0x4   :  { %564 = vmatprep.subr.bf16.mxu0 %v611_v1  ;;  %595 = vmatprep.subr.bf16.mxu1 %v611_v1  ;;  %v614_v6 = vld [vmem:[%s721_s1 + $0x20] sm:$0xff]   ;;  %v620_v10 = vld [vmem:[%s722_s0 + $0x8] sm:$0xff]   ;;  %v622_v12 = vld [vmem:[%s722_s0 + $0x10] sm:$0xff]  }
   0x5   :  { %578 = vmatprep.mubr.bf16.mxu0 %v618_v4  ;;  %586 = vmatprep.mubr.bf16.mxu1 %v619_v5  ;;  %v621_v11 = vld [vmem:[%s722_s0 + $0x28] sm:$0xff]   ;;  %v623_v13 = vld [vmem:[%s722_s0 + $0x30] sm:$0xff]   ;;  %v624_v14 = vld [vmem:[%s722_s0 + $0x18] sm:$0xff]  }
   0x6   :  { %v625_v15 = vld [vmem:[%s722_s0 + $0x38] sm:$0xff]   ;;  %v466_v16 = vld [vmem:[%s723_s2] ss:$0 sm:$0xff] }
   0x7   :  { %565 = vmatpush3.bf16.msra.mxu0 %v611_v1  ;;  %603 = vmatpush3.bf16.msra.mxu1 %v611_v1 }
   0x8   :  { %566 = vmatprep.subr.bf16.mxu0 %v612_v2  ;;  %596 = vmatprep.subr.bf16.mxu1 %v612_v2 }
   0xb   :  { %567 = vmatpush3.bf16.msra.mxu0 %v612_v2  ;;  %604 = vmatpush3.bf16.msra.mxu1 %v612_v2 }
   0xc   :  { %568 = vmatprep.subr.bf16.mxu0 %v613_v3  ;;  %597 = vmatprep.subr.bf16.mxu1 %v613_v3 }
   0xf   :  { %569 = vmatpush3.bf16.msra.mxu0 %v613_v3  ;;  %605 = vmatpush3.bf16.msra.mxu1 %v613_v3 }
  0x10   :  { %570 = vmatprep.subr.bf16.mxu0 %v614_v6  ;;  %598 = vmatprep.subr.bf16.mxu1 %v614_v6 }
  0x13   :  { %571 = vmatpush3.bf16.msra.mxu0 %v614_v6  ;;  %606 = vmatpush3.bf16.msra.mxu1 %v614_v6 }
  0x14   :  { %572 = vmatprep.subr.bf16.mxu0 %v615_v7  ;;  %599 = vmatprep.subr.bf16.mxu1 %v615_v7 }
  0x17   :  { %573 = vmatpush3.bf16.msra.mxu0 %v615_v7  ;;  %607 = vmatpush3.bf16.msra.mxu1 %v615_v7 }
  0x18   :  { %574 = vmatprep.subr.bf16.mxu0 %v616_v8  ;;  %600 = vmatprep.subr.bf16.mxu1 %v616_v8 }
  0x1b   :  { %575 = vmatpush3.bf16.msra.mxu0 %v616_v8  ;;  %608 = vmatpush3.bf16.msra.mxu1 %v616_v8 }
  0x1c   :  { %576 = vmatprep.subr.bf16.mxu0 %v617_v9  ;;  %601 = vmatprep.subr.bf16.mxu1 %v617_v9 }
  0x1f   :  { %577 = vmatpush3.bf16.msra.mxu0 %v617_v9  ;;  %609 = vmatpush3.bf16.msra.mxu1 %v617_v9 }
  0x22   :  { %579 = vmatmul.mubr.bf16.vlgmr.msra.gmra.mrb[0].mxu0 %v620_v10  ;;  %587 = vmatmul.mubr.bf16.vlgmr.msra.gmra.mrb[0].mxu1 %v621_v11 }
  0x23   :  { %582 = vmatprep.mubr.bf16.mxu0 %v622_v12  ;;  %590 = vmatprep.mubr.bf16.mxu1 %v623_v13 }
  0x2a   :  { %583 = vmatmul.mubr.bf16.gmra.mrb[4].mxu0 %v624_v14  ;;  %591 = vmatmul.mubr.bf16.gmra.mrb[4].mxu1 %v625_v15 }
  0xf5   :  { %v580_v17 = vpop.f32.mrb[0].mxu0  ;;  %v588_v18 = vpop.f32.mrb[0].mxu1 }
  0xf6   :  { %v336_v19 = vadd.f32 %v580_v17, %v466_v16  ;;  %v344_v20 = vadd.f32 %v588_v18, %v466_v16  ;;  %v213_v21 = vpop.f32.mrb[1].mxu0  ;;  %v245_v22 = vpop.f32.mrb[1].mxu1 }
  0xf7   :  { %v334_v23 = vadd.f32 %v466_v16, %v213_v21  ;;  %v342_v24 = vadd.f32 %v466_v16, %v245_v22  ;;  %v581_v25 = vpop.f32.mrb[2].mxu0  ;;  %v589_v26 = vpop.f32.mrb[2].mxu1 }
  0xf8   :  { %v337_v27 = vadd.f32 %v581_v25, %v466_v16  ;;  %v345_v28 = vadd.f32 %v589_v26, %v466_v16  ;;  %v216_v29 = vpop.f32.mrb[3].mxu0  ;;  %v248_v30 = vpop.f32.mrb[3].mxu1  ;;  %v352_v33 = vmax.f32 %v336_v19, 0.0  ;;  %v360_v34 = vmax.f32 %v344_v20, 0.0 }
  0xf9   :  { %v335_v31 = vadd.f32 %v466_v16, %v216_v29  ;;  %v343_v32 = vadd.f32 %v466_v16, %v248_v30  ;;  %v350_v37 = vmax.f32 %v334_v23, 0.0  ;;  %v358_v38 = vmax.f32 %v342_v24, 0.0 }
  0xfa   :  { %v353_v35 = vmax.f32 %v337_v27, 0.0  ;;  %v361_v36 = vmax.f32 %v345_v28, 0.0 }
  0xfb   :  { %v351_v39 = vmax.f32 %v335_v31, 0.0  ;;  %v359_v40 = vmax.f32 %v343_v32, 0.0 }
  0xfc   :  { %v507_v41 = vpack.c.bf16 %v353_v35, %v352_v33  ;;  %v527_v42 = vpack.c.bf16 %v361_v36, %v360_v34 }
  0xfd   :  { %v502_v43 = vpack.c.bf16 %v351_v39, %v350_v37  ;;  %v522_v44 = vpack.c.bf16 %v359_v40, %v358_v38  ;;  %v584_v45 = vpop.f32.mrb[4].mxu0  ;;  %v592_v46 = vpop.f32.mrb[4].mxu1 }
  0xfe   :  { %539 = vst [vmem:[%s724_s3 + $0x8] sm:$0xff] %v507_v41   ;;  %543 = vst [vmem:[%s724_s3 + $0x28] sm:$0xff] %v527_v42   ;;  %v340_v47 = vadd.f32 %v584_v45, %v466_v16  ;;  %v348_v48 = vadd.f32 %v592_v46, %v466_v16  ;;  %v229_v49 = vpop.f32.mrb[5].mxu0  ;;  %v261_v50 = vpop.f32.mrb[5].mxu1 }
  0xff   :  { %503 = vst [vmem:[%s724_s3] sm:$0xff] %v502_v43   ;;  %542 = vst [vmem:[%s724_s3 + $0x20] sm:$0xff] %v522_v44   ;;  %v338_v51 = vadd.f32 %v466_v16, %v229_v49  ;;  %v346_v52 = vadd.f32 %v466_v16, %v261_v50  ;;  %v585_v53 = vpop.f32.mrb[6].mxu0  ;;  %v593_v54 = vpop.f32.mrb[6].mxu1 }
 0x100   :  { %v341_v55 = vadd.f32 %v585_v53, %v466_v16  ;;  %v349_v56 = vadd.f32 %v593_v54, %v466_v16  ;;  %v232_v57 = vpop.f32.mrb[7].mxu0  ;;  %v264_v58 = vpop.f32.mrb[7].mxu1  ;;  %v356_v61 = vmax.f32 %v340_v47, 0.0  ;;  %v364_v62 = vmax.f32 %v348_v48, 0.0 }
 0x101   :  { %v339_v59 = vadd.f32 %v466_v16, %v232_v57  ;;  %v347_v60 = vadd.f32 %v466_v16, %v264_v58  ;;  %v354_v1 = vmax.f32 %v338_v51, 0.0  ;;  %v362_v2 = vmax.f32 %v346_v52, 0.0 }
 0x102   :  { %v357_v63 = vmax.f32 %v341_v55, 0.0  ;;  %v365_v0 = vmax.f32 %v349_v56, 0.0 }
 0x103   :  { %v355_v3 = vmax.f32 %v339_v59, 0.0  ;;  %v363_v4 = vmax.f32 %v347_v60, 0.0 }
 0x104   :  { %v517_v5 = vpack.c.bf16 %v357_v63, %v356_v61  ;;  %v537_v6 = vpack.c.bf16 %v365_v0, %v364_v62 }
 0x105   :  { %v512_v7 = vpack.c.bf16 %v355_v3, %v354_v1  ;;  %v532_v8 = vpack.c.bf16 %v363_v4, %v362_v2 }
 0x106   :  { %541 = vst [vmem:[%s724_s3 + $0x18] sm:$0xff] %v517_v5   ;;  %545 = vst [vmem:[%s724_s3 + $0x38] sm:$0xff] %v537_v6  }
 0x107   :  { %540 = vst [vmem:[%s724_s3 + $0x10] sm:$0xff] %v512_v7   ;;  %544 = vst [vmem:[%s724_s3 + $0x30] sm:$0xff] %v532_v8  }

// kernel: _lambda_.15
= control target key start
LH: loop header
LB: loop body
LE: loop exit
PB: predicated region body
PF: predicated region fallthrough
CT: control target
= control target key end

     0   :  { %s306_s1 = inlined_call_operand.vmem [shape: bf16[128,128], index: 1, kind: input, shape index: {}]   ;;  %s307_s0 = inlined_call_operand.vmem [shape: bf16[32,128], index: 0, kind: input, shape index: {}]   ;;  %s308_s2 = inlined_call_operand.vmem [shape: f32[1,128], index: 2, kind: input, shape index: {}]   ;;  %s309_s3 = inlined_call_operand.vmem [shape: f32[32,128], index: 3, kind: output, shape index: {}]  }
   0x1   :  { %v231_v0 = vld [vmem:[%s306_s1] sm:$0xff]   ;;  %v232_v1 = vld [vmem:[%s306_s1 + $0x8] sm:$0xff]   ;;  %v233_v2 = vld [vmem:[%s306_s1 + $0x10] sm:$0xff]  }
   0x2   :  { %211 = vmatprep.subr.bf16.mxu0 %v231_v0  ;;  %v234_v3 = vld [vmem:[%s306_s1 + $0x18] sm:$0xff]   ;;  %v239_v4 = vld [vmem:[%s307_s0] sm:$0xff]   ;;  %v236_v6 = vld [vmem:[%s306_s1 + $0x28] sm:$0xff]  }
   0x3   :  { %212 = vmatpush3.bf16.msra.mxu0 %v231_v0  ;;  %227 = vmatprep.mubr.bf16.mxu0 %v239_v4  ;;  %v235_v5 = vld [vmem:[%s306_s1 + $0x20] sm:$0xff]   ;;  %v237_v7 = vld [vmem:[%s306_s1 + $0x30] sm:$0xff]   ;;  %v238_v8 = vld [vmem:[%s306_s1 + $0x38] sm:$0xff]  }
   0x4   :  { %213 = vmatprep.subr.bf16.mxu0 %v232_v1  ;;  %v240_v9 = vld [vmem:[%s307_s0 + $0x8] sm:$0xff]   ;;  %v200_v10 = vld [vmem:[%s308_s2] ss:$0 sm:$0xff] }
   0x7   :  { %214 = vmatpush3.bf16.msra.mxu0 %v232_v1 }
   0x8   :  { %215 = vmatprep.subr.bf16.mxu0 %v233_v2 }
   0xb   :  { %216 = vmatpush3.bf16.msra.mxu0 %v233_v2 }
   0xc   :  { %217 = vmatprep.subr.bf16.mxu0 %v234_v3 }
   0xf   :  { %218 = vmatpush3.bf16.msra.mxu0 %v234_v3 }
  0x10   :  { %219 = vmatprep.subr.bf16.mxu0 %v235_v5 }
  0x13   :  { %220 = vmatpush3.bf16.msra.mxu0 %v235_v5 }
  0x14   :  { %221 = vmatprep.subr.bf16.mxu0 %v236_v6 }
  0x17   :  { %222 = vmatpush3.bf16.msra.mxu0 %v236_v6 }
  0x18   :  { %223 = vmatprep.subr.bf16.mxu0 %v237_v7 }
  0x1b   :  { %224 = vmatpush3.bf16.msra.mxu0 %v237_v7 }
  0x1c   :  { %225 = vmatprep.subr.bf16.mxu0 %v238_v8 }
  0x1f   :  { %226 = vmatpush3.bf16.msra.mxu0 %v238_v8 }
  0x22   :  { %228 = vmatmul.mubr.bf16.vlgmr.msra.gmra.mrb[0].mxu0 %v240_v9 }
  0xf5   :  { %v229_v11 = vpop.f32.mrb[0].mxu0 }
  0xf6   :  { %v180_v12 = vadd.f32 %v229_v11, %v200_v10  ;;  %v141_v13 = vpop.f32.mrb[1].mxu0 }
  0xf7   :  { %v178_v14 = vadd.f32 %v200_v10, %v141_v13  ;;  %v230_v15 = vpop.f32.mrb[2].mxu0 }
  0xf8   :  { %184 = vst [vmem:[%s309_s3 + $0x10] sm:$0xff] %v180_v12  ;;  %v181_v16 = vadd.f32 %v230_v15, %v200_v10  ;;  %v144_v17 = vpop.f32.mrb[3].mxu0 }
  0xf9   :  { %182 = vst [vmem:[%s309_s3] sm:$0xff] %v178_v14  ;;  %v179_v18 = vadd.f32 %v200_v10, %v144_v17 }
  0xfa   :  { %185 = vst [vmem:[%s309_s3 + $0x18] sm:$0xff] %v181_v16 }
  0xfb   :  { %183 = vst [vmem:[%s309_s3 + $0x8] sm:$0xff] %v179_v18 }

// kernel: _lambda_.14
= control target key start
LH: loop header
LB: loop body
LE: loop exit
PB: predicated region body
PF: predicated region fallthrough
CT: control target
= control target key end

     0   :  { %s670_s1 = inlined_call_operand.vmem [shape: bf16[384,128], index: 1, kind: input, shape index: {}]   ;;  %s671_s0 = inlined_call_operand.vmem [shape: bf16[32,384], index: 0, kind: input, shape index: {}]   ;;  %s672_s2 = inlined_call_operand.vmem [shape: f32[1,128], index: 2, kind: input, shape index: {}]   ;;  %s673_s3 = inlined_call_operand.vmem [shape: bf16[32,128], index: 3, kind: output, shape index: {}]  }
   0x1   :  { %v519_v0 = vld [vmem:[%s670_s1 + $0x40] sm:$0xff]   ;;  %v522_v3 = vld [vmem:[%s670_s1 + $0x48] sm:$0xff]   ;;  %v525_v6 = vld [vmem:[%s670_s1 + $0x50] sm:$0xff]  }
   0x2   :  { %v520_v1 = vld [vmem:[%s670_s1] sm:$0xff]   ;;  %461 = vmatprep.subr.bf16.mxu0 %v519_v0  ;;  %v523_v4 = vld [vmem:[%s670_s1 + $0x8] sm:$0xff]   ;;  %v526_v7 = vld [vmem:[%s670_s1 + $0x10] sm:$0xff]  }
   0x3   :  { %v521_v2 = vld [vmem:[%s670_s1 + $0x80] sm:$0xff]   ;;  %462 = vmatpush3.bf16.msra.mxu0 %v520_v1  ;;  %v524_v5 = vld [vmem:[%s670_s1 + $0x88] sm:$0xff]   ;;  %v527_v8 = vld [vmem:[%s670_s1 + $0x90] sm:$0xff]  }
   0x4   :  { %499 = vmatprep.subr.bf16.mxu1 %v521_v2  ;;  %463 = vmatprep.subr.bf16.mxu0 %v522_v3  ;;  %v528_v9 = vld [vmem:[%s670_s1 + $0x58] sm:$0xff]   ;;  %v531_v12 = vld [vmem:[%s670_s1 + $0x60] sm:$0xff]   ;;  %v534_v15 = vld [vmem:[%s670_s1 + $0x68] sm:$0xff]  }
   0x5   :  { %500 = vmatpush3.bf16.msra.mxu1 %v521_v2  ;;  %v529_v10 = vld [vmem:[%s670_s1 + $0x18] sm:$0xff]   ;;  %v533_v13 = vld [vmem:[%s670_s1 + $0xa0] sm:$0xff]   ;;  %v536_v16 = vld [vmem:[%s670_s1 + $0xa8] sm:$0xff]  }
   0x6   :  { %501 = vmatprep.subr.bf16.mxu1 %v524_v5  ;;  %v530_v11 = vld [vmem:[%s670_s1 + $0x98] sm:$0xff]   ;;  %v532_v14 = vld [vmem:[%s670_s1 + $0x20] sm:$0xff]   ;;  %v535_v17 = vld [vmem:[%s670_s1 + $0x28] sm:$0xff]  }
   0x7   :  { %464 = vmatpush3.bf16.msra.mxu0 %v523_v4  ;;  %v537_v18 = vld [vmem:[%s670_s1 + $0x70] sm:$0xff]   ;;  %v540_v21 = vld [vmem:[%s670_s1 + $0x78] sm:$0xff]   ;;  %v543_v26 = vld [vmem:[%s671_s0] ss:$12 sps:$4 sm:$0xff]  }
   0x8   :  { %465 = vmatprep.subr.bf16.mxu0 %v525_v6  ;;  %v538_v19 = vld [vmem:[%s670_s1 + $0x30] sm:$0xff]   ;;  %v542_v22 = vld [vmem:[%s670_s1 + $0xb8] sm:$0xff]   ;;  %v547_v28 = vld [vmem:[%s671_s0 + $0x20] ss:$12 sps:$4 sm:$0xff]  }
   0x9   :  { %502 = vmatpush3.bf16.msra.mxu1 %v524_v5  ;;  %v539_v20 = vld [vmem:[%s670_s1 + $0xb0] sm:$0xff]   ;;  %v541_v25 = vld [vmem:[%s670_s1 + $0x38] sm:$0xff]   ;;  %v441_v37 = vld [vmem:[%s672_s2] ss:$0 sm:$0xff] }
   0xa   :  { %503 = vmatprep.subr.bf16.mxu1 %v527_v8  ;;  %v545_v23 = vld [vmem:[%s671_s0 + $0x4] ss:$12 sps:$4 sm:$0xff]   ;;  %v546_v24 = vld [vmem:[%s671_s0 + $0x8] ss:$12 sps:$4 sm:$0xff]  }
   0xb   :  { %466 = vmatpush3.bf16.msra.mxu0 %v526_v7  ;;  %291 = vmatprep.mubr.bf16.mxu0 %v545_v23  ;;  %v548_v27 = vld [vmem:[%s671_s0 + $0x1c] ss:$12 sps:$4 sm:$0xff]   ;;  %v550_v29 = vld [vmem:[%s671_s0 + $0x18] ss:$12 sps:$4 sm:$0xff]  }
   0xc   :  { %467 = vmatprep.subr.bf16.mxu0 %v528_v9  ;;  %515 = vmatprep.mubr.bf16.mxu1 %v546_v24 }
   0xd   :  { %504 = vmatpush3.bf16.msra.mxu1 %v527_v8 }
   0xe   :  { %505 = vmatprep.subr.bf16.mxu1 %v530_v11 }
   0xf   :  { %468 = vmatpush3.bf16.msra.mxu0 %v529_v10 }
  0x10   :  { %469 = vmatprep.subr.bf16.mxu0 %v531_v12 }
  0x11   :  { %506 = vmatpush3.bf16.msra.mxu1 %v530_v11 }
  0x12   :  { %507 = vmatprep.subr.bf16.mxu1 %v533_v13 }
  0x13   :  { %470 = vmatpush3.bf16.msra.mxu0 %v532_v14 }
  0x14   :  { %471 = vmatprep.subr.bf16.mxu0 %v534_v15 }
  0x15   :  { %508 = vmatpush3.bf16.msra.mxu1 %v533_v13 }
  0x16   :  { %509 = vmatprep.subr.bf16.mxu1 %v536_v16 }
  0x17   :  { %472 = vmatpush3.bf16.msra.mxu0 %v535_v17 }
  0x18   :  { %473 = vmatprep.subr.bf16.mxu0 %v537_v18 }
  0x19   :  { %510 = vmatpush3.bf16.msra.mxu1 %v536_v16 }
  0x1a   :  { %511 = vmatprep.subr.bf16.mxu1 %v539_v20 }
  0x1b   :  { %474 = vmatpush3.bf16.msra.mxu0 %v538_v19 }
  0x1c   :  { %475 = vmatprep.subr.bf16.mxu0 %v540_v21 }
  0x1d   :  { %512 = vmatpush3.bf16.msra.mxu1 %v539_v20 }
  0x1e   :  { %513 = vmatprep.subr.bf16.mxu1 %v542_v22 }
  0x1f   :  { %476 = vmatpush3.bf16.msra.mxu0 %v541_v25 }
  0x21   :  { %514 = vmatpush3.bf16.msra.mxu1 %v542_v22 }
  0x22   :  { %292 = vmatmul.mubr.bf16.vlgmr.msra.gmra.mrb[0].mxu0 %v543_v26 }
  0x23   :  { %299 = vmatprep.mubr.bf16.mxu0 %v548_v27 }
  0x24   :  { %516 = vmatmul.mubr.bf16.vlgmr.msra.gmra.mrb[0].mxu1 %v547_v28 }
  0x2a   :  { %300 = vmatmul.mubr.bf16.gmra.mrb[4].mxu0 %v550_v29 }
  0xf5   :  { %v477_v30 = vpop.f32.mrb[0].mxu0 }
  0xf6   :  { %v478_v31 = vpop.f32.mrb[1].mxu0 }
  0xf7   :  { %v479_v32 = vadd.f32 %v478_v31, %v477_v30  ;;  %v480_v33 = vpop.f32.mrb[2].mxu0  ;;  %v517_v34 = vpop.f32.mrb[0].mxu1 }
  0xf8   :  { %v481_v35 = vpop.f32.mrb[3].mxu0  ;;  %v342_v36 = vpop.f32.mrb[1].mxu1 }
  0xf9   :  { %v482_v38 = vadd.f32 %v481_v35, %v480_v33  ;;  %v343_v39 = vadd.f32 %v479_v32, %v342_v36  ;;  %v518_v40 = vpop.f32.mrb[2].mxu1 }
  0xfa   :  { %v345_v41 = vpop.f32.mrb[3].mxu1 }
  0xfb   :  { %v379_v42 = vadd.f32 %v441_v37, %v343_v39  ;;  %v346_v43 = vadd.f32 %v482_v38, %v345_v41 }
  0xfd   :  { %v380_v44 = vadd.f32 %v441_v37, %v346_v43  ;;  %v483_v45 = vpop.f32.mrb[4].mxu0  ;;  %v383_v47 = vmax.f32 %v379_v42, 0.0 }
  0xfe   :  { %v484_v46 = vpop.f32.mrb[5].mxu0 }
  0xff   :  { %v384_v48 = vmax.f32 %v380_v44, 0.0  ;;  %v485_v49 = vadd.f32 %v484_v46, %v483_v45  ;;  %v486_v50 = vpop.f32.mrb[6].mxu0 }
 0x100   :  { %v487_v51 = vpop.f32.mrb[7].mxu0 }
 0x101   :  { %v453_v52 = vpack.c.bf16 %v384_v48, %v383_v47  ;;  %v351_v53 = vadd.f32 %v517_v34, %v485_v49  ;;  %v488_v54 = vadd.f32 %v487_v51, %v486_v50 }
 0x103   :  { %454 = vst [vmem:[%s673_s3] sm:$0xff] %v453_v52   ;;  %v381_v55 = vadd.f32 %v441_v37, %v351_v53  ;;  %v354_v56 = vadd.f32 %v518_v40, %v488_v54 }
 0x105   :  { %v382_v57 = vadd.f32 %v441_v37, %v354_v56  ;;  %v385_v58 = vmax.f32 %v381_v55, 0.0 }
 0x107   :  { %v386_v59 = vmax.f32 %v382_v57, 0.0 }
 0x109   :  { %v458_v60 = vpack.c.bf16 %v386_v59, %v385_v58 }
 0x10b   :  { %460 = vst [vmem:[%s673_s3 + $0x8] sm:$0xff] %v458_v60  }

// kernel: _lambda_.17
= control target key start
LH: loop header
LB: loop body
LE: loop exit
PB: predicated region body
PF: predicated region fallthrough
CT: control target
= control target key end

     0   :  { %s339_s1 = inlined_call_operand.vmem [shape: bf16[128,128], index: 1, kind: input, shape index: {}]   ;;  %s340_s0 = inlined_call_operand.vmem [shape: bf16[32,128], index: 0, kind: input, shape index: {}]   ;;  %s341_s2 = inlined_call_operand.vmem [shape: f32[1,128], index: 2, kind: input, shape index: {}]   ;;  %s342_s3 = inlined_call_operand.vmem [shape: bf16[32,128], index: 3, kind: output, shape index: {}]  }
   0x1   :  { %v270_v0 = vld [vmem:[%s339_s1] sm:$0xff]   ;;  %v271_v1 = vld [vmem:[%s339_s1 + $0x8] sm:$0xff]   ;;  %v272_v2 = vld [vmem:[%s339_s1 + $0x10] sm:$0xff]  }
   0x2   :  { %250 = vmatprep.subr.bf16.mxu0 %v270_v0  ;;  %v273_v3 = vld [vmem:[%s339_s1 + $0x18] sm:$0xff]   ;;  %v278_v4 = vld [vmem:[%s340_s0] sm:$0xff]   ;;  %v275_v6 = vld [vmem:[%s339_s1 + $0x28] sm:$0xff]  }
   0x3   :  { %251 = vmatpush3.bf16.msra.mxu0 %v270_v0  ;;  %266 = vmatprep.mubr.bf16.mxu0 %v278_v4  ;;  %v274_v5 = vld [vmem:[%s339_s1 + $0x20] sm:$0xff]   ;;  %v276_v7 = vld [vmem:[%s339_s1 + $0x30] sm:$0xff]   ;;  %v277_v8 = vld [vmem:[%s339_s1 + $0x38] sm:$0xff]  }
   0x4   :  { %252 = vmatprep.subr.bf16.mxu0 %v271_v1  ;;  %v279_v9 = vld [vmem:[%s340_s0 + $0x8] sm:$0xff]   ;;  %v220_v10 = vld [vmem:[%s341_s2] ss:$0 sm:$0xff] }
   0x7   :  { %253 = vmatpush3.bf16.msra.mxu0 %v271_v1 }
   0x8   :  { %254 = vmatprep.subr.bf16.mxu0 %v272_v2 }
   0xb   :  { %255 = vmatpush3.bf16.msra.mxu0 %v272_v2 }
   0xc   :  { %256 = vmatprep.subr.bf16.mxu0 %v273_v3 }
   0xf   :  { %257 = vmatpush3.bf16.msra.mxu0 %v273_v3 }
  0x10   :  { %258 = vmatprep.subr.bf16.mxu0 %v274_v5 }
  0x13   :  { %259 = vmatpush3.bf16.msra.mxu0 %v274_v5 }
  0x14   :  { %260 = vmatprep.subr.bf16.mxu0 %v275_v6 }
  0x17   :  { %261 = vmatpush3.bf16.msra.mxu0 %v275_v6 }
  0x18   :  { %262 = vmatprep.subr.bf16.mxu0 %v276_v7 }
  0x1b   :  { %263 = vmatpush3.bf16.msra.mxu0 %v276_v7 }
  0x1c   :  { %264 = vmatprep.subr.bf16.mxu0 %v277_v8 }
  0x1f   :  { %265 = vmatpush3.bf16.msra.mxu0 %v277_v8 }
  0x22   :  { %267 = vmatmul.mubr.bf16.vlgmr.msra.gmra.mrb[0].mxu0 %v279_v9 }
  0xf5   :  { %v268_v11 = vpop.f32.mrb[0].mxu0 }
  0xf6   :  { %v180_v12 = vadd.f32 %v268_v11, %v220_v10  ;;  %v141_v13 = vpop.f32.mrb[1].mxu0 }
  0xf7   :  { %v178_v14 = vadd.f32 %v220_v10, %v141_v13  ;;  %v269_v15 = vpop.f32.mrb[2].mxu0 }
  0xf8   :  { %v181_v16 = vadd.f32 %v269_v15, %v220_v10  ;;  %v144_v17 = vpop.f32.mrb[3].mxu0  ;;  %v184_v19 = vmax.f32 %v180_v12, 0.0 }
  0xf9   :  { %v179_v18 = vadd.f32 %v220_v10, %v144_v17  ;;  %v182_v21 = vmax.f32 %v178_v14, 0.0 }
  0xfa   :  { %v185_v20 = vmax.f32 %v181_v16, 0.0 }
  0xfb   :  { %v183_v22 = vmax.f32 %v179_v18, 0.0 }
  0xfc   :  { %v237_v23 = vpack.c.bf16 %v185_v20, %v184_v19 }
  0xfd   :  { %v232_v24 = vpack.c.bf16 %v183_v22, %v182_v21 }
  0xfe   :  { %239 = vst [vmem:[%s342_s3 + $0x8] sm:$0xff] %v237_v23  }
  0xff   :  { %233 = vst [vmem:[%s342_s3] sm:$0xff] %v232_v24  }

// kernel: _lambda_.16
= control target key start
LH: loop header
LB: loop body
LE: loop exit
PB: predicated region body
PF: predicated region fallthrough
CT: control target
= control target key end

     0   :  { %v2802_v3 = vmov 0   ;;  %s2798_s1 = inlined_call_operand.vmem [shape: f32[128,1024], index: 1, kind: input, shape index: {}]   ;;  %s2799_s0 = inlined_call_operand.vmem [shape: f32[32,128], index: 0, kind: input, shape index: {}]   ;;  %s2800_s2 = inlined_call_operand.vmem [shape: f32[32,128], index: 2, kind: output, shape index: {0}]   ;;  %s2801_s3 = inlined_call_operand.vmem [shape: f32[1,128], index: 3, kind: output, shape index: {1}]  }
   0x1   :  { %v24_v0 = vld [vmem:[%s2798_s1 + $0x8] sm:$0xff]  ;;  %v23_v2 = vld [vmem:[%s2798_s1] sm:$0xff]  ;;  %545 = vmatprep.mubr.bf16.mxu0 %v2802_v3  ;;  %598 = vmatprep.mubr.bf16.mxu1 %v2802_v3  ;;  %v26_v9 = vld [vmem:[%s2798_s1 + $0x18] sm:$0xff] }
   0x2   :  { %v32_v1 = vld [vmem:[%s2798_s1 + $0x48] sm:$0xff]  ;;  %v152_v4 = vmul.f32 %v24_v0, %v24_v0  ;;  %v31_v7 = vld [vmem:[%s2798_s1 + $0x40] sm:$0xff]  ;;  %v151_v8 = vmul.f32 %v23_v2, %v23_v2  ;;  %v34_v10 = vld [vmem:[%s2798_s1 + $0x58] sm:$0xff]  ;;  %v154_v13 = vmul.f32 %v26_v9, %v26_v9 }
   0x3   :  { %v160_v5 = vmul.f32 %v32_v1, %v32_v1  ;;  %v1764_v6 = vpack.c.bf16 %v32_v1, %v24_v0  ;;  %v159_v11 = vmul.f32 %v31_v7, %v31_v7  ;;  %v1775_v12 = vpack.c.bf16 %v31_v7, %v23_v2  ;;  %v25_v15 = vld [vmem:[%s2798_s1 + $0x10] sm:$0xff]  ;;  %v40_v17 = vld [vmem:[%s2798_s1 + $0x88] sm:$0xff]  ;;  %v39_v23 = vld [vmem:[%s2798_s1 + $0x80] sm:$0xff] }
   0x4   :  { %v162_v14 = vmul.f32 %v34_v10, %v34_v10  ;;  %v33_v16 = vld [vmem:[%s2798_s1 + $0x50] sm:$0xff]  ;;  %v1787_v19 = vpack.c.bf16 %v34_v10, %v26_v9  ;;  %v153_v20 = vmul.f32 %v25_v15, %v25_v15  ;;  %v48_v22 = vld [vmem:[%s2798_s1 + $0xc8] sm:$0xff]  ;;  %v47_v24 = vld [vmem:[%s2798_s1 + $0xc0] sm:$0xff]  ;;  %v168_v28 = vmul.f32 %v40_v17, %v40_v17 }
   0x5   :  { %v300_v18 = vadd.f32 %v160_v5, %v152_v4  ;;  %513 = vmatprep.subr.bf16.mxu0 %v1764_v6  ;;  %v161_v21 = vmul.f32 %v33_v16, %v33_v16  ;;  %v279_v25 = vadd.f32 %v159_v11, %v151_v8  ;;  %v1799_v27 = vpack.c.bf16 %v33_v16, %v25_v15  ;;  %v42_v29 = vld [vmem:[%s2798_s1 + $0x98] sm:$0xff]  ;;  %v41_v35 = vld [vmem:[%s2798_s1 + $0x90] sm:$0xff]  ;;  %v56_v45 = vld [vmem:[%s2798_s1 + $0x108] sm:$0xff] }
   0x6   :  { %514 = vmatpush1.bf16.msra.mxu0 %v1775_v12  ;;  %v342_v26 = vadd.f32 %v162_v14, %v154_v13  ;;  %v50_v30 = vld [vmem:[%s2798_s1 + $0xd8] sm:$0xff]  ;;  %566 = vmatprep.subr.bf16.mxu1 %v1787_v19  ;;  %v176_v32 = vmul.f32 %v48_v22, %v48_v22  ;;  %v1808_v33 = vpack.c.bf16 %v48_v22, %v40_v17  ;;  %v49_v36 = vld [vmem:[%s2798_s1 + $0xd0] sm:$0xff]  ;;  %v64_v46 = vld [vmem:[%s2798_s1 + $0x148] sm:$0xff] }
   0x7   :  { %2834 = vst [vmem:[#allocation2_spill] sm:$0xff] %v1799_v27  ;;  %v321_v31 = vadd.f32 %v161_v21, %v153_v20  ;;  %v167_v34 = vmul.f32 %v39_v23, %v39_v23  ;;  %567 = vmatpush1.bf16.msra.mxu1 %v1799_v27  ;;  %v301_v37 = vadd.f32 %v300_v18, %v168_v28  ;;  %v55_v51 = vld [vmem:[%s2798_s1 + $0x100] sm:$0xff]  ;;  %v58_v57 = vld [vmem:[%s2798_s1 + $0x118] sm:$0xff]  ;;  %v57_v63 = vld [vmem:[%s2798_s1 + $0x110] sm:$0xff] }
   0x8   :  { %v175_v38 = vmul.f32 %v47_v24, %v47_v24  ;;  %v1817_v39 = vpack.c.bf16 %v47_v24, %v39_v23  ;;  %v170_v40 = vmul.f32 %v42_v29, %v42_v29  ;;  %515 = vmatprep.subr.bf16.mxu0 %v1808_v33  ;;  %v178_v42 = vmul.f32 %v50_v30, %v50_v30  ;;  %v63_v52 = vld [vmem:[%s2798_s1 + $0x140] sm:$0xff]  ;;  %v66_v58 = vld [vmem:[%s2798_s1 + $0x158] sm:$0xff]  ;;  %v65_v0 = vld [vmem:[%s2798_s1 + $0x150] sm:$0xff] }
   0x9   :  { %v280_v41 = vadd.f32 %v279_v25, %v167_v34  ;;  %v1820_v43 = vpack.c.bf16 %v50_v30, %v42_v29  ;;  %v169_v44 = vmul.f32 %v41_v35, %v41_v35  ;;  %v302_v47 = vadd.f32 %v301_v37, %v176_v32  ;;  %v72_v11 = vld [vmem:[%s2798_s1 + $0x188] sm:$0xff]  ;;  %v71_v18 = vld [vmem:[%s2798_s1 + $0x180] sm:$0xff]  ;;  %v74_v25 = vld [vmem:[%s2798_s1 + $0x198] sm:$0xff] }
   0xa   :  { %516 = vmatpush1.bf16.msra.mxu0 %v1817_v39  ;;  %v343_v48 = vadd.f32 %v342_v26, %v170_v40  ;;  %v177_v49 = vmul.f32 %v49_v36, %v49_v36  ;;  %v1829_v50 = vpack.c.bf16 %v49_v36, %v41_v35  ;;  %v184_v55 = vmul.f32 %v56_v45, %v56_v45  ;;  %v80_v13 = vld [vmem:[%s2798_s1 + $0x1c8] sm:$0xff]  ;;  %v79_v20 = vld [vmem:[%s2798_s1 + $0x1c0] sm:$0xff]  ;;  %v82_v26 = vld [vmem:[%s2798_s1 + $0x1d8] sm:$0xff] }
   0xb   :  { %2835 = vst [vmem:[#allocation3_spill] sm:$0xff] %v1820_v43  ;;  %v281_v53 = vadd.f32 %v280_v41, %v175_v38  ;;  %568 = vmatprep.subr.bf16.mxu1 %v1820_v43  ;;  %v322_v54 = vadd.f32 %v321_v31, %v169_v44  ;;  %v192_v56 = vmul.f32 %v64_v46, %v64_v46  ;;  %v73_v32 = vld [vmem:[%s2798_s1 + $0x190] sm:$0xff] }
   0xc   :  { %2836 = vst [vmem:[#allocation4_spill] sm:$0xff] %v1829_v50  ;;  %v344_v59 = vadd.f32 %v343_v48, %v178_v42  ;;  %569 = vmatpush1.bf16.msra.mxu1 %v1829_v50  ;;  %v1845_v60 = vpack.c.bf16 %v64_v46, %v56_v45  ;;  %v183_v61 = vmul.f32 %v55_v51, %v55_v51  ;;  %v81_v34 = vld [vmem:[%s2798_s1 + $0x1d0] sm:$0xff]  ;;  %v88_v45 = vld [vmem:[%s2798_s1 + $0x208] sm:$0xff]  ;;  %v123_v50 = vld [vmem:[%s2798_s1 + $0x320] sm:$0xff] }
   0xd   :  { %v191_v62 = vmul.f32 %v63_v52, %v63_v52  ;;  %v323_v1 = vadd.f32 %v322_v54, %v177_v49  ;;  %v303_v2 = vadd.f32 %v302_v47, %v184_v55  ;;  %v1853_v4 = vpack.c.bf16 %v63_v52, %v55_v51  ;;  %v96_v46 = vld [vmem:[%s2798_s1 + $0x248] sm:$0xff]  ;;  %v87_v52 = vld [vmem:[%s2798_s1 + $0x200] sm:$0xff] }
   0xe   :  { %v186_v5 = vmul.f32 %v58_v57, %v58_v57  ;;  %517 = vmatprep.subr.bf16.mxu0 %v1845_v60  ;;  %v282_v7 = vadd.f32 %v281_v53, %v183_v61  ;;  %v194_v8 = vmul.f32 %v66_v58, %v66_v58  ;;  %v1856_v9 = vpack.c.bf16 %v66_v58, %v58_v57  ;;  %v95_v53 = vld [vmem:[%s2798_s1 + $0x240] sm:$0xff]  ;;  %v90_v58 = vld [vmem:[%s2798_s1 + $0x218] sm:$0xff] }
   0xf   :  { %v185_v10 = vmul.f32 %v57_v63, %v57_v63  ;;  %v304_v14 = vadd.f32 %v303_v2, %v192_v56  ;;  %518 = vmatpush1.bf16.msra.mxu0 %v1853_v4  ;;  %v193_v16 = vmul.f32 %v65_v0, %v65_v0  ;;  %v1865_v17 = vpack.c.bf16 %v65_v0, %v57_v63  ;;  %v97_v2 = vld [vmem:[%s2798_s1 + $0x250] sm:$0xff] }
  0x10   :  { %2837 = vst [vmem:[#allocation5_spill] sm:$0xff] %v1856_v9  ;;  %v345_v15 = vadd.f32 %v344_v59, %v186_v5  ;;  %v283_v21 = vadd.f32 %v282_v7, %v191_v62  ;;  %570 = vmatprep.subr.bf16.mxu1 %v1856_v9  ;;  %v200_v23 = vmul.f32 %v72_v11, %v72_v11  ;;  %v98_v59 = vld [vmem:[%s2798_s1 + $0x258] sm:$0xff] }
  0x11   :  { %2838 = vst [vmem:[#allocation6_spill] sm:$0xff] %v1865_v17  ;;  %v324_v22 = vadd.f32 %v323_v1, %v185_v10  ;;  %v208_v24 = vmul.f32 %v80_v13, %v80_v13  ;;  %571 = vmatpush1.bf16.msra.mxu1 %v1865_v17  ;;  %v1881_v29 = vpack.c.bf16 %v80_v13, %v72_v11  ;;  %v89_v1 = vld [vmem:[%s2798_s1 + $0x210] sm:$0xff] }
  0x12   :  { %v346_v28 = vadd.f32 %v345_v15, %v194_v8  ;;  %v199_v30 = vmul.f32 %v71_v18, %v71_v18  ;;  %v207_v31 = vmul.f32 %v79_v20, %v79_v20  ;;  %v305_v36 = vadd.f32 %v304_v14, %v200_v23 }
  0x13   :  { %v325_v35 = vadd.f32 %v324_v22, %v193_v16  ;;  %v1889_v37 = vpack.c.bf16 %v79_v20, %v71_v18  ;;  %v202_v38 = vmul.f32 %v74_v25, %v74_v25  ;;  %519 = vmatprep.subr.bf16.mxu0 %v1881_v29  ;;  %v210_v41 = vmul.f32 %v82_v26, %v82_v26  ;;  %v104_v16 = vld [vmem:[%s2798_s1 + $0x288] sm:$0xff] }
  0x14   :  { %v284_v40 = vadd.f32 %v283_v21, %v199_v30  ;;  %v1892_v42 = vpack.c.bf16 %v82_v26, %v74_v25  ;;  %v201_v44 = vmul.f32 %v73_v32, %v73_v32  ;;  %v306_v47 = vadd.f32 %v305_v36, %v208_v24  ;;  %v112_v18 = vld [vmem:[%s2798_s1 + $0x2c8] sm:$0xff]  ;;  %v103_v24 = vld [vmem:[%s2798_s1 + $0x280] sm:$0xff] }
  0x15   :  { %520 = vmatpush1.bf16.msra.mxu0 %v1889_v37  ;;  %v347_v48 = vadd.f32 %v346_v28, %v202_v38  ;;  %v209_v49 = vmul.f32 %v81_v34, %v81_v34  ;;  %v1901_v51 = vpack.c.bf16 %v81_v34, %v73_v32  ;;  %v216_v56 = vmul.f32 %v88_v45, %v88_v45  ;;  %v111_v25 = vld [vmem:[%s2798_s1 + $0x2c0] sm:$0xff]  ;;  %v106_v32 = vld [vmem:[%s2798_s1 + $0x298] sm:$0xff] }
  0x16   :  { %2839 = vst [vmem:[#allocation7_spill] sm:$0xff] %v1892_v42  ;;  %v285_v54 = vadd.f32 %v284_v40, %v207_v31  ;;  %572 = vmatprep.subr.bf16.mxu1 %v1892_v42  ;;  %v326_v55 = vadd.f32 %v325_v35, %v201_v44  ;;  %v224_v57 = vmul.f32 %v96_v46, %v96_v46  ;;  %v114_v34 = vld [vmem:[%s2798_s1 + $0x2d8] sm:$0xff]  ;;  %v113_v44 = vld [vmem:[%s2798_s1 + $0x2d0] sm:$0xff] }
  0x17   :  { %2840 = vst [vmem:[#allocation8_spill] sm:$0xff] %v1901_v51  ;;  %v348_v61 = vadd.f32 %v347_v48, %v210_v41  ;;  %573 = vmatpush1.bf16.msra.mxu1 %v1901_v51  ;;  %v1917_v62 = vpack.c.bf16 %v96_v46, %v88_v45  ;;  %v215_v63 = vmul.f32 %v87_v52, %v87_v52  ;;  %v105_v41 = vld [vmem:[%s2798_s1 + $0x290] sm:$0xff] }
  0x18   :  { %v223_v0 = vmul.f32 %v95_v53, %v95_v53  ;;  %v327_v5 = vadd.f32 %v326_v55, %v209_v49  ;;  %v307_v7 = vadd.f32 %v306_v47, %v216_v56  ;;  %v1925_v8 = vpack.c.bf16 %v95_v53, %v87_v52  ;;  %v120_v55 = vld [vmem:[%s2798_s1 + $0x308] sm:$0xff]  ;;  %v77_v51 = vld [vmem:[%s2798_s1 + $0x1b0] sm:$0xff] }
  0x19   :  { %v218_v10 = vmul.f32 %v90_v58, %v90_v58  ;;  %521 = vmatprep.subr.bf16.mxu0 %v1917_v62  ;;  %v286_v11 = vadd.f32 %v285_v54, %v215_v63  ;;  %v226_v13 = vmul.f32 %v98_v59, %v98_v59  ;;  %v1928_v14 = vpack.c.bf16 %v98_v59, %v90_v58  ;;  %v128_v56 = vld [vmem:[%s2798_s1 + $0x348] sm:$0xff]  ;;  %v119_v63 = vld [vmem:[%s2798_s1 + $0x300] sm:$0xff]  ;;  %v85_v42 = vld [vmem:[%s2798_s1 + $0x1f0] sm:$0xff] }
  0x1a   :  { %v217_v15 = vmul.f32 %v89_v1, %v89_v1  ;;  %v308_v20 = vadd.f32 %v307_v7, %v224_v57  ;;  %522 = vmatpush1.bf16.msra.mxu0 %v1925_v8  ;;  %v225_v22 = vmul.f32 %v97_v2, %v97_v2  ;;  %v1937_v23 = vpack.c.bf16 %v97_v2, %v89_v1 }
  0x1b   :  { %2841 = vst [vmem:[#allocation9_spill] sm:$0xff] %v1928_v14  ;;  %v349_v21 = vadd.f32 %v348_v61, %v218_v10  ;;  %v287_v26 = vadd.f32 %v286_v11, %v223_v0  ;;  %574 = vmatprep.subr.bf16.mxu1 %v1928_v14  ;;  %v232_v30 = vmul.f32 %v104_v16, %v104_v16  ;;  %v127_v0 = vld [vmem:[%s2798_s1 + $0x340] sm:$0xff]  ;;  %v122_v10 = vld [vmem:[%s2798_s1 + $0x318] sm:$0xff] }
  0x1c   :  { %2842 = vst [vmem:[#allocation10_spill] sm:$0xff] %v1937_v23  ;;  %v328_v28 = vadd.f32 %v327_v5, %v217_v15  ;;  %v240_v31 = vmul.f32 %v112_v18, %v112_v18  ;;  %575 = vmatpush1.bf16.msra.mxu1 %v1937_v23  ;;  %v1953_v36 = vpack.c.bf16 %v112_v18, %v104_v16  ;;  %v130_v11 = vld [vmem:[%s2798_s1 + $0x358] sm:$0xff] }
  0x1d   :  { %v350_v35 = vadd.f32 %v349_v21, %v226_v13  ;;  %v231_v38 = vmul.f32 %v103_v24, %v103_v24  ;;  %v239_v40 = vmul.f32 %v111_v25, %v111_v25  ;;  %v309_v46 = vadd.f32 %v308_v20, %v232_v30  ;;  %v121_v20 = vld [vmem:[%s2798_s1 + $0x310] sm:$0xff] }
  0x1e   :  { %v329_v45 = vadd.f32 %v328_v28, %v225_v22  ;;  %v1961_v47 = vpack.c.bf16 %v111_v25, %v103_v24  ;;  %v234_v48 = vmul.f32 %v106_v32, %v106_v32  ;;  %523 = vmatprep.subr.bf16.mxu0 %v1953_v36  ;;  %v242_v52 = vmul.f32 %v114_v34, %v114_v34  ;;  %v129_v21 = vld [vmem:[%s2798_s1 + $0x350] sm:$0xff] }
  0x1f   :  { %v288_v49 = vadd.f32 %v287_v26, %v231_v38  ;;  %v1964_v53 = vpack.c.bf16 %v114_v34, %v106_v32  ;;  %v233_v54 = vmul.f32 %v105_v41, %v105_v41  ;;  %v310_v57 = vadd.f32 %v309_v46, %v240_v31  ;;  %v136_v34 = vld [vmem:[%s2798_s1 + $0x388] sm:$0xff]  ;;  %v143_v46 = vld [vmem:[%s2798_s1 + $0x3c0] sm:$0xff] }
  0x20   :  { %524 = vmatpush1.bf16.msra.mxu0 %v1961_v47  ;;  %v351_v58 = vadd.f32 %v350_v35, %v234_v48  ;;  %v241_v59 = vmul.f32 %v113_v44, %v113_v44  ;;  %v1973_v61 = vpack.c.bf16 %v113_v44, %v105_v41  ;;  %v248_v5 = vmul.f32 %v120_v55, %v120_v55  ;;  %v144_v35 = vld [vmem:[%s2798_s1 + $0x3c8] sm:$0xff] }
  0x21   :  { %2843 = vst [vmem:[#allocation11_spill] sm:$0xff] %v1964_v53  ;;  %v289_v1 = vadd.f32 %v288_v49, %v239_v40  ;;  %576 = vmatprep.subr.bf16.mxu1 %v1964_v53  ;;  %v330_v2 = vadd.f32 %v329_v45, %v233_v54  ;;  %v256_v7 = vmul.f32 %v128_v56, %v128_v56  ;;  %v135_v45 = vld [vmem:[%s2798_s1 + $0x380] sm:$0xff]  ;;  %v69_v53 = vld [vmem:[%s2798_s1 + $0x170] sm:$0xff] }
  0x22   :  { %2844 = vst [vmem:[#allocation12_spill] sm:$0xff] %v1973_v61  ;;  %v352_v13 = vadd.f32 %v351_v58, %v242_v52  ;;  %577 = vmatpush1.bf16.msra.mxu1 %v1973_v61  ;;  %v1989_v15 = vpack.c.bf16 %v128_v56, %v120_v55  ;;  %v247_v16 = vmul.f32 %v119_v63, %v119_v63  ;;  %v138_v55 = vld [vmem:[%s2798_s1 + $0x398] sm:$0xff]  ;;  %v61_v61 = vld [vmem:[%s2798_s1 + $0x130] sm:$0xff] }
  0x23   :  { %v255_v18 = vmul.f32 %v127_v0, %v127_v0  ;;  %v331_v22 = vadd.f32 %v330_v2, %v241_v59  ;;  %v311_v24 = vadd.f32 %v310_v57, %v248_v5  ;;  %v1997_v25 = vpack.c.bf16 %v127_v0, %v119_v63  ;;  %v146_v56 = vld [vmem:[%s2798_s1 + $0x3d8] sm:$0xff]  ;;  %v137_v0 = vld [vmem:[%s2798_s1 + $0x390] sm:$0xff] }
  0x24   :  { %v250_v26 = vmul.f32 %v122_v10, %v122_v10  ;;  %525 = vmatprep.subr.bf16.mxu0 %v1989_v15  ;;  %v290_v28 = vadd.f32 %v289_v1, %v247_v16  ;;  %v258_v30 = vmul.f32 %v130_v11, %v130_v11  ;;  %v2000_v31 = vpack.c.bf16 %v130_v11, %v122_v10  ;;  %v145_v1 = vld [vmem:[%s2798_s1 + $0x3d0] sm:$0xff]  ;;  %v19_v11 = vld [vmem:[%s2799_s0] sm:$0xff] }
  0x25   :  { %v249_v32 = vmul.f32 %v121_v20, %v121_v20  ;;  %v312_v38 = vadd.f32 %v311_v24, %v256_v7  ;;  %526 = vmatpush1.bf16.msra.mxu0 %v1997_v25  ;;  %v257_v41 = vmul.f32 %v129_v21, %v129_v21  ;;  %v2009_v44 = vpack.c.bf16 %v129_v21, %v121_v20  ;;  %v36_v24 = vld [vmem:[%s2798_s1 + $0x68] sm:$0xff] }
  0x26   :  { %2845 = vst [vmem:[#allocation13_spill] sm:$0xff] %v2000_v31  ;;  %v353_v40 = vadd.f32 %v352_v13, %v250_v26  ;;  %v291_v48 = vadd.f32 %v290_v28, %v255_v18  ;;  %578 = vmatprep.subr.bf16.mxu1 %v2000_v31  ;;  %v264_v52 = vmul.f32 %v136_v34, %v136_v34  ;;  %v20_v13 = vld [vmem:[%s2799_s0 + $0x8] sm:$0xff] }
  0x27   :  { %2846 = vst [vmem:[#allocation14_spill] sm:$0xff] %v2009_v44  ;;  %v332_v49 = vadd.f32 %v331_v22, %v249_v32  ;;  %v272_v54 = vmul.f32 %v144_v35, %v144_v35  ;;  %579 = vmatpush1.bf16.msra.mxu1 %v2009_v44  ;;  %v2025_v58 = vpack.c.bf16 %v144_v35, %v136_v34  ;;  %v28_v22 = vld [vmem:[%s2798_s1 + $0x28] sm:$0xff] }
  0x28   :  { %v354_v57 = vadd.f32 %v353_v40, %v258_v30  ;;  %v263_v59 = vmul.f32 %v135_v45, %v135_v45  ;;  %v271_v63 = vmul.f32 %v143_v46, %v143_v46  ;;  %v313_v5 = vadd.f32 %v312_v38, %v264_v52 }
  0x29   :  { %v333_v2 = vadd.f32 %v332_v49, %v257_v41  ;;  %v2033_v7 = vpack.c.bf16 %v143_v46, %v135_v45  ;;  %v266_v10 = vmul.f32 %v138_v55, %v138_v55  ;;  %527 = vmatprep.subr.bf16.mxu0 %v2025_v58  ;;  %v274_v18 = vmul.f32 %v146_v56, %v146_v56  ;;  %v27_v41 = vld [vmem:[%s2798_s1 + $0x20] sm:$0xff] }
  0x2a   :  { %v292_v16 = vadd.f32 %v291_v48, %v263_v59  ;;  %v2042_v20 = vpack.c.bf16 %v146_v56, %v138_v55  ;;  %v265_v21 = vmul.f32 %v137_v0, %v137_v0  ;;  %v2050_v26 = vadd.f32 %v313_v5, %v272_v54  ;;  %v35_v45 = vld [vmem:[%s2798_s1 + $0x60] sm:$0xff]  ;;  %v30_v56 = vld [vmem:[%s2798_s1 + $0x38] sm:$0xff]  ;;  %v37_v5 = vld [vmem:[%s2798_s1 + $0x70] sm:$0xff] }
  0x2b   :  { %528 = vmatpush1.bf16.msra.mxu0 %v2033_v7  ;;  %v355_v28 = vadd.f32 %v354_v57, %v266_v10  ;;  %v273_v30 = vmul.f32 %v145_v1, %v145_v1  ;;  %v2053_v32 = vpack.c.bf16 %v145_v1, %v137_v0  ;;  %v2058_v38 = vpack.c.bf16 %v20_v13, %v19_v11  ;;  %v38_v57 = vld [vmem:[%s2798_s1 + $0x78] sm:$0xff] }
  0x2c   :  { %2847 = vst [vmem:[#allocation15_spill] sm:$0xff] %v2042_v20  ;;  %v2055_v34 = vadd.f32 %v292_v16, %v271_v63  ;;  %580 = vmatprep.subr.bf16.mxu1 %v2042_v20  ;;  %v334_v35 = vadd.f32 %v333_v2, %v265_v21  ;;  %v156_v40 = vmul.f32 %v28_v22, %v28_v22  ;;  %v29_v2 = vld [vmem:[%s2798_s1 + $0x30] sm:$0xff]  ;;  %v52_v21 = vld [vmem:[%s2798_s1 + $0xe8] sm:$0xff] }
  0x2d   :  { %2848 = vst [vmem:[#allocation16_spill] sm:$0xff] %v2053_v32  ;;  %v2066_v46 = vadd.f32 %v355_v28, %v274_v18  ;;  %581 = vmatpush1.bf16.msra.mxu1 %v2053_v32  ;;  %v164_v48 = vmul.f32 %v36_v24, %v36_v24  ;;  %v2069_v49 = vpack.c.bf16 %v36_v24, %v28_v22  ;;  %v44_v18 = vld [vmem:[%s2798_s1 + $0xa8] sm:$0xff]  ;;  %v43_v28 = vld [vmem:[%s2798_s1 + $0xa0] sm:$0xff] }
  0x2e   :  { %v2071_v52 = vadd.f32 %v334_v35, %v273_v30  ;;  %546 = vmatmul.mubr.bf16.vlgmr.msra.gmra.mrb[0].mxu0 %v2058_v38  ;;  %v155_v54 = vmul.f32 %v27_v41, %v27_v41  ;;  %v163_v55 = vmul.f32 %v35_v45, %v35_v45  ;;  %v2081_v63 = vpack.c.bf16 %v35_v45, %v27_v41  ;;  %v51_v30 = vld [vmem:[%s2798_s1 + $0xe0] sm:$0xff]  ;;  %v46_v41 = vld [vmem:[%s2798_s1 + $0xb8] sm:$0xff] }
  0x2f   :  { %2849 = vst [vmem:[#allocation17_spill] sm:$0xff] %v2066_v46  ;;  %v384_v59 = vadd.f32 %v164_v48, %v156_v40  ;;  %619 = vmatprep.subr.bf16.mxu0 %v2069_v49  ;;  %555 = vmatprep.mubr.bf16.mxu0 %v2802_v3  ;;  %v158_v1 = vmul.f32 %v30_v56, %v30_v56  ;;  %v54_v45 = vld [vmem:[%s2798_s1 + $0xf8] sm:$0xff] }
  0x30   :  { %2850 = vst [vmem:[#allocation18_spill] sm:$0xff] %v2071_v52  ;;  %v363_v0 = vadd.f32 %v163_v55, %v155_v54  ;;  %599 = vmatmul.mubr.bf16.vlgmr.msra.gmra.mrb[0].mxu1 %v2058_v38  ;;  %620 = vmatpush1.bf16.msra.mxu0 %v2081_v63  ;;  %v166_v10 = vmul.f32 %v38_v57, %v38_v57 }
  0x31   :  { %v2092_v11 = vpack.c.bf16 %v38_v57, %v30_v56  ;;  %608 = vmatprep.mubr.bf16.mxu1 %v2802_v3  ;;  %v157_v13 = vmul.f32 %v29_v2, %v29_v2  ;;  %v165_v16 = vmul.f32 %v37_v5, %v37_v5  ;;  %v2102_v24 = vpack.c.bf16 %v37_v5, %v29_v2  ;;  %v45_v56 = vld [vmem:[%s2798_s1 + $0xb0] sm:$0xff]  ;;  %v68_v3 = vld [vmem:[%s2798_s1 + $0x168] sm:$0xff] }
  0x32   :  { %v426_v22 = vadd.f32 %v166_v10, %v158_v1  ;;  %v172_v40 = vmul.f32 %v44_v18, %v44_v18  ;;  %v180_v48 = vmul.f32 %v52_v21, %v52_v21  ;;  %v2117_v54 = vpack.c.bf16 %v52_v21, %v44_v18  ;;  %v53_v57 = vld [vmem:[%s2798_s1 + $0xf0] sm:$0xff]  ;;  %v60_v21 = vld [vmem:[%s2798_s1 + $0x128] sm:$0xff] }
  0x33   :  { %672 = vmatprep.subr.bf16.mxu1 %v2092_v11  ;;  %2851 = vst [vmem:[#allocation19_spill] sm:$0xff] %v2102_v24  ;;  %v405_v35 = vadd.f32 %v165_v16, %v157_v13  ;;  %v171_v55 = vmul.f32 %v43_v28, %v43_v28  ;;  %v179_v2 = vmul.f32 %v51_v30, %v51_v30 }
  0x34   :  { %673 = vmatpush1.bf16.msra.mxu1 %v2102_v24  ;;  %v385_v1 = vadd.f32 %v384_v59, %v172_v40  ;;  %v2125_v5 = vpack.c.bf16 %v51_v30, %v43_v28  ;;  %621 = vmatprep.subr.bf16.mxu0 %v2117_v54  ;;  %v174_v13 = vmul.f32 %v46_v41, %v46_v41  ;;  %v67_v40 = vld [vmem:[%s2798_s1 + $0x160] sm:$0xff] }
  0x35   :  { %v364_v10 = vadd.f32 %v363_v0, %v171_v55  ;;  %v182_v16 = vmul.f32 %v54_v45, %v54_v45  ;;  %v2128_v18 = vpack.c.bf16 %v54_v45, %v46_v41  ;;  %v173_v59 = vmul.f32 %v45_v56, %v45_v56  ;;  %v59_v0 = vld [vmem:[%s2798_s1 + $0x120] sm:$0xff] }
  0x36   :  { %v386_v32 = vadd.f32 %v385_v1, %v180_v48  ;;  %622 = vmatpush1.bf16.msra.mxu0 %v2125_v5  ;;  %v181_v28 = vmul.f32 %v53_v57, %v53_v57  ;;  %v2137_v30 = vpack.c.bf16 %v53_v57, %v45_v56  ;;  %v427_v45 = vadd.f32 %v426_v22, %v174_v13  ;;  %v62_v1 = vld [vmem:[%s2798_s1 + $0x138] sm:$0xff]  ;;  %v139_v24 = vld [vmem:[%s2798_s1 + $0x3a0] sm:$0xff] }
  0x37   :  { %2852 = vst [vmem:[#allocation20_spill] sm:$0xff] %v2128_v18  ;;  %v365_v41 = vadd.f32 %v364_v10, %v179_v2  ;;  %674 = vmatprep.subr.bf16.mxu1 %v2128_v18  ;;  %v188_v55 = vmul.f32 %v60_v21, %v60_v21  ;;  %v196_v48 = vmul.f32 %v68_v3, %v68_v3  ;;  %v70_v56 = vld [vmem:[%s2798_s1 + $0x178] sm:$0xff] }
  0x38   :  { %2853 = vst [vmem:[#allocation21_spill] sm:$0xff] %v2137_v30  ;;  %v406_v57 = vadd.f32 %v405_v35, %v173_v59  ;;  %675 = vmatpush1.bf16.msra.mxu1 %v2137_v30  ;;  %v2153_v20 = vpack.c.bf16 %v68_v3, %v60_v21  ;;  %v187_v44 = vmul.f32 %v59_v0, %v59_v0  ;;  %v110_v30 = vld [vmem:[%s2798_s1 + $0x2b8] sm:$0xff] }
  0x39   :  { %v195_v2 = vmul.f32 %v67_v40, %v67_v40  ;;  %v428_v22 = vadd.f32 %v427_v45, %v182_v16  ;;  %v387_v10 = vadd.f32 %v386_v32, %v188_v55  ;;  %v2155_v13 = vpack.c.bf16 %v67_v40, %v59_v0  ;;  %v76_v32 = vld [vmem:[%s2798_s1 + $0x1a8] sm:$0xff] }
  0x3a   :  { %v190_v31 = vmul.f32 %v62_v1, %v62_v1  ;;  %v407_v35 = vadd.f32 %v406_v57, %v181_v28  ;;  %623 = vmatprep.subr.bf16.mxu0 %v2153_v20  ;;  %v366_v3 = vadd.f32 %v365_v41, %v187_v44  ;;  %v198_v21 = vmul.f32 %v70_v56, %v70_v56  ;;  %v84_v16 = vld [vmem:[%s2798_s1 + $0x1e8] sm:$0xff]  ;;  %v75_v44 = vld [vmem:[%s2798_s1 + $0x1a0] sm:$0xff]  ;;  %v86_v57 = vld [vmem:[%s2798_s1 + $0x1f8] sm:$0xff] }
  0x3b   :  { %v2164_v59 = vpack.c.bf16 %v70_v56, %v62_v1  ;;  %v388_v0 = vadd.f32 %v387_v10, %v196_v48  ;;  %624 = vmatpush1.bf16.msra.mxu0 %v2155_v13  ;;  %v189_v45 = vmul.f32 %v61_v61, %v61_v61  ;;  %v197_v28 = vmul.f32 %v69_v53, %v69_v53  ;;  %v83_v41 = vld [vmem:[%s2798_s1 + $0x1e0] sm:$0xff] }
  0x3c   :  { %v429_v40 = vadd.f32 %v428_v22, %v190_v31  ;;  %v367_v55 = vadd.f32 %v366_v3, %v195_v2  ;;  %v2180_v1 = vpack.c.bf16 %v69_v53, %v61_v61  ;;  %v204_v56 = vmul.f32 %v76_v32, %v76_v32  ;;  %v78_v31 = vld [vmem:[%s2798_s1 + $0x1b8] sm:$0xff] }
  0x3d   :  { %2854 = vst [vmem:[#allocation22_spill] sm:$0xff] %v2164_v59  ;;  %676 = vmatprep.subr.bf16.mxu1 %v2164_v59  ;;  %v212_v48 = vmul.f32 %v84_v16, %v84_v16  ;;  %v408_v10 = vadd.f32 %v407_v35, %v189_v45  ;;  %v2188_v23 = vpack.c.bf16 %v84_v16, %v76_v32  ;;  %v101_v59 = vld [vmem:[%s2798_s1 + $0x270] sm:$0xff] }
  0x3e   :  { %2855 = vst [vmem:[#allocation23_spill] sm:$0xff] %v2180_v1  ;;  %v430_v22 = vadd.f32 %v429_v40, %v198_v21  ;;  %v203_v14 = vmul.f32 %v75_v44, %v75_v44  ;;  %677 = vmatpush1.bf16.msra.mxu1 %v2180_v1  ;;  %v389_v2 = vadd.f32 %v388_v0, %v204_v56  ;;  %v92_v0 = vld [vmem:[%s2798_s1 + $0x228] sm:$0xff] }
  0x3f   :  { %v211_v53 = vmul.f32 %v83_v41, %v83_v41  ;;  %v2191_v61 = vpack.c.bf16 %v83_v41, %v75_v44  ;;  %v206_v3 = vmul.f32 %v78_v31, %v78_v31  ;;  %v409_v21 = vadd.f32 %v408_v10, %v197_v28  ;;  %625 = vmatprep.subr.bf16.mxu0 %v2188_v23  ;;  %v100_v40 = vld [vmem:[%s2798_s1 + $0x268] sm:$0xff]  ;;  %v102_v10 = vld [vmem:[%s2798_s1 + $0x278] sm:$0xff] }
  0x40   :  { %v368_v35 = vadd.f32 %v367_v55, %v203_v14  ;;  %v214_v32 = vmul.f32 %v86_v57, %v86_v57  ;;  %v2200_v16 = vpack.c.bf16 %v86_v57, %v78_v31  ;;  %v390_v45 = vadd.f32 %v389_v2, %v212_v48  ;;  %v91_v14 = vld [vmem:[%s2798_s1 + $0x220] sm:$0xff] }
  0x41   :  { %626 = vmatpush1.bf16.msra.mxu0 %v2191_v61  ;;  %v431_v44 = vadd.f32 %v430_v22, %v206_v3  ;;  %v205_v41 = vmul.f32 %v77_v51, %v77_v51  ;;  %v213_v28 = vmul.f32 %v85_v42, %v85_v42  ;;  %v99_v55 = vld [vmem:[%s2798_s1 + $0x260] sm:$0xff]  ;;  %v2216_v31 = vpack.c.bf16 %v85_v42, %v77_v51  ;;  %v94_v22 = vld [vmem:[%s2798_s1 + $0x238] sm:$0xff] }
  0x42   :  { %2856 = vst [vmem:[#allocation24_spill] sm:$0xff] %v2200_v16  ;;  %v369_v56 = vadd.f32 %v368_v35, %v211_v53  ;;  %678 = vmatprep.subr.bf16.mxu1 %v2200_v16  ;;  %v220_v57 = vmul.f32 %v92_v0, %v92_v0  ;;  %v228_v48 = vmul.f32 %v100_v40, %v100_v40  ;;  %v93_v16 = vld [vmem:[%s2798_s1 + $0x230] sm:$0xff] }
  0x43   :  { %2857 = vst [vmem:[#allocation25_spill] sm:$0xff] %v2216_v31  ;;  %v432_v2 = vadd.f32 %v431_v44, %v214_v32  ;;  %v410_v3 = vadd.f32 %v409_v21, %v205_v41  ;;  %v2224_v1 = vpack.c.bf16 %v100_v40, %v92_v0  ;;  %v219_v17 = vmul.f32 %v91_v14, %v91_v14  ;;  %v108_v21 = vld [vmem:[%s2798_s1 + $0x2a8] sm:$0xff]  ;;  %v21_v41 = vld [vmem:[%s2799_s0 + $0x10] sm:$0xff] }
  0x44   :  { %679 = vmatpush1.bf16.msra.mxu1 %v2216_v31  ;;  %v391_v53 = vadd.f32 %v390_v45, %v220_v57  ;;  %v227_v42 = vmul.f32 %v99_v55, %v99_v55  ;;  %v2227_v51 = vpack.c.bf16 %v99_v55, %v91_v14  ;;  %v222_v35 = vmul.f32 %v94_v22, %v94_v22  ;;  %v116_v44 = vld [vmem:[%s2798_s1 + $0x2e8] sm:$0xff]  ;;  %v22_v14 = vld [vmem:[%s2799_s0 + $0x18] sm:$0xff]  ;;  %v107_v57 = vld [vmem:[%s2798_s1 + $0x2a0] sm:$0xff] }
  0x45   :  { %v411_v32 = vadd.f32 %v410_v3, %v213_v28  ;;  %627 = vmatprep.subr.bf16.mxu0 %v2224_v1  ;;  %v370_v0 = vadd.f32 %v369_v56, %v219_v17  ;;  %v230_v40 = vmul.f32 %v102_v10, %v102_v10  ;;  %v2239_v45 = vpack.c.bf16 %v102_v10, %v94_v22  ;;  %v115_v22 = vld [vmem:[%s2798_s1 + $0x2e0] sm:$0xff] }
  0x46   :  { %v392_v55 = vadd.f32 %v391_v53, %v228_v48  ;;  %628 = vmatpush1.bf16.msra.mxu0 %v2227_v51  ;;  %v433_v28 = vadd.f32 %v432_v2, %v222_v35  ;;  %v221_v17 = vmul.f32 %v93_v16, %v93_v16  ;;  %v229_v56 = vmul.f32 %v101_v59, %v101_v59 }
  0x47   :  { %2858 = vst [vmem:[#allocation26_spill] sm:$0xff] %v2239_v45  ;;  %v371_v10 = vadd.f32 %v370_v0, %v227_v42  ;;  %680 = vmatprep.subr.bf16.mxu1 %v2239_v45  ;;  %v2258_v3 = vpack.c.bf16 %v101_v59, %v93_v16  ;;  %v236_v31 = vmul.f32 %v108_v21, %v108_v21  ;;  %v118_v42 = vld [vmem:[%s2798_s1 + $0x2f8] sm:$0xff] }
  0x48   :  { %v244_v48 = vmul.f32 %v116_v44, %v116_v44  ;;  %v434_v53 = vadd.f32 %v433_v28, %v230_v40  ;;  %v412_v9 = vadd.f32 %v411_v32, %v221_v17  ;;  %v2260_v2 = vpack.c.bf16 %v116_v44, %v108_v21  ;;  %v109_v21 = vld [vmem:[%s2798_s1 + $0x2b0] sm:$0xff] }
  0x49   :  { %2859 = vst [vmem:[#allocation27_spill] sm:$0xff] %v2258_v3  ;;  %v2262_v35 = vpack.c.bf16 %v22_v14, %v21_v41  ;;  %681 = vmatpush1.bf16.msra.mxu1 %v2258_v3  ;;  %v393_v59 = vadd.f32 %v392_v55, %v236_v31  ;;  %v235_v16 = vmul.f32 %v107_v57, %v107_v57  ;;  %v117_v32 = vld [vmem:[%s2798_s1 + $0x2f0] sm:$0xff]  ;;  %v124_v31 = vld [vmem:[%s2798_s1 + $0x328] sm:$0xff] }
  0x4a   :  { %v243_v0 = vmul.f32 %v115_v22, %v115_v22  ;;  %v2271_v45 = vpack.c.bf16 %v115_v22, %v107_v57  ;;  %v413_v40 = vadd.f32 %v412_v9, %v229_v56  ;;  %629 = vmatprep.subr.bf16.mxu0 %v2260_v2  ;;  %v238_v44 = vmul.f32 %v110_v30, %v110_v30  ;;  %v132_v14 = vld [vmem:[%s2798_s1 + $0x368] sm:$0xff] }
  0x4b   :  { %556 = vmatmul.mubr.bf16.gmra.mrb[4].mxu0 %v2262_v35  ;;  %v246_v41 = vmul.f32 %v118_v42, %v118_v42  ;;  %v394_v55 = vadd.f32 %v393_v59, %v244_v48  ;;  %v372_v28 = vadd.f32 %v371_v10, %v235_v16  ;;  %v2288_v17 = vpack.c.bf16 %v118_v42, %v110_v30  ;;  %v131_v10 = vld [vmem:[%s2798_s1 + $0x360] sm:$0xff]  ;;  %v126_v59 = vld [vmem:[%s2798_s1 + $0x338] sm:$0xff] }
  0x4c   :  { %630 = vmatpush1.bf16.msra.mxu0 %v2271_v45  ;;  %v237_v9 = vmul.f32 %v109_v21, %v109_v21  ;;  %v435_v56 = vadd.f32 %v434_v53, %v238_v44  ;;  %v245_v57 = vmul.f32 %v117_v32, %v117_v32  ;;  %v2290_v22 = vpack.c.bf16 %v117_v32, %v109_v21  ;;  %v134_v16 = vld [vmem:[%s2798_s1 + $0x378] sm:$0xff] }
  0x4d   :  { %2860 = vst [vmem:[#allocation28_spill] sm:$0xff] %v2288_v17  ;;  %609 = vmatmul.mubr.bf16.gmra.mrb[4].mxu1 %v2262_v35  ;;  %v252_v3 = vmul.f32 %v124_v31, %v124_v31  ;;  %v373_v48 = vadd.f32 %v372_v28, %v243_v0  ;;  %682 = vmatprep.subr.bf16.mxu1 %v2288_v17 }
  0x4e   :  { %2861 = vst [vmem:[#allocation29_spill] sm:$0xff] %v2290_v22  ;;  %v414_v30 = vadd.f32 %v413_v40, %v237_v9  ;;  %v260_v42 = vmul.f32 %v132_v14, %v132_v14  ;;  %v2300_v53 = vpack.c.bf16 %v132_v14, %v124_v31  ;;  %v436_v21 = vadd.f32 %v435_v56, %v246_v41  ;;  %v125_v40 = vld [vmem:[%s2798_s1 + $0x330] sm:$0xff] }
  0x4f   :  { %683 = vmatpush1.bf16.msra.mxu1 %v2290_v22  ;;  %v395_v32 = vadd.f32 %v394_v55, %v252_v3  ;;  %v251_v44 = vmul.f32 %v123_v50, %v123_v50  ;;  %v259_v0 = vmul.f32 %v131_v10, %v131_v10  ;;  %v133_v31 = vld [vmem:[%s2798_s1 + $0x370] sm:$0xff]  ;;  %v2316_v28 = vpack.c.bf16 %v131_v10, %v123_v50  ;;  %v140_v3 = vld [vmem:[%s2798_s1 + $0x3a8] sm:$0xff] }
  0x50   :  { %v415_v14 = vadd.f32 %v414_v30, %v245_v57  ;;  %631 = vmatprep.subr.bf16.mxu0 %v2300_v53  ;;  %v254_v9 = vmul.f32 %v126_v59, %v126_v59  ;;  %v262_v41 = vmul.f32 %v134_v16, %v134_v16  ;;  %v148_v55 = vld [vmem:[%s2798_s1 + $0x3e8] sm:$0xff]  ;;  %v2324_v17 = vpack.c.bf16 %v134_v16, %v126_v59 }
  0x51   :  { %v396_v56 = vadd.f32 %v395_v32, %v260_v42  ;;  %v374_v22 = vadd.f32 %v373_v48, %v251_v44  ;;  %v253_v18 = vmul.f32 %v125_v40, %v125_v40  ;;  %v2863_v57 = vmov 0   ;;  %632 = vmatpush1.bf16.msra.mxu0 %v2316_v28  ;;  %v147_v48 = vld [vmem:[%s2798_s1 + $0x3e0] sm:$0xff]  ;;  %v150_v44 = vld [vmem:[%s2798_s1 + $0x3f8] sm:$0xff] }
  0x52   :  { %2862 = vst [vmem:[#allocation30_spill] sm:$0xff] %v2324_v17  ;;  %651 = vmatprep.mubr.bf16.mxu0 %v2863_v57  ;;  %v437_v50 = vadd.f32 %v436_v21, %v254_v9  ;;  %v261_v10 = vmul.f32 %v133_v31, %v133_v31  ;;  %v2328_v30 = vpack.c.bf16 %v133_v31, %v125_v40  ;;  %v142_v21 = vld [vmem:[%s2798_s1 + $0x3b8] sm:$0xff] }
  0x53   :  { %v268_v43 = vmul.f32 %v140_v3, %v140_v3  ;;  %v375_v42 = vadd.f32 %v374_v22, %v259_v0  ;;  %684 = vmatprep.subr.bf16.mxu1 %v2324_v17  ;;  %v416_v59 = vadd.f32 %v415_v14, %v253_v18  ;;  %v276_v16 = vmul.f32 %v148_v55, %v148_v55  ;;  %v141_v18 = vld [vmem:[%s2798_s1 + $0x3b0] sm:$0xff] }
  0x54   :  { %2864 = vst [vmem:[#allocation31_spill] sm:$0xff] %v2328_v30  ;;  %v510_v32 = vpack.c.bf16 %v148_v55, %v140_v3  ;;  %v438_v40 = vadd.f32 %v437_v50, %v262_v41  ;;  %685 = vmatpush1.bf16.msra.mxu1 %v2328_v30  ;;  %v267_v9 = vmul.f32 %v139_v24, %v139_v24  ;;  %v149_v22 = vld [vmem:[%s2798_s1 + $0x3f0] sm:$0xff] }
  0x55   :  { %v397_v31 = vadd.f32 %v396_v56, %v268_v43  ;;  %v275_v27 = vmul.f32 %v147_v48, %v147_v48  ;;  %v417_v0 = vadd.f32 %v416_v59, %v261_v10  ;;  %v509_v14 = vpack.c.bf16 %v147_v48, %v139_v24  ;;  %704 = vmatprep.mubr.bf16.mxu1 %v2863_v57 }
  0x56   :  { %633 = vmatprep.subr.bf16.mxu0 %v510_v32  ;;  %v270_v3 = vmul.f32 %v142_v21, %v142_v21  ;;  %v278_v55 = vmul.f32 %v150_v44, %v150_v44  ;;  %v376_v41 = vadd.f32 %v375_v42, %v267_v9  ;;  %v2352_v50 = vpack.c.bf16 %v150_v44, %v142_v21 }
  0x57   :  { %v2350_v17 = vadd.f32 %v397_v31, %v276_v16  ;;  %v269_v43 = vmul.f32 %v141_v18, %v141_v18  ;;  %634 = vmatpush1.bf16.msra.mxu0 %v509_v14  ;;  %v277_v30 = vmul.f32 %v149_v22, %v149_v22  ;;  %v2355_v46 = vpack.c.bf16 %v149_v22, %v141_v18 }
  0x58   :  { %v439_v56 = vadd.f32 %v438_v40, %v270_v3  ;;  %v2357_v52 = vadd.f32 %v376_v41, %v275_v27  ;;  %686 = vmatprep.subr.bf16.mxu1 %v2352_v50  ;;  %1638 = vmatprep.subr.bf16.mxu0 %v2069_v49  ;;  %v2865_v27 = vld [vmem:[#allocation18_spill] sm:$0xff] }
  0x59   :  { %v418_v24 = vadd.f32 %v417_v0, %v269_v43  ;;  %687 = vmatpush1.bf16.msra.mxu1 %v2355_v46 }
  0x5a   :  { %v2361_v10 = vadd.f32 %v439_v56, %v278_v55  ;;  %652 = vmatmul.mubr.bf16.vlgmr.msra.gmra.mrb[8].mxu0 %v2058_v38  ;;  %1574 = vmatprep.subr.bf16.mxu1 %v1764_v6  ;;  %v294_v6 = vrot.slane %v2055_v34, 4  ;;  %v378_v0 = vrot.slane %v2357_v52, 4 }
  0x5b   :  { %v2364_v48 = vadd.f32 %v418_v24, %v277_v30  ;;  %661 = vmatprep.mubr.bf16.mxu0 %v2863_v57 }
  0x5c   :  { %705 = vmatmul.mubr.bf16.vlgmr.msra.gmra.mrb[8].mxu1 %v2058_v38  ;;  %v441_v55 = vrot.slane %v2361_v10, 4  ;;  %v379_v41 = vadd.f32 %v378_v0, %v2357_v52 }
  0x5d   :  { %714 = vmatprep.mubr.bf16.mxu1 %v2863_v57  ;;  %v420_v3 = vrot.slane %v2364_v48, 4 }
  0x5f   :  { %v421_v56 = vadd.f32 %v420_v3, %v2364_v48 }
  0x60   :  { %1640 = vmatpush1.bf16.xpose.msra.mxu0 %v2081_v63 }
  0x61   :  { %1642 = vmatprep.subr.bf16.mxu0 %v2117_v54 }
  0x62   :  { %662 = vmatmul.mubr.bf16.gmra.mrb[12].mxu0 %v2262_v35  ;;  %1576 = vmatpush1.bf16.xpose.msra.mxu1 %v1775_v12  ;;  %v315_v12 = vrot.slane %v2050_v26, 4 }
  0x63   :  { %1578 = vmatprep.subr.bf16.mxu1 %v1808_v33  ;;  %v336_v33 = vrot.slane %v2865_v27, 4 }
  0x64   :  { %715 = vmatmul.mubr.bf16.gmra.mrb[12].mxu1 %v2262_v35 }
  0x68   :  { %1644 = vmatpush1.bf16.xpose.msra.mxu0 %v2125_v5 }
  0x69   :  { %1646 = vmatprep.subr.bf16.mxu0 %v2153_v20 }
  0x6a   :  { %1580 = vmatpush1.bf16.xpose.msra.mxu1 %v1817_v39  ;;  %v2866_v39 = vld [vmem:[#allocation17_spill] sm:$0xff] }
  0x6b   :  { %1582 = vmatprep.subr.bf16.mxu1 %v1845_v60  ;;  %v357_v60 = vrot.slane %v2866_v39, 4 }
  0x70   :  { %1648 = vmatpush1.bf16.xpose.msra.mxu0 %v2155_v13 }
  0x71   :  { %1650 = vmatprep.subr.bf16.mxu0 %v2188_v23 }
  0x72   :  { %1584 = vmatpush1.bf16.xpose.msra.mxu1 %v1853_v4  ;;  %v295_v4 = vadd.f32 %v294_v6, %v2055_v34  ;;  %v442_v6 = vadd.f32 %v441_v55, %v2361_v10 }
  0x73   :  { %1586 = vmatprep.subr.bf16.mxu1 %v1881_v29  ;;  %v316_v29 = vadd.f32 %v315_v12, %v2050_v26 }
  0x74   :  { %v443_v10 = vrot.slane %v442_v6, 2 }
  0x75   :  { %v317_v23 = vrot.slane %v316_v29, 2 }
  0x78   :  { %1652 = vmatpush1.bf16.xpose.msra.mxu0 %v2191_v61 }
  0x79   :  { %1654 = vmatprep.subr.bf16.mxu0 %v2224_v1 }
  0x7a   :  { %1588 = vmatpush1.bf16.xpose.msra.mxu1 %v1889_v37  ;;  %v337_v37 = vadd.f32 %v336_v33, %v2865_v27 }
  0x7b   :  { %1590 = vmatprep.subr.bf16.mxu1 %v1917_v62  ;;  %v358_v62 = vadd.f32 %v357_v60, %v2866_v39 }
  0x80   :  { %1656 = vmatpush1.bf16.xpose.msra.mxu0 %v2227_v51 }
  0x81   :  { %1658 = vmatprep.subr.bf16.mxu0 %v2260_v2 }
  0x82   :  { %1592 = vmatpush1.bf16.xpose.msra.mxu1 %v1925_v8  ;;  %v296_v8 = vrot.slane %v295_v4, 2 }
  0x83   :  { %1594 = vmatprep.subr.bf16.mxu1 %v1953_v36  ;;  %v338_v36 = vrot.slane %v337_v37, 2 }
  0x88   :  { %1660 = vmatpush1.bf16.xpose.msra.mxu0 %v2271_v45 }
  0x89   :  { %1662 = vmatprep.subr.bf16.mxu0 %v2300_v53 }
  0x8a   :  { %1596 = vmatpush1.bf16.xpose.msra.mxu1 %v1961_v47  ;;  %v297_v47 = vadd.f32 %v296_v8, %v295_v4  ;;  %v380_v4 = vrot.slane %v379_v41, 2 }
  0x8b   :  { %1598 = vmatprep.subr.bf16.mxu1 %v1989_v15  ;;  %v318_v15 = vadd.f32 %v317_v23, %v316_v29 }
  0x8d   :  { %v319_v20 = vrot.slane %v318_v15, 1 }
  0x90   :  { %1664 = vmatpush1.bf16.xpose.msra.mxu0 %v2316_v28 }
  0x91   :  { %1666 = vmatprep.subr.bf16.mxu0 %v510_v32 }
  0x92   :  { %1600 = vmatpush1.bf16.xpose.msra.mxu1 %v1997_v25  ;;  %v339_v25 = vadd.f32 %v338_v36, %v337_v37 }
  0x93   :  { %1602 = vmatprep.subr.bf16.mxu1 %v2025_v58 }
  0x94   :  { %v340_v38 = vrot.slane %v339_v25, 1 }
  0x96   :  { %v341_v5 = vadd.f32 %v340_v38, %v339_v25 }
  0x98   :  { %1668 = vmatpush1.bf16.xpose.msra.mxu0 %v509_v14  ;;  %v399_v14 = vrot.slane %v2350_v17, 4 }
  0x99   :  { %1670 = vmatprep.subr.bf16.mxu0 %v2092_v11  ;;  %v320_v11 = vadd.f32 %v319_v20, %v318_v15 }
  0x9a   :  { %1604 = vmatpush1.bf16.xpose.msra.mxu1 %v2033_v7  ;;  %v298_v7 = vrot.slane %v297_v47, 1  ;;  %v400_v43 = vadd.f32 %v399_v14, %v2350_v17 }
  0x9b   :  { %1606 = vmatprep.subr.bf16.mxu1 %v1787_v19  ;;  %v359_v19 = vrot.slane %v358_v62, 2 }
  0x9c   :  { %v299_v63 = vadd.f32 %v298_v7, %v297_v47  ;;  %v401_v29 = vrot.slane %v400_v43, 2  ;;  %v422_v47 = vrot.slane %v421_v56, 2 }
  0x9d   :  { %v360_v58 = vadd.f32 %v359_v19, %v358_v62 }
  0x9f   :  { %v361_v49 = vrot.slane %v360_v58, 1 }
  0xa1   :  { %v362_v51 = vadd.f32 %v361_v49, %v360_v58 }
 0x101   :  { %v547_v34 = vpop.f32.mrb[0].mxu0 }
 0x102   :  { %v725_v26 = vmul.f32 2.0, %v547_v34  ;;  %v549_v54 = vpop.f32.mrb[1].mxu0  ;;  %v381_v34 = vadd.f32 %v380_v4, %v379_v41 }
 0x103   :  { %v726_v13 = vmul.f32 2.0, %v549_v54  ;;  %v551_v1 = vpop.f32.mrb[2].mxu0  ;;  %v600_v61 = vpop.f32.mrb[0].mxu1 }
 0x104   :  { %v2411_v45 = vsub.f32 %v299_v63, %v725_v26  ;;  %v733_v2 = vmul.f32 2.0, %v551_v1  ;;  %v727_v35 = vmul.f32 2.0, %v600_v61  ;;  %v553_v53 = vpop.f32.mrb[3].mxu0  ;;  %v602_v28 = vpop.f32.mrb[1].mxu1  ;;  %v402_v26 = vadd.f32 %v401_v29, %v400_v43 }
 0x105   :  { %v2413_v57 = vsub.f32 %v320_v11, %v726_v13  ;;  %v734_v30 = vmul.f32 2.0, %v553_v53  ;;  %v728_v42 = vmul.f32 2.0, %v602_v28  ;;  %v604_v59 = vpop.f32.mrb[2].mxu1  ;;  %v423_v1 = vadd.f32 %v422_v47, %v421_v56 }
 0x106   :  { %v2415_v16 = vsub.f32 %v299_v63, %v733_v2  ;;  %v2417_v32 = vsub.f32 %v341_v5, %v727_v35  ;;  %v735_v21 = vmul.f32 2.0, %v604_v59  ;;  %v606_v44 = vpop.f32.mrb[3].mxu1  ;;  %v444_v61 = vadd.f32 %v443_v10, %v442_v6 }
 0x107   :  { %v2419_v40 = vsub.f32 %v320_v11, %v734_v30  ;;  %v2421_v31 = vsub.f32 %v362_v51, %v728_v42  ;;  %v736_v9 = vmul.f32 2.0, %v606_v44  ;;  %v382_v35 = vrot.slane %v381_v34, 1 }
 0x108   :  { %v2423_v18 = vsub.f32 %v341_v5, %v735_v21  ;;  %v424_v53 = vrot.slane %v423_v1, 1  ;;  %v445_v30 = vrot.slane %v444_v61, 1 }
 0x109   :  { %v2425_v22 = vsub.f32 %v362_v51, %v736_v9  ;;  %v807_v2 = vmin.f32 %v2415_v16, %v2419_v40 }
 0x10a   :  { %v425_v0 = vadd.f32 %v424_v53, %v423_v1  ;;  %v446_v56 = vadd.f32 %v445_v30, %v444_v61 }
 0x10b   :  { %v808_v42 = vmin.f32 %v807_v2, %v2423_v18 }
 0x11e   :  { %v557_v24 = vpop.f32.mrb[4].mxu0 }
 0x11f   :  { %v741_v12 = vmul.f32 2.0, %v557_v24  ;;  %v559_v27 = vpop.f32.mrb[5].mxu0  ;;  %v809_v24 = vmin.f32 %v808_v42, %v2425_v22 }
 0x120   :  { %v742_v33 = vmul.f32 2.0, %v559_v27  ;;  %v561_v39 = vpop.f32.mrb[6].mxu0  ;;  %v610_v60 = vpop.f32.mrb[4].mxu1 }
 0x121   :  { %v2435_v37 = vsub.f32 %v299_v63, %v741_v12  ;;  %v749_v62 = vmul.f32 2.0, %v561_v39  ;;  %v563_v8 = vpop.f32.mrb[7].mxu0  ;;  %v743_v23 = vmul.f32 2.0, %v610_v60  ;;  %v612_v52 = vpop.f32.mrb[5].mxu1 }
 0x122   :  { %v2437_v36 = vsub.f32 %v320_v11, %v742_v33  ;;  %v750_v17 = vmul.f32 2.0, %v563_v8  ;;  %v744_v48 = vmul.f32 2.0, %v612_v52  ;;  %v614_v19 = vpop.f32.mrb[6].mxu1 }
 0x123   :  { %v2439_v15 = vsub.f32 %v299_v63, %v749_v62  ;;  %v2441_v25 = vsub.f32 %v341_v5, %v743_v23  ;;  %v751_v58 = vmul.f32 2.0, %v614_v19  ;;  %v616_v7 = vpop.f32.mrb[7].mxu1  ;;  %v798_v63 = vmin.f32 %v2411_v45, %v2413_v57 }
 0x124   :  { %v2443_v20 = vsub.f32 %v320_v11, %v750_v17  ;;  %v2445_v38 = vsub.f32 %v362_v51, %v744_v48  ;;  %v752_v49 = vmul.f32 2.0, %v616_v7  ;;  %v403_v11 = vrot.slane %v402_v26, 1 }
 0x125   :  { %v2447_v54 = vsub.f32 %v341_v5, %v751_v58  ;;  %v799_v28 = vmin.f32 %v798_v63, %v2417_v32  ;;  %v383_v5 = vadd.f32 %v382_v35, %v381_v34 }
 0x126   :  { %v2449_v13 = vsub.f32 %v362_v51, %v752_v49  ;;  %v816_v51 = vmin.f32 %v2435_v37, %v2437_v36  ;;  %v404_v21 = vadd.f32 %v403_v11, %v402_v26  ;;  %v825_v3 = vmin.f32 %v2439_v15, %v2443_v20 }
 0x127   :  { %v800_v14 = vmin.f32 %v799_v28, %v2421_v31 }
 0x128   :  { %v817_v60 = vmin.f32 %v816_v51, %v2441_v25  ;;  %v826_v47 = vmin.f32 %v825_v3, %v2447_v54 }
 0x12a   :  { %v818_v53 = vmin.f32 %v817_v60, %v2445_v38  ;;  %v827_v28 = vmin.f32 %v826_v47, %v2449_v13 }
 0x12d   :  { %v653_v59 = vpop.f32.mrb[8].mxu0 }
 0x12e   :  { %v729_v44 = vmul.f32 2.0, %v653_v59  ;;  %v655_v9 = vpop.f32.mrb[9].mxu0 }
 0x12f   :  { %v730_v55 = vmul.f32 2.0, %v655_v9  ;;  %v706_v41 = vpop.f32.mrb[8].mxu1  ;;  %v657_v43 = vpop.f32.mrb[10].mxu0 }
 0x130   :  { %v2463_v6 = vsub.f32 %v383_v5, %v729_v44  ;;  %v731_v12 = vmul.f32 2.0, %v706_v41  ;;  %v737_v27 = vmul.f32 2.0, %v657_v43  ;;  %v708_v33 = vpop.f32.mrb[9].mxu1  ;;  %v659_v39 = vpop.f32.mrb[11].mxu0 }
 0x131   :  { %v2466_v4 = vsub.f32 %v404_v21, %v730_v55  ;;  %v732_v29 = vmul.f32 2.0, %v708_v33  ;;  %v738_v62 = vmul.f32 2.0, %v659_v39  ;;  %v710_v8 = vpop.f32.mrb[10].mxu1 }
 0x132   :  { %v801_v23 = vmin.f32 %v800_v14, %v2463_v6  ;;  %v2469_v52 = vsub.f32 %v425_v0, %v731_v12  ;;  %v2471_v17 = vsub.f32 %v383_v5, %v737_v27  ;;  %v739_v48 = vmul.f32 2.0, %v710_v8  ;;  %v712_v19 = vpop.f32.mrb[11].mxu1 }
 0x133   :  { %v2474_v10 = vsub.f32 %v404_v21, %v738_v62  ;;  %v740_v58 = vmul.f32 2.0, %v712_v19  ;;  %v2476_v7 = vsub.f32 %v446_v56, %v732_v29 }
 0x134   :  { %v810_v49 = vmin.f32 %v809_v24, %v2471_v17  ;;  %v2479_v34 = vsub.f32 %v425_v0, %v739_v48  ;;  %v802_v26 = vmin.f32 %v801_v23, %v2466_v4 }
 0x135   :  { %v2482_v1 = vsub.f32 %v446_v56, %v740_v58  ;;  %v663_v61 = vpop.f32.mrb[12].mxu0 }
 0x136   :  { %v811_v63 = vmin.f32 %v810_v49, %v2474_v10  ;;  %v745_v2 = vmul.f32 2.0, %v663_v61  ;;  %v665_v35 = vpop.f32.mrb[13].mxu0  ;;  %v803_v11 = vmin.f32 %v802_v26, %v2469_v52 }
 0x137   :  { %v746_v30 = vmul.f32 2.0, %v665_v35  ;;  %v667_v42 = vpop.f32.mrb[14].mxu0  ;;  %v716_v51 = vpop.f32.mrb[12].mxu1 }
 0x138   :  { %v2488_v59 = vsub.f32 %v383_v5, %v745_v2  ;;  %v753_v44 = vmul.f32 2.0, %v667_v42  ;;  %v669_v9 = vpop.f32.mrb[15].mxu0  ;;  %v747_v14 = vmul.f32 2.0, %v716_v51  ;;  %v718_v3 = vpop.f32.mrb[13].mxu1  ;;  %v804_v55 = vmin.f32 %v803_v11, %v2476_v7 }
 0x139   :  { %v2491_v41 = vsub.f32 %v404_v21, %v746_v30  ;;  %v754_v43 = vmul.f32 2.0, %v669_v9  ;;  %v748_v24 = vmul.f32 2.0, %v718_v3  ;;  %v720_v12 = vpop.f32.mrb[14].mxu1  ;;  %v812_v27 = vmin.f32 %v811_v63, %v2479_v34 }
 0x13a   :  { %v819_v33 = vmin.f32 %v818_v53, %v2488_v59  ;;  %v2495_v39 = vsub.f32 %v383_v5, %v753_v44  ;;  %v2497_v60 = vsub.f32 %v425_v0, %v747_v14  ;;  %805 = vmin.xlane.f32.xlu0 %v804_v55  ;;  %v755_v29 = vmul.f32 2.0, %v720_v12  ;;  %v722_v62 = vpop.f32.mrb[15].mxu1 }
 0x13b   :  { %v2499_v8 = vsub.f32 %v404_v21, %v754_v43  ;;  %v756_v23 = vmul.f32 2.0, %v722_v62  ;;  %v2501_v48 = vsub.f32 %v446_v56, %v748_v24  ;;  %v813_v58 = vmin.f32 %v812_v27, %v2482_v1 }
 0x13c   :  { %v828_v19 = vmin.f32 %v827_v28, %v2495_v39  ;;  %v2504_v47 = vsub.f32 %v425_v0, %v755_v29  ;;  %v820_v49 = vmin.f32 %v819_v33, %v2491_v41  ;;  %v789_v0 = vlaneseq }
 0x13d   :  { %v2508_v5 = vsub.f32 %v446_v56, %v756_v23 }
 0x13e   :  { %v829_v26 = vmin.f32 %v828_v19, %v2499_v8  ;;  %814 = vmin.xlane.f32.xlu0 %v813_v58  ;;  %v821_v61 = vmin.f32 %v820_v49, %v2497_v60  ;;  %v2515_v35 = vand.u32 127, %v789_v0 }
 0x140   :  { %v822_v21 = vmin.f32 %v821_v61, %v2501_v48  ;;  %v830_v63 = vmin.f32 %v829_v26, %v2504_v47  ;;  %v2518_v11 = vadd.s32 128, %v2515_v35  ;;  %v2523_v53 = vadd.s32 256, %v2515_v35 }
 0x141   :  { %v2526_v28 = vadd.s32 384, %v2515_v35  ;;  %v2529_v30 = vadd.s32 512, %v2515_v35  ;;  %v2532_v42 = vadd.s32 640, %v2515_v35  ;;  %v2541_v9 = vadd.s32 896, %v2515_v35 }
 0x142   :  { %823 = vmin.xlane.f32.xlu1 %v822_v21  ;;  %v831_v2 = vmin.f32 %v830_v63, %v2508_v5 }
 0x146   :  { %832 = vmin.xlane.f32.xlu1 %v831_v2 }
 0x1c7   :  { %v806_v56 = vpop.xlane.xlu0 %805 }
 0x1c8   :  { %vm834_vm0 = vcmp.le.f32.partialorder %v2411_v45, %v806_v56  ;;  %vm835_vm1 = vcmp.le.f32.partialorder %v2413_v57, %v806_v56  ;;  %vm836_vm2 = vcmp.le.f32.partialorder %v2417_v32, %v806_v56  ;;  %v2538_v57 = vadd.s32 768, %v2515_v35 }
 0x1c9   :  { %v866_v51 = vsel %vm834_vm0, %v2515_v35, 1024  ;;  %v867_v45 = vsel %vm835_vm1, %v2518_v11, 1024  ;;  %vm837_vm3 = vcmp.le.f32.partialorder %v2421_v31, %v806_v56  ;;  %vm838_vm4 = vcmp.le.f32.partialorder %v2463_v6, %v806_v56 }
 0x1ca   :  { %vm839_vm5 = vcmp.le.f32.partialorder %v2466_v4, %v806_v56  ;;  %vm898_vm6 = vcmp.lt.s32.totalorder %v866_v51, %v867_v45  ;;  %vm840_vm9 = vcmp.le.f32.partialorder %v2469_v52, %v806_v56  ;;  %vm841_vm10 = vcmp.le.f32.partialorder %v2476_v7, %v806_v56 }
 0x1cb   :  { %v815_v44 = vpop.xlane.xlu0 %814  ;;  %v868_v32 = vsel %vm836_vm2, %v2523_v53, 1024  ;;  %v899_v14 = vsel %vm898_vm6, %v866_v51, %v867_v45  ;;  %v869_v3 = vsel %vm837_vm3, %v2526_v28, 1024  ;;  %v870_v31 = vsel %vm838_vm4, %v2529_v30, 1024 }
 0x1cc   :  { %vm842_vm7 = vcmp.le.f32.partialorder %v2415_v16, %v815_v44  ;;  %vm843_vm8 = vcmp.le.f32.partialorder %v2419_v40, %v815_v44  ;;  %vm900_vm11 = vcmp.lt.s32.totalorder %v899_v14, %v868_v32  ;;  %v871_v4 = vsel %vm839_vm5, %v2532_v42, 1024 }
 0x1cd   :  { %v874_v6 = vsel %vm842_vm7, %v2515_v35, 1024  ;;  %v901_v55 = vsel %vm900_vm11, %v899_v14, %v868_v32  ;;  %vm844_vm12 = vcmp.le.f32.partialorder %v2423_v18, %v815_v44  ;;  %v875_v16 = vsel %vm843_vm8, %v2518_v11, 1024 }
 0x1ce   :  { %v872_v52 = vsel %vm840_vm9, %v2538_v57, 1024  ;;  %v873_v7 = vsel %vm841_vm10, %v2541_v9, 1024  ;;  %vm902_vm13 = vcmp.lt.s32.totalorder %v901_v55, %v869_v3  ;;  %vm845_vm14 = vcmp.le.f32.partialorder %v2425_v22, %v815_v44 }
 0x1cf   :  { %v2557_v40 = vpop.xlane.xlu1 %823  ;;  %v903_v43 = vsel %vm902_vm13, %v901_v55, %v869_v3  ;;  %vm846_vm15 = vcmp.le.f32.partialorder %v2471_v17, %v815_v44  ;;  %vm847_vm0 = vcmp.le.f32.partialorder %v2474_v10, %v815_v44  ;;  %vm926_vm1 = vcmp.lt.s32.totalorder %v874_v6, %v875_v16 }
 0x1d0   :  { %vm904_vm2 = vcmp.lt.s32.totalorder %v903_v43, %v870_v31  ;;  %vm848_vm3 = vcmp.le.f32.partialorder %v2479_v34, %v815_v44  ;;  %v876_v18 = vsel %vm844_vm12, %v2523_v53, 1024  ;;  %v927_v24 = vsel %vm926_vm1, %v874_v6, %v875_v16 }
 0x1d1   :  { %v905_v12 = vsel %vm904_vm2, %v903_v43, %v870_v31  ;;  %vm928_vm4 = vcmp.lt.s32.totalorder %v927_v24, %v876_v18  ;;  %vm850_vm5 = vcmp.le.f32.partialorder %v2435_v37, %v2557_v40  ;;  %vm851_vm6 = vcmp.le.f32.partialorder %v2437_v36, %v2557_v40 }
 0x1d2   :  { %vm906_vm7 = vcmp.lt.s32.totalorder %v905_v12, %v871_v4  ;;  %vm849_vm8 = vcmp.le.f32.partialorder %v2482_v1, %v815_v44  ;;  %v877_v22 = vsel %vm845_vm14, %v2526_v28, 1024  ;;  %v929_v27 = vsel %vm928_vm4, %v927_v24, %v876_v18 }
 0x1d3   :  { %v907_v33 = vsel %vm906_vm7, %v905_v12, %v871_v4  ;;  %v878_v29 = vsel %vm846_vm15, %v2529_v30, 1024  ;;  %v879_v62 = vsel %vm847_vm0, %v2532_v42, 1024  ;;  %vm930_vm9 = vcmp.lt.s32.totalorder %v929_v27, %v877_v22  ;;  %v2585_v17 = vpop.xlane.xlu1 %832 }
 0x1d4   :  { %vm908_vm10 = vcmp.lt.s32.totalorder %v907_v33, %v872_v52  ;;  %v931_v37 = vsel %vm930_vm9, %v929_v27, %v877_v22  ;;  %v882_v36 = vsel %vm850_vm5, %v2515_v35, 1024  ;;  %v883_v23 = vsel %vm851_vm6, %v2518_v11, 1024 }
 0x1d5   :  { %v909_v19 = vsel %vm908_vm10, %v907_v33, %v872_v52  ;;  %v880_v58 = vsel %vm848_vm3, %v2538_v57, 1024  ;;  %vm932_vm11 = vcmp.lt.s32.totalorder %v931_v37, %v878_v29  ;;  %vm852_vm12 = vcmp.le.f32.partialorder %v2441_v25, %v2557_v40 }
 0x1d6   :  { %vm910_vm13 = vcmp.lt.s32.totalorder %v909_v19, %v873_v7  ;;  %v881_v10 = vsel %vm849_vm8, %v2541_v9, 1024  ;;  %v933_v49 = vsel %vm932_vm11, %v931_v37, %v878_v29  ;;  %vm853_vm14 = vcmp.le.f32.partialorder %v2445_v38, %v2557_v40 }
 0x1d7   :  { %v2592_v26 = vsel %vm910_vm13, %v909_v19, %v873_v7  ;;  %vm934_vm15 = vcmp.lt.s32.totalorder %v933_v49, %v879_v62  ;;  %vm854_vm0 = vcmp.le.f32.partialorder %v2488_v59, %v2557_v40  ;;  %vm954_vm1 = vcmp.lt.s32.totalorder %v882_v36, %v883_v23 }
 0x1d8   :  { %v913_v25 = vshra.s32 %v2592_v26, 16  ;;  %v935_v34 = vsel %vm934_vm15, %v933_v49, %v879_v62  ;;  %v884_v61 = vsel %vm852_vm12, %v2523_v53, 1024  ;;  %v955_v21 = vsel %vm954_vm1, %v882_v36, %v883_v23 }
 0x1d9   :  { %vm936_vm2 = vcmp.lt.s32.totalorder %v935_v34, %v880_v58  ;;  %v885_v1 = vsel %vm853_vm14, %v2526_v28, 1024  ;;  %vm956_vm3 = vcmp.lt.s32.totalorder %v955_v21, %v884_v61  ;;  %vm858_vm4 = vcmp.le.f32.partialorder %v2439_v15, %v2585_v17 }
 0x1da   :  { %v2601_v38 = vcvt.s32.f32 %v913_v25  ;;  %v937_v63 = vsel %vm936_vm2, %v935_v34, %v880_v58  ;;  %v957_v2 = vsel %vm956_vm3, %v955_v21, %v884_v61  ;;  %vm859_vm5 = vcmp.le.f32.partialorder %v2443_v20, %v2585_v17 }
 0x1db   :  { %vm938_vm6 = vcmp.lt.s32.totalorder %v937_v63, %v881_v10  ;;  %vm855_vm7 = vcmp.le.f32.partialorder %v2491_v41, %v2557_v40  ;;  %vm958_vm8 = vcmp.lt.s32.totalorder %v957_v2, %v885_v1  ;;  %vm856_vm9 = vcmp.le.f32.partialorder %v2497_v60, %v2557_v40 }
 0x1dc   :  { %916 = vmin.xlane.f32.xlu0 %v2601_v38  ;;  %v939_v0 = vsel %vm938_vm6, %v937_v63, %v881_v10  ;;  %v886_v15 = vsel %vm854_vm0, %v2529_v30, 1024  ;;  %v959_v56 = vsel %vm958_vm8, %v957_v2, %v885_v1  ;;  %v890_v20 = vsel %vm858_vm4, %v2515_v35, 1024 }
 0x1dd   :  { %v941_v51 = vshra.s32 %v939_v0, 16  ;;  %vm960_vm10 = vcmp.lt.s32.totalorder %v959_v56, %v886_v15  ;;  %v891_v45 = vsel %vm859_vm5, %v2518_v11, 1024  ;;  %v887_v41 = vsel %vm855_vm7, %v2532_v42, 1024 }
 0x1de   :  { %v961_v44 = vsel %vm960_vm10, %v959_v56, %v886_v15  ;;  %vm860_vm11 = vcmp.le.f32.partialorder %v2447_v54, %v2585_v17  ;;  %vm857_vm12 = vcmp.le.f32.partialorder %v2501_v48, %v2557_v40  ;;  %v888_v59 = vsel %vm856_vm9, %v2538_v57, 1024 }
 0x1df   :  { %v943_v32 = vcvt.s32.f32 %v941_v51  ;;  %vm962_vm13 = vcmp.lt.s32.totalorder %v961_v44, %v887_v41  ;;  %vm861_vm14 = vcmp.le.f32.partialorder %v2449_v13, %v2585_v17  ;;  %vm982_vm15 = vcmp.lt.s32.totalorder %v890_v20, %v891_v45 }
 0x1e0   :  { %v963_v60 = vsel %vm962_vm13, %v961_v44, %v887_v41  ;;  %v892_v14 = vsel %vm860_vm11, %v2523_v53, 1024  ;;  %v983_v3 = vsel %vm982_vm15, %v890_v20, %v891_v45  ;;  %v889_v31 = vsel %vm857_vm12, %v2541_v9, 1024  ;;  %v2867_v20 = vld [vmem:[#allocation2_spill] sm:$0xff]  ;;  %v2868_v45 = vld [vmem:[#allocation19_spill] sm:$0xff] }
 0x1e1   :  { %944 = vmin.xlane.f32.xlu1 %v943_v32  ;;  %vm964_vm0 = vcmp.lt.s32.totalorder %v963_v60, %v888_v59  ;;  %vm862_vm1 = vcmp.le.f32.partialorder %v2495_v39, %v2585_v17  ;;  %vm984_vm2 = vcmp.lt.s32.totalorder %v983_v3, %v892_v14  ;;  %v893_v48 = vsel %vm861_vm14, %v2526_v28, 1024  ;;  %v2869_v44 = vld [vmem:[#allocation3_spill] sm:$0xff] }
 0x1e2   :  { %v965_v54 = vsel %vm964_vm0, %v963_v60, %v888_v59  ;;  %v985_v6 = vsel %vm984_vm2, %v983_v3, %v892_v14  ;;  %vm863_vm4 = vcmp.le.f32.partialorder %v2499_v8, %v2585_v17  ;;  %v894_v55 = vsel %vm862_vm1, %v2529_v30, 1024 }
 0x1e3   :  { %vm966_vm3 = vcmp.lt.s32.totalorder %v965_v54, %v889_v31  ;;  %vm986_vm5 = vcmp.lt.s32.totalorder %v985_v6, %v893_v48  ;;  %vm864_vm6 = vcmp.le.f32.partialorder %v2504_v47, %v2585_v17  ;;  %v895_v39 = vsel %vm863_vm4, %v2532_v42, 1024 }
 0x1e4   :  { %v967_v4 = vsel %vm966_vm3, %v965_v54, %v889_v31  ;;  %v987_v16 = vsel %vm986_vm5, %v985_v6, %v893_v48  ;;  %vm865_vm8 = vcmp.le.f32.partialorder %v2508_v5, %v2585_v17  ;;  %v896_v8 = vsel %vm864_vm6, %v2538_v57, 1024  ;;  %v2871_v31 = vld [vmem:[#allocation4_spill] sm:$0xff]  ;;  %v2872_v54 = vld [vmem:[#allocation21_spill] sm:$0xff]  ;;  %v2874_v6 = vld [vmem:[#allocation22_spill] sm:$0xff] }
 0x1e5   :  { %v969_v13 = vshra.s32 %v967_v4, 16  ;;  %vm988_vm7 = vcmp.lt.s32.totalorder %v987_v16, %v894_v55  ;;  %v897_v43 = vsel %vm865_vm8, %v2541_v9, 1024  ;;  %v912_v22 = vand.u32 65535, %v2592_v26  ;;  %v2873_v48 = vld [vmem:[#allocation5_spill] sm:$0xff] }
 0x1e6   :  { %v989_v52 = vsel %vm988_vm7, %v987_v16, %v894_v55  ;;  %v940_v5 = vand.u32 65535, %v939_v0  ;;  %v968_v23 = vand.u32 65535, %v967_v4  ;;  %v1731_v56 = vmov 1.0  }
 0x1e7   :  { %v971_v40 = vcvt.s32.f32 %v969_v13  ;;  %vm990_vm9 = vcmp.lt.s32.totalorder %v989_v52, %v895_v39  ;;  %v914_v33 = vcvt.s32.f32 %v912_v22  ;;  %v2888_v22 = vld [vmem:[#allocation29_spill] sm:$0xff] }
 0x1e8   :  { %v991_v7 = vsel %vm990_vm9, %v989_v52, %v895_v39  ;;  %v942_v37 = vcvt.s32.f32 %v940_v5  ;;  %v970_v58 = vcvt.s32.f32 %v968_v23  ;;  %v2876_v39 = vld [vmem:[#allocation23_spill] sm:$0xff]  ;;  %v2891_v5 = vld [vmem:[#allocation14_spill] sm:$0xff] }
 0x1e9   :  { %972 = vmin.xlane.f32.xlu0 %v971_v40  ;;  %vm992_vm10 = vcmp.lt.s32.totalorder %v991_v7, %v896_v8 }
 0x1ea   :  { %v993_v18 = vsel %vm992_vm10, %v991_v7, %v896_v8  ;;  %v2877_v8 = vld [vmem:[#allocation7_spill] sm:$0xff]  ;;  %v2878_v7 = vld [vmem:[#allocation24_spill] sm:$0xff] }
 0x1eb   :  { %vm994_vm11 = vcmp.lt.s32.totalorder %v993_v18, %v897_v43 }
 0x1ec   :  { %v995_v24 = vsel %vm994_vm11, %v993_v18, %v897_v43  ;;  %v2883_v43 = vld [vmem:[#allocation10_spill] sm:$0xff]  ;;  %v2884_v18 = vld [vmem:[#allocation27_spill] sm:$0xff] }
 0x1ed   :  { %v997_v47 = vshra.s32 %v995_v24, 16  ;;  %v996_v10 = vand.u32 65535, %v995_v24  ;;  %v2885_v24 = vld [vmem:[#allocation11_spill] sm:$0xff] }
 0x1ef   :  { %v999_v12 = vcvt.s32.f32 %v997_v47  ;;  %v998_v26 = vcvt.s32.f32 %v996_v10  ;;  %v2886_v47 = vld [vmem:[#allocation28_spill] sm:$0xff] }
 0x1f1   :  { %1000 = vmin.xlane.f32.xlu1 %v999_v12 }
 0x269   :  { %v917_v27 = vpop.xlane.xlu0 %916 }
 0x26a   :  { %vm918_vm12 = vcmp.eq.f32.partialorder %v2601_v38, %v917_v27  ;;  %v923_v34 = vcvt.f32.s32 %v917_v27  ;;  %v2889_v27 = vld [vmem:[#allocation13_spill] sm:$0xff] }
 0x26b   :  { %v919_v29 = vsel %vm918_vm12, %v914_v33, inf  ;;  %v2890_v33 = vld [vmem:[#allocation30_spill] sm:$0xff] }
 0x26c   :  { %920 = vmin.xlane.f32.xlu0 %v919_v29  ;;  %v924_v21 = vshll.u32 %v923_v34, 16  ;;  %v2892_v29 = vld [vmem:[#allocation31_spill] sm:$0xff] }
 0x26e   :  { %v945_v62 = vpop.xlane.xlu1 %944 }
 0x26f   :  { %vm946_vm13 = vcmp.eq.f32.partialorder %v943_v32, %v945_v62  ;;  %v951_v38 = vcvt.f32.s32 %v945_v62  ;;  %v2870_v32 = vld [vmem:[#allocation20_spill] sm:$0xff]  ;;  %v2893_v62 = vld [vmem:[#allocation15_spill] sm:$0xff] }
 0x270   :  { %v947_v36 = vsel %vm946_vm13, %v942_v37, inf  ;;  %v2894_v37 = vld [vmem:[#allocation16_spill] sm:$0xff] }
 0x271   :  { %948 = vmin.xlane.f32.xlu1 %v947_v36  ;;  %v952_v0 = vshll.u32 %v951_v38, 16 }
 0x276   :  { %v973_v19 = vpop.xlane.xlu0 %972 }
 0x277   :  { %vm974_vm14 = vcmp.eq.f32.partialorder %v971_v40, %v973_v19  ;;  %v979_v41 = vcvt.f32.s32 %v973_v19  ;;  %v2875_v40 = vld [vmem:[#allocation6_spill] sm:$0xff] }
 0x278   :  { %v975_v17 = vsel %vm974_vm14, %v970_v58, inf }
 0x279   :  { %976 = vmin.xlane.f32.xlu0 %v975_v17  ;;  %v980_v60 = vshll.u32 %v979_v41, 16 }
 0x27e   :  { %v1001_v49 = vpop.xlane.xlu1 %1000 }
 0x27f   :  { %vm1002_vm15 = vcmp.eq.f32.partialorder %v999_v12, %v1001_v49  ;;  %v1007_v4 = vcvt.f32.s32 %v1001_v49  ;;  %v2887_v12 = vld [vmem:[#allocation12_spill] sm:$0xff]  ;;  %v1727_v49 = vld [vmem:[%s2799_s0 + $0x8] sm:$0xff] }
 0x280   :  { %v1003_v25 = vsel %vm1002_vm15, %v998_v26, inf }
 0x281   :  { %1004 = vmin.xlane.f32.xlu1 %v1003_v25  ;;  %v1008_v55 = vshll.u32 %v1007_v4, 16 }
 0x2f9   :  { %v921_v61 = vpop.xlane.xlu0 %920 }
 0x2fa   :  { %v922_v1 = vcvt.f32.s32 %v921_v61 }
 0x2fc   :  { %v2641_v63 = vadd.s32 %v924_v21, %v922_v1 }
 0x2fe   :  { %v949_v2 = vpop.xlane.xlu1 %948  ;;  %vm1011_vm0 = vcmp.eq.s32.totalorder %v2518_v11, %v2641_v63  ;;  %vm1015_vm1 = vcmp.eq.s32.totalorder %v2532_v42, %v2641_v63  ;;  %vm1010_vm2 = vcmp.eq.s32.totalorder %v2515_v35, %v2641_v63  ;;  %vm1014_vm3 = vcmp.eq.s32.totalorder %v2529_v30, %v2641_v63 }
 0x2ff   :  { %v950_v15 = vcvt.f32.s32 %v949_v2  ;;  %1541 = vmatprep.mubr.msk.f32.mxu1 %vm1011_vm0, %v1731_v56  ;;  %1557 = vmatprep.mubr.msk.f32.mxu0 %vm1015_vm1, %v1731_v56  ;;  %vm1013_vm0 = vcmp.eq.s32.totalorder %v2526_v28, %v2641_v63  ;;  %vm1017_vm1 = vcmp.eq.s32.totalorder %v2541_v9, %v2641_v63 }
 0x300   :  { %1542 = vmatmul.mubr.msk.f32.vlgmr.msra.gmra.mrb[16].mxu1 %vm1010_vm2, %v1731_v56  ;;  %1558 = vmatmul.mubr.msk.f32.vlgmr.msra.gmra.mrb[16].mxu0 %vm1014_vm3, %v1731_v56  ;;  %vm1012_vm2 = vcmp.eq.s32.totalorder %v2523_v53, %v2641_v63  ;;  %vm1016_vm3 = vcmp.eq.s32.totalorder %v2538_v57, %v2641_v63 }
 0x301   :  { %v2655_v51 = vadd.s32 %v952_v0, %v950_v15  ;;  %1608 = vmatpush1.bf16.xpose.msra.mxu1 %v2867_v20  ;;  %1672 = vmatpush1.bf16.xpose.msra.mxu0 %v2868_v45  ;;  %v1728_v0 = vld [vmem:[%s2799_s0 + $0x10] sm:$0xff] }
 0x302   :  { %1610 = vmatprep.subr.bf16.mxu1 %v2869_v44  ;;  %1674 = vmatprep.subr.bf16.mxu0 %v2870_v32  ;;  %v1729_v32 = vld [vmem:[%s2799_s0 + $0x18] sm:$0xff] }
 0x303   :  { %vm1019_vm4 = vcmp.eq.s32.totalorder %v2518_v11, %v2655_v51  ;;  %vm1023_vm5 = vcmp.eq.s32.totalorder %v2532_v42, %v2655_v51  ;;  %vm1018_vm6 = vcmp.eq.s32.totalorder %v2515_v35, %v2655_v51  ;;  %vm1022_vm7 = vcmp.eq.s32.totalorder %v2529_v30, %v2655_v51 }
 0x304   :  { %1543 = vmatprep.mubr.msk.f32.mxu1 %vm1019_vm4, %v1731_v56  ;;  %1559 = vmatprep.mubr.msk.f32.mxu0 %vm1023_vm5, %v1731_v56  ;;  %vm1021_vm4 = vcmp.eq.s32.totalorder %v2526_v28, %v2655_v51  ;;  %vm1025_vm5 = vcmp.eq.s32.totalorder %v2541_v9, %v2655_v51 }
 0x305   :  { %1544 = vmatmul.mubr.msk.f32.gmra.mrb[18].mxu1 %vm1018_vm6, %v1731_v56  ;;  %1560 = vmatmul.mubr.msk.f32.gmra.mrb[18].mxu0 %vm1022_vm7, %v1731_v56  ;;  %vm1020_vm6 = vcmp.eq.s32.totalorder %v2523_v53, %v2655_v51  ;;  %vm1024_vm7 = vcmp.eq.s32.totalorder %v2538_v57, %v2655_v51 }
 0x306   :  { %v977_v59 = vpop.xlane.xlu0 %976 }
 0x307   :  { %v978_v14 = vcvt.f32.s32 %v977_v59 }
 0x309   :  { %v2673_v3 = vadd.s32 %v980_v60, %v978_v14  ;;  %1612 = vmatpush1.bf16.xpose.msra.mxu1 %v2871_v31  ;;  %1676 = vmatpush1.bf16.xpose.msra.mxu0 %v2872_v54  ;;  %v1732_v31 = vmov 0.0  }
 0x30a   :  { %1614 = vmatprep.subr.bf16.mxu1 %v2873_v48  ;;  %1678 = vmatprep.subr.bf16.mxu0 %v2874_v6  ;;  %18 = vst [vmem:[%s2801_s3] sm:$0x1] %v1732_v31 }
 0x30b   :  { %vm1027_vm8 = vcmp.eq.s32.totalorder %v2518_v11, %v2673_v3  ;;  %vm1031_vm9 = vcmp.eq.s32.totalorder %v2532_v42, %v2673_v3  ;;  %vm1026_vm10 = vcmp.eq.s32.totalorder %v2515_v35, %v2673_v3  ;;  %vm1030_vm11 = vcmp.eq.s32.totalorder %v2529_v30, %v2673_v3 }
 0x30c   :  { %1545 = vmatprep.mubr.msk.f32.mxu1 %vm1027_vm8, %v1731_v56  ;;  %1561 = vmatprep.mubr.msk.f32.mxu0 %vm1031_vm9, %v1731_v56  ;;  %vm1029_vm8 = vcmp.eq.s32.totalorder %v2526_v28, %v2673_v3  ;;  %vm1033_vm9 = vcmp.eq.s32.totalorder %v2541_v9, %v2673_v3 }
 0x30d   :  { %1546 = vmatmul.mubr.msk.f32.gmra.mrb[20].mxu1 %vm1026_vm10, %v1731_v56  ;;  %1562 = vmatmul.mubr.msk.f32.gmra.mrb[20].mxu0 %vm1030_vm11, %v1731_v56  ;;  %vm1028_vm10 = vcmp.eq.s32.totalorder %v2523_v53, %v2673_v3  ;;  %vm1032_vm11 = vcmp.eq.s32.totalorder %v2538_v57, %v2673_v3 }
 0x30e   :  { %v1005_v13 = vpop.xlane.xlu1 %1004 }
 0x30f   :  { %v1006_v16 = vcvt.f32.s32 %v1005_v13 }
 0x311   :  { %1616 = vmatpush1.bf16.xpose.msra.mxu1 %v2875_v40  ;;  %1680 = vmatpush1.bf16.xpose.msra.mxu0 %v2876_v39  ;;  %v1009_v52 = vadd.s32 %v1008_v55, %v1006_v16  ;;  %v1481_v40 = vld [vmem:[%s2801_s3] sm:$0x1] }
 0x312   :  { %1618 = vmatprep.subr.bf16.mxu1 %v2877_v8  ;;  %1682 = vmatprep.subr.bf16.mxu0 %v2878_v7 }
 0x313   :  { %vm1035_vm12 = vcmp.eq.s32.totalorder %v2518_v11, %v1009_v52  ;;  %vm1039_vm13 = vcmp.eq.s32.totalorder %v2532_v42, %v1009_v52  ;;  %vm1034_vm14 = vcmp.eq.s32.totalorder %v2515_v35, %v1009_v52  ;;  %vm1038_vm15 = vcmp.eq.s32.totalorder %v2529_v30, %v1009_v52  ;;  %v2879_v35 = vld [vmem:[#allocation8_spill] sm:$0xff]  ;;  %v2880_v11 = vld [vmem:[#allocation25_spill] sm:$0xff]  ;;  %v2882_v42 = vld [vmem:[#allocation26_spill] sm:$0xff] }
 0x314   :  { %1547 = vmatprep.mubr.msk.f32.mxu1 %vm1035_vm12, %v1731_v56  ;;  %1563 = vmatprep.mubr.msk.f32.mxu0 %vm1039_vm13, %v1731_v56  ;;  %v2881_v30 = vld [vmem:[#allocation9_spill] sm:$0xff]  ;;  %vm1037_vm12 = vcmp.eq.s32.totalorder %v2526_v28, %v1009_v52  ;;  %vm1041_vm13 = vcmp.eq.s32.totalorder %v2541_v9, %v1009_v52 }
 0x315   :  { %1548 = vmatmul.mubr.msk.f32.gmra.mrb[22].mxu1 %vm1034_vm14, %v1731_v56  ;;  %1564 = vmatmul.mubr.msk.f32.gmra.mrb[22].mxu0 %vm1038_vm15, %v1731_v56  ;;  %vm1036_vm14 = vcmp.eq.s32.totalorder %v2523_v53, %v1009_v52  ;;  %vm1040_vm15 = vcmp.eq.s32.totalorder %v2538_v57, %v1009_v52  ;;  %v1726_v53 = vld [vmem:[%s2799_s0] sm:$0xff] }
 0x316   :  { %1549 = vmatprep.mubr.msk.f32.mxu1 %vm1013_vm0, %v1731_v56  ;;  %1565 = vmatprep.mubr.msk.f32.mxu0 %vm1017_vm1, %v1731_v56 }
 0x319   :  { %1620 = vmatpush1.bf16.xpose.msra.mxu1 %v2879_v35  ;;  %1684 = vmatpush1.bf16.xpose.msra.mxu0 %v2880_v11 }
 0x31a   :  { %1622 = vmatprep.subr.bf16.mxu1 %v2881_v30  ;;  %1686 = vmatprep.subr.bf16.mxu0 %v2882_v42 }
 0x321   :  { %1624 = vmatpush1.bf16.xpose.msra.mxu1 %v2883_v43  ;;  %1688 = vmatpush1.bf16.xpose.msra.mxu0 %v2884_v18 }
 0x322   :  { %1626 = vmatprep.subr.bf16.mxu1 %v2885_v24  ;;  %1690 = vmatprep.subr.bf16.mxu0 %v2886_v47 }
 0x329   :  { %1628 = vmatpush1.bf16.xpose.msra.mxu1 %v2887_v12  ;;  %1692 = vmatpush1.bf16.xpose.msra.mxu0 %v2888_v22 }
 0x32a   :  { %1630 = vmatprep.subr.bf16.mxu1 %v2889_v27  ;;  %1694 = vmatprep.subr.bf16.mxu0 %v2890_v33 }
 0x331   :  { %1632 = vmatpush1.bf16.xpose.msra.mxu1 %v2891_v5  ;;  %1696 = vmatpush1.bf16.xpose.msra.mxu0 %v2892_v29 }
 0x332   :  { %1634 = vmatprep.subr.bf16.mxu1 %v2893_v62  ;;  %1698 = vmatprep.subr.bf16.mxu0 %v2352_v50 }
 0x339   :  { %1636 = vmatpush1.bf16.xpose.msra.mxu1 %v2894_v37  ;;  %1700 = vmatpush1.bf16.xpose.msra.mxu0 %v2355_v46 }
 0x340   :  { %1550 = vmatmul.mubr.msk.f32.vlgmr.msra.gmra.mrb[16].mxu1 %vm1012_vm2, %v1731_v56  ;;  %1566 = vmatmul.mubr.msk.f32.vlgmr.msra.gmra.mrb[16].mxu0 %vm1016_vm3, %v1731_v56 }
 0x341   :  { %1551 = vmatprep.mubr.msk.f32.mxu1 %vm1021_vm4, %v1731_v56  ;;  %1567 = vmatprep.mubr.msk.f32.mxu0 %vm1025_vm5, %v1731_v56 }
 0x344   :  { %1552 = vmatmul.mubr.msk.f32.gmra.mrb[18].mxu1 %vm1020_vm6, %v1731_v56  ;;  %1568 = vmatmul.mubr.msk.f32.gmra.mrb[18].mxu0 %vm1024_vm7, %v1731_v56 }
 0x345   :  { %1553 = vmatprep.mubr.msk.f32.mxu1 %vm1029_vm8, %v1731_v56  ;;  %1569 = vmatprep.mubr.msk.f32.mxu0 %vm1033_vm9, %v1731_v56 }
 0x348   :  { %1554 = vmatmul.mubr.msk.f32.gmra.mrb[20].mxu1 %vm1028_vm10, %v1731_v56  ;;  %1570 = vmatmul.mubr.msk.f32.gmra.mrb[20].mxu0 %vm1032_vm11, %v1731_v56 }
 0x349   :  { %1555 = vmatprep.mubr.msk.f32.mxu1 %vm1037_vm12, %v1731_v56  ;;  %1571 = vmatprep.mubr.msk.f32.mxu0 %vm1041_vm13, %v1731_v56 }
 0x34c   :  { %1556 = vmatmul.mubr.msk.f32.gmra.mrb[22].mxu1 %vm1036_vm14, %v1731_v56  ;;  %1572 = vmatmul.mubr.msk.f32.gmra.mrb[22].mxu0 %vm1040_vm15, %v1731_v56 }
 0x413   :  { %v1257_v46 = vpop.f32.mrb[16].mxu1  ;;  %v1427_v50 = vpop.f32.mrb[16].mxu0 }
 0x414   :  { %v1701_v36 = vadd.f32 %v1427_v50, %v1257_v46  ;;  %v1259_v23 = vpop.f32.mrb[17].mxu1  ;;  %v1429_v19 = vpop.f32.mrb[17].mxu0 }
 0x416   :  { %1446 = vst [vmem:[%s2800_s2] sm:$0xff] %v1701_v36  ;;  %v1473_v57 = vsub.f32 %v1701_v36, %v1726_v53 }
 0x417   :  { %v1262_v28 = vpop.f32.mrb[18].mxu1  ;;  %v1432_v9 = vpop.f32.mrb[18].mxu0 }
 0x418   :  { %v1702_v58 = vadd.f32 %v1432_v9, %v1262_v28  ;;  %v1264_v17 = vpop.f32.mrb[19].mxu1  ;;  %v1434_v10 = vpop.f32.mrb[19].mxu0  ;;  %v1482_v61 = vmul.f32 %v1473_v57, %v1473_v57 }
 0x41a   :  { %1447 = vst [vmem:[%s2800_s2 + $0x8] sm:$0xff] %v1702_v58  ;;  %v1474_v26 = vsub.f32 %v1702_v58, %v1727_v49 }
 0x41b   :  { %v1267_v25 = vpop.f32.mrb[20].mxu1  ;;  %v1437_v34 = vpop.f32.mrb[20].mxu0 }
 0x41c   :  { %v1483_v21 = vmul.f32 %v1474_v26, %v1474_v26  ;;  %v1703_v1 = vadd.f32 %v1437_v34, %v1267_v25  ;;  %v1269_v38 = vpop.f32.mrb[21].mxu1  ;;  %v1439_v63 = vpop.f32.mrb[21].mxu0 }
 0x41e   :  { %v1486_v2 = vadd.f32 %v1483_v21, %v1482_v61  ;;  %1448 = vst [vmem:[%s2800_s2 + $0x10] sm:$0xff] %v1703_v1  ;;  %v1475_v15 = vsub.f32 %v1703_v1, %v1728_v0 }
 0x41f   :  { %v1272_v56 = vpop.f32.mrb[22].mxu1  ;;  %v1442_v51 = vpop.f32.mrb[22].mxu0 }
 0x420   :  { %v1484_v20 = vmul.f32 %v1475_v15, %v1475_v15  ;;  %v1704_v45 = vadd.f32 %v1442_v51, %v1272_v56  ;;  %v1274_v41 = vpop.f32.mrb[23].mxu1  ;;  %v1444_v44 = vpop.f32.mrb[23].mxu0 }
 0x422   :  { %1449 = vst [vmem:[%s2800_s2 + $0x18] sm:$0xff] %v1704_v45  ;;  %v1476_v59 = vsub.f32 %v1704_v45, %v1729_v32  ;;  %v1487_v60 = vadd.f32 %v1486_v2, %v1484_v20 }
 0x424   :  { %v1485_v14 = vmul.f32 %v1476_v59, %v1476_v59 }
 0x426   :  { %v1488_v3 = vadd.f32 %v1487_v60, %v1485_v14 }
 0x428   :  { %1489 = vadd.xlane.f32.xlu0 %v1488_v3 }
 0x4b5   :  { %v1490_v54 = vpop.xlane.xlu0 %1489 }
 0x4b6   :  { %v1491_v48 = vrot.slane %v1490_v54, 4 }
 0x4b8   :  { %v1492_v6 = vadd.f32 %v1491_v48, %v1490_v54 }
 0x4ba   :  { %v1493_v4 = vrot.slane %v1492_v6, 2 }
 0x4bc   :  { %v1494_v13 = vadd.f32 %v1493_v4, %v1492_v6 }
 0x4be   :  { %v1495_v55 = vrot.slane %v1494_v13, 1 }
 0x4c0   :  { %v1496_v16 = vadd.f32 %v1495_v55, %v1494_v13 }
 0x4c2   :  { %1721 = vpush %v1496_v16 }
 0x4f3   :  { %s1722_s23 = spop %1721 }
 0x4f4   :  { %v1498_v39 = vstv %s1722_s23 }
 0x4f5   :  { %v1499_v52 = vadd.f32 %v1498_v39, %v1481_v40 }
 0x4f7   :  { %1500 = vst [vmem:[%s2801_s3] sm:$0x1] %v1499_v52 }

// kernel: _lambda_.24
= control target key start
LH: loop header
LB: loop body
LE: loop exit
PB: predicated region body
PF: predicated region fallthrough
CT: control target
= control target key end

     0   :  { %s939_s1 = inlined_call_operand.vmem [shape: bf16[256,128], index: 1, kind: input, shape index: {}]   ;;  %s940_s0 = inlined_call_operand.vmem [shape: bf16[128,256], index: 0, kind: input, shape index: {}]   ;;  %s941_s2 = inlined_call_operand.vmem [shape: f32[1,128], index: 2, kind: input, shape index: {}]   ;;  %s942_s3 = inlined_call_operand.vmem [shape: bf16[128,128], index: 3, kind: output, shape index: {}]  }
   0x1   :  { %v738_v0 = vld [vmem:[%s939_s1 + $0x40] sm:$0xff]   ;;  %v740_v2 = vld [vmem:[%s939_s1 + $0x48] sm:$0xff]   ;;  %v742_v4 = vld [vmem:[%s939_s1 + $0x50] sm:$0xff]  }
   0x2   :  { %v739_v1 = vld [vmem:[%s939_s1] sm:$0xff]   ;;  %658 = vmatprep.subr.bf16.mxu0 %v738_v0  ;;  %722 = vmatprep.subr.bf16.mxu1 %v738_v0  ;;  %v741_v3 = vld [vmem:[%s939_s1 + $0x8] sm:$0xff]   ;;  %v743_v5 = vld [vmem:[%s939_s1 + $0x10] sm:$0xff]  }
   0x3   :  { %659 = vmatpush3.bf16.msra.mxu0 %v739_v1  ;;  %730 = vmatpush3.bf16.msra.mxu1 %v739_v1  ;;  %v744_v6 = vld [vmem:[%s939_s1 + $0x58] sm:$0xff]   ;;  %v746_v8 = vld [vmem:[%s939_s1 + $0x60] sm:$0xff]   ;;  %v748_v10 = vld [vmem:[%s939_s1 + $0x68] sm:$0xff]  }
   0x4   :  { %660 = vmatprep.subr.bf16.mxu0 %v740_v2  ;;  %723 = vmatprep.subr.bf16.mxu1 %v740_v2  ;;  %v745_v7 = vld [vmem:[%s939_s1 + $0x18] sm:$0xff]   ;;  %v747_v9 = vld [vmem:[%s939_s1 + $0x20] sm:$0xff]   ;;  %v749_v13 = vld [vmem:[%s939_s1 + $0x28] sm:$0xff]  }
   0x5   :  { %v756_v11 = vld [vmem:[%s940_s0 + $0x4] ss:$8 sps:$4 sm:$0xff]   ;;  %v750_v14 = vld [vmem:[%s939_s1 + $0x70] sm:$0xff]   ;;  %v752_v16 = vld [vmem:[%s939_s1 + $0x78] sm:$0xff]  }
   0x6   :  { %v759_v12 = vld [vmem:[%s940_s0 + $0x44] ss:$8 sps:$4 sm:$0xff]   ;;  %307 = vmatprep.mubr.bf16.mxu0 %v756_v11  ;;  %v751_v15 = vld [vmem:[%s939_s1 + $0x30] sm:$0xff]   ;;  %v753_v17 = vld [vmem:[%s939_s1 + $0x38] sm:$0xff]  }
   0x7   :  { %661 = vmatpush3.bf16.msra.mxu0 %v741_v3  ;;  %731 = vmatpush3.bf16.msra.mxu1 %v741_v3  ;;  %v754_v18 = vld [vmem:[%s940_s0] ss:$8 sps:$4 sm:$0xff]   ;;  %v760_v20 = vld [vmem:[%s940_s0 + $0x14] ss:$8 sps:$4 sm:$0xff]   ;;  %v764_v22 = vld [vmem:[%s940_s0 + $0x10] ss:$8 sps:$4 sm:$0xff]  }
   0x8   :  { %662 = vmatprep.subr.bf16.mxu0 %v742_v4  ;;  %724 = vmatprep.subr.bf16.mxu1 %v742_v4  ;;  %v757_v19 = vld [vmem:[%s940_s0 + $0x40] ss:$8 sps:$4 sm:$0xff]   ;;  %v762_v21 = vld [vmem:[%s940_s0 + $0x54] ss:$8 sps:$4 sm:$0xff]   ;;  %v765_v23 = vld [vmem:[%s940_s0 + $0x50] ss:$8 sps:$4 sm:$0xff]  }
   0x9   :  { %339 = vmatprep.mubr.bf16.mxu1 %v759_v12  ;;  %v766_v24 = vld [vmem:[%s940_s0 + $0x24] ss:$8 sps:$4 sm:$0xff]   ;;  %v770_v26 = vld [vmem:[%s940_s0 + $0x20] ss:$8 sps:$4 sm:$0xff]   ;;  %v772_v28 = vld [vmem:[%s940_s0 + $0x34] ss:$8 sps:$4 sm:$0xff]  }
   0xa   :  { %v768_v25 = vld [vmem:[%s940_s0 + $0x64] ss:$8 sps:$4 sm:$0xff]   ;;  %v771_v27 = vld [vmem:[%s940_s0 + $0x60] ss:$8 sps:$4 sm:$0xff]   ;;  %v774_v29 = vld [vmem:[%s940_s0 + $0x74] ss:$8 sps:$4 sm:$0xff]  }
   0xb   :  { %663 = vmatpush3.bf16.msra.mxu0 %v743_v5  ;;  %732 = vmatpush3.bf16.msra.mxu1 %v743_v5  ;;  %v776_v30 = vld [vmem:[%s940_s0 + $0x30] ss:$8 sps:$4 sm:$0xff]   ;;  %v897_v35 = vld [vmem:[%s941_s2] ss:$0 sm:$0xff] }
   0xc   :  { %664 = vmatprep.subr.bf16.mxu0 %v744_v6  ;;  %725 = vmatprep.subr.bf16.mxu1 %v744_v6  ;;  %v777_v31 = vld [vmem:[%s940_s0 + $0x70] ss:$8 sps:$4 sm:$0xff]  }
   0xf   :  { %665 = vmatpush3.bf16.msra.mxu0 %v745_v7  ;;  %733 = vmatpush3.bf16.msra.mxu1 %v745_v7 }
  0x10   :  { %666 = vmatprep.subr.bf16.mxu0 %v746_v8  ;;  %726 = vmatprep.subr.bf16.mxu1 %v746_v8 }
  0x13   :  { %667 = vmatpush3.bf16.msra.mxu0 %v747_v9  ;;  %734 = vmatpush3.bf16.msra.mxu1 %v747_v9 }
  0x14   :  { %668 = vmatprep.subr.bf16.mxu0 %v748_v10  ;;  %727 = vmatprep.subr.bf16.mxu1 %v748_v10 }
  0x17   :  { %669 = vmatpush3.bf16.msra.mxu0 %v749_v13  ;;  %735 = vmatpush3.bf16.msra.mxu1 %v749_v13 }
  0x18   :  { %670 = vmatprep.subr.bf16.mxu0 %v750_v14  ;;  %728 = vmatprep.subr.bf16.mxu1 %v750_v14 }
  0x1b   :  { %671 = vmatpush3.bf16.msra.mxu0 %v751_v15  ;;  %736 = vmatpush3.bf16.msra.mxu1 %v751_v15 }
  0x1c   :  { %672 = vmatprep.subr.bf16.mxu0 %v752_v16  ;;  %729 = vmatprep.subr.bf16.mxu1 %v752_v16 }
  0x1f   :  { %673 = vmatpush3.bf16.msra.mxu0 %v753_v17  ;;  %737 = vmatpush3.bf16.msra.mxu1 %v753_v17 }
  0x22   :  { %308 = vmatmul.mubr.bf16.vlgmr.msra.gmra.mrb[0].mxu0 %v754_v18  ;;  %340 = vmatmul.mubr.bf16.vlgmr.msra.gmra.mrb[0].mxu1 %v757_v19 }
  0x23   :  { %315 = vmatprep.mubr.bf16.mxu0 %v760_v20  ;;  %347 = vmatprep.mubr.bf16.mxu1 %v762_v21 }
  0x2a   :  { %316 = vmatmul.mubr.bf16.gmra.mrb[4].mxu0 %v764_v22  ;;  %348 = vmatmul.mubr.bf16.gmra.mrb[4].mxu1 %v765_v23 }
  0x2b   :  { %323 = vmatprep.mubr.bf16.mxu0 %v766_v24  ;;  %355 = vmatprep.mubr.bf16.mxu1 %v768_v25 }
  0x32   :  { %324 = vmatmul.mubr.bf16.gmra.mrb[8].mxu0 %v770_v26  ;;  %356 = vmatmul.mubr.bf16.gmra.mrb[8].mxu1 %v771_v27 }
  0x33   :  { %331 = vmatprep.mubr.bf16.mxu0 %v772_v28  ;;  %363 = vmatprep.mubr.bf16.mxu1 %v774_v29 }
  0x3a   :  { %332 = vmatmul.mubr.bf16.gmra.mrb[12].mxu0 %v776_v30  ;;  %364 = vmatmul.mubr.bf16.gmra.mrb[12].mxu1 %v777_v31 }
  0xf5   :  { %v674_v32 = vpop.f32.mrb[0].mxu0  ;;  %v698_v33 = vpop.f32.mrb[0].mxu1 }
  0xf6   :  { %v675_v34 = vpop.f32.mrb[1].mxu0  ;;  %v699_v36 = vpop.f32.mrb[1].mxu1 }
  0xf7   :  { %v676_v37 = vadd.f32 %v675_v34, %v674_v32  ;;  %v700_v38 = vadd.f32 %v699_v36, %v698_v33  ;;  %v677_v39 = vpop.f32.mrb[2].mxu0  ;;  %v701_v40 = vpop.f32.mrb[2].mxu1 }
  0xf8   :  { %v678_v41 = vpop.f32.mrb[3].mxu0  ;;  %v702_v42 = vpop.f32.mrb[3].mxu1 }
  0xf9   :  { %v430_v43 = vadd.f32 %v676_v37, %v897_v35  ;;  %v438_v44 = vadd.f32 %v700_v38, %v897_v35  ;;  %v679_v45 = vadd.f32 %v678_v41, %v677_v39  ;;  %v703_v46 = vadd.f32 %v702_v42, %v701_v40 }
  0xfb   :  { %v431_v47 = vadd.f32 %v679_v45, %v897_v35  ;;  %v439_v48 = vadd.f32 %v703_v46, %v897_v35  ;;  %v446_v49 = vmax.f32 %v430_v43, 0.0  ;;  %v454_v50 = vmax.f32 %v438_v44, 0.0 }
  0xfd   :  { %v447_v51 = vmax.f32 %v431_v47, 0.0  ;;  %v455_v52 = vmax.f32 %v439_v48, 0.0  ;;  %v680_v53 = vpop.f32.mrb[4].mxu0  ;;  %v704_v54 = vpop.f32.mrb[4].mxu1 }
  0xfe   :  { %v681_v55 = vpop.f32.mrb[5].mxu0  ;;  %v705_v56 = vpop.f32.mrb[5].mxu1 }
  0xff   :  { %v614_v57 = vpack.c.bf16 %v447_v51, %v446_v49  ;;  %v634_v58 = vpack.c.bf16 %v455_v52, %v454_v50  ;;  %v682_v59 = vadd.f32 %v681_v55, %v680_v53  ;;  %v706_v60 = vadd.f32 %v705_v56, %v704_v54  ;;  %v683_v61 = vpop.f32.mrb[6].mxu0  ;;  %v707_v62 = vpop.f32.mrb[6].mxu1 }
 0x100   :  { %v684_v63 = vpop.f32.mrb[7].mxu0  ;;  %v708_v0 = vpop.f32.mrb[7].mxu1 }
 0x101   :  { %615 = vst [vmem:[%s942_s3] sm:$0xff] %v614_v57   ;;  %654 = vst [vmem:[%s942_s3 + $0x20] sm:$0xff] %v634_v58   ;;  %v432_v1 = vadd.f32 %v682_v59, %v897_v35  ;;  %v440_v2 = vadd.f32 %v706_v60, %v897_v35  ;;  %v685_v3 = vadd.f32 %v684_v63, %v683_v61 }
 0x102   :  { %v709_v4 = vadd.f32 %v708_v0, %v707_v62 }
 0x103   :  { %v433_v5 = vadd.f32 %v685_v3, %v897_v35  ;;  %v448_v7 = vmax.f32 %v432_v1, 0.0  ;;  %v456_v8 = vmax.f32 %v440_v2, 0.0 }
 0x104   :  { %v441_v6 = vadd.f32 %v709_v4, %v897_v35 }
 0x105   :  { %v449_v9 = vmax.f32 %v433_v5, 0.0  ;;  %v686_v11 = vpop.f32.mrb[8].mxu0  ;;  %v710_v12 = vpop.f32.mrb[8].mxu1 }
 0x106   :  { %v457_v10 = vmax.f32 %v441_v6, 0.0  ;;  %v687_v13 = vpop.f32.mrb[9].mxu0  ;;  %v711_v14 = vpop.f32.mrb[9].mxu1 }
 0x107   :  { %v619_v15 = vpack.c.bf16 %v449_v9, %v448_v7  ;;  %v688_v17 = vadd.f32 %v687_v13, %v686_v11  ;;  %v712_v18 = vadd.f32 %v711_v14, %v710_v12  ;;  %v689_v19 = vpop.f32.mrb[10].mxu0  ;;  %v713_v20 = vpop.f32.mrb[10].mxu1 }
 0x108   :  { %v639_v16 = vpack.c.bf16 %v457_v10, %v456_v8  ;;  %v690_v21 = vpop.f32.mrb[11].mxu0  ;;  %v714_v22 = vpop.f32.mrb[11].mxu1 }
 0x109   :  { %651 = vst [vmem:[%s942_s3 + $0x8] sm:$0xff] %v619_v15   ;;  %v434_v23 = vadd.f32 %v688_v17, %v897_v35  ;;  %v442_v24 = vadd.f32 %v712_v18, %v897_v35  ;;  %v691_v25 = vadd.f32 %v690_v21, %v689_v19  ;;  %v715_v26 = vadd.f32 %v714_v22, %v713_v20 }
 0x10a   :  { %655 = vst [vmem:[%s942_s3 + $0x28] sm:$0xff] %v639_v16  }
 0x10b   :  { %v435_v27 = vadd.f32 %v691_v25, %v897_v35  ;;  %v443_v28 = vadd.f32 %v715_v26, %v897_v35  ;;  %v450_v29 = vmax.f32 %v434_v23, 0.0  ;;  %v458_v30 = vmax.f32 %v442_v24, 0.0 }
 0x10d   :  { %v451_v31 = vmax.f32 %v435_v27, 0.0  ;;  %v459_v32 = vmax.f32 %v443_v28, 0.0  ;;  %v692_v33 = vpop.f32.mrb[12].mxu0  ;;  %v716_v34 = vpop.f32.mrb[12].mxu1 }
 0x10e   :  { %v693_v36 = vpop.f32.mrb[13].mxu0  ;;  %v717_v37 = vpop.f32.mrb[13].mxu1 }
 0x10f   :  { %v624_v38 = vpack.c.bf16 %v451_v31, %v450_v29  ;;  %v644_v39 = vpack.c.bf16 %v459_v32, %v458_v30  ;;  %v694_v40 = vadd.f32 %v693_v36, %v692_v33  ;;  %v718_v41 = vadd.f32 %v717_v37, %v716_v34  ;;  %v695_v42 = vpop.f32.mrb[14].mxu0  ;;  %v719_v43 = vpop.f32.mrb[14].mxu1 }
 0x110   :  { %v696_v44 = vpop.f32.mrb[15].mxu0  ;;  %v720_v45 = vpop.f32.mrb[15].mxu1 }
 0x111   :  { %652 = vst [vmem:[%s942_s3 + $0x10] sm:$0xff] %v624_v38   ;;  %656 = vst [vmem:[%s942_s3 + $0x30] sm:$0xff] %v644_v39   ;;  %v436_v46 = vadd.f32 %v694_v40, %v897_v35  ;;  %v444_v47 = vadd.f32 %v718_v41, %v897_v35  ;;  %v697_v48 = vadd.f32 %v696_v44, %v695_v42 }
 0x112   :  { %v721_v49 = vadd.f32 %v720_v45, %v719_v43 }
 0x113   :  { %v437_v50 = vadd.f32 %v697_v48, %v897_v35  ;;  %v452_v52 = vmax.f32 %v436_v46, 0.0  ;;  %v460_v53 = vmax.f32 %v444_v47, 0.0 }
 0x114   :  { %v445_v51 = vadd.f32 %v721_v49, %v897_v35 }
 0x115   :  { %v453_v54 = vmax.f32 %v437_v50, 0.0 }
 0x116   :  { %v461_v55 = vmax.f32 %v445_v51, 0.0 }
 0x117   :  { %v629_v56 = vpack.c.bf16 %v453_v54, %v452_v52 }
 0x118   :  { %v649_v57 = vpack.c.bf16 %v461_v55, %v460_v53 }
 0x119   :  { %653 = vst [vmem:[%s942_s3 + $0x18] sm:$0xff] %v629_v56  }
 0x11a   :  { %657 = vst [vmem:[%s942_s3 + $0x38] sm:$0xff] %v649_v57  }

// kernel: _lambda_.25
= control target key start
LH: loop header
LB: loop body
LE: loop exit
PB: predicated region body
PF: predicated region fallthrough
CT: control target
= control target key end

     0   :  { %v2317_v0 = vmov 0   ;;  %s3111_s1 = inlined_call_operand.vmem [shape: bf16[384,128], index: 1, kind: input, shape index: {}]   ;;  %s3112_s0 = inlined_call_operand.vmem [shape: bf16[512,384], index: 0, kind: input, shape index: {}]   ;;  %s3113_s2 = inlined_call_operand.vmem [shape: f32[1,128], index: 2, kind: input, shape index: {}]   ;;  %s3114_s3 = inlined_call_operand.vmem [shape: f32[512,128], index: 3, kind: output, shape index: {}]  }
   0x1   :  { %979 = vmatprep.subr.bf16.mxu0 %v2317_v0  ;;  %2132 = vmatprep.subr.bf16.mxu1 %v2317_v0  ;;  %v2165_v1 = vld [vmem:[%s3111_s1] sm:$0xff]   ;;  %v2166_v2 = vld [vmem:[%s3111_s1 + $0x8] sm:$0xff]   ;;  %v2167_v3 = vld [vmem:[%s3111_s1 + $0x10] sm:$0xff]  }
   0x2   :  { %980 = vmatpush1.bf16.msra.mxu0 %v2165_v1  ;;  %2148 = vmatpush1.bf16.msra.mxu1 %v2165_v1  ;;  %v2168_v4 = vld [vmem:[%s3111_s1 + $0x18] sm:$0xff]   ;;  %v2169_v5 = vld [vmem:[%s3111_s1 + $0x20] sm:$0xff]   ;;  %v2170_v7 = vld [vmem:[%s3111_s1 + $0x28] sm:$0xff]  }
   0x3   :  { %981 = vmatprep.subr.bf16.mxu0 %v2317_v0  ;;  %2133 = vmatprep.subr.bf16.mxu1 %v2317_v0  ;;  %v2183_v6 = vld [vmem:[%s3112_s0 + $0x4] ss:$12 sps:$4 sm:$0xff]   ;;  %v2172_v10 = vld [vmem:[%s3111_s1 + $0x38] sm:$0xff]   ;;  %v2174_v12 = vld [vmem:[%s3111_s1 + $0x48] sm:$0xff]  }
   0x4   :  { %v2186_v8 = vld [vmem:[%s3112_s0 + $0x244] ss:$12 sps:$4 sm:$0xff]   ;;  %1011 = vmatprep.mubr.bf16.mxu0 %v2183_v6  ;;  %v2176_v14 = vld [vmem:[%s3111_s1 + $0x58] sm:$0xff]   ;;  %v2178_v16 = vld [vmem:[%s3111_s1 + $0x68] sm:$0xff]  }
   0x5   :  { %1203 = vmatprep.mubr.bf16.mxu1 %v2186_v8  ;;  %v2171_v9 = vld [vmem:[%s3111_s1 + $0x30] sm:$0xff]   ;;  %v2173_v11 = vld [vmem:[%s3111_s1 + $0x40] sm:$0xff]   ;;  %v2180_v18 = vld [vmem:[%s3111_s1 + $0x78] sm:$0xff]  }
   0x6   :  { %982 = vmatpush1.bf16.msra.mxu0 %v2166_v2  ;;  %2149 = vmatpush1.bf16.msra.mxu1 %v2166_v2  ;;  %v2175_v13 = vld [vmem:[%s3111_s1 + $0x50] sm:$0xff]   ;;  %v2177_v15 = vld [vmem:[%s3111_s1 + $0x60] sm:$0xff]   ;;  %v2188_v22 = vld [vmem:[%s3112_s0 + $0x1c] ss:$12 sps:$4 sm:$0xff]  }
   0x7   :  { %983 = vmatprep.subr.bf16.mxu0 %v2317_v0  ;;  %2134 = vmatprep.subr.bf16.mxu1 %v2317_v0  ;;  %v2179_v17 = vld [vmem:[%s3111_s1 + $0x70] sm:$0xff]   ;;  %v2187_v19 = vld [vmem:[%s3111_s1 + $0x80] sm:$0xff]   ;;  %v2190_v23 = vld [vmem:[%s3112_s0 + $0x25c] ss:$12 sps:$4 sm:$0xff]  }
   0x8   :  { %v2181_v20 = vld [vmem:[%s3112_s0] ss:$12 sps:$4 sm:$0xff]   ;;  %v2201_v25 = vld [vmem:[%s3111_s1 + $0x90] sm:$0xff]   ;;  %v2192_v26 = vld [vmem:[%s3112_s0 + $0x18] ss:$12 sps:$4 sm:$0xff]  }
   0x9   :  { %v2184_v21 = vld [vmem:[%s3112_s0 + $0x240] ss:$12 sps:$4 sm:$0xff]   ;;  %v2193_v27 = vld [vmem:[%s3112_s0 + $0x258] ss:$12 sps:$4 sm:$0xff]   ;;  %v2199_v31 = vld [vmem:[%s3112_s0 + $0x30] ss:$12 sps:$4 sm:$0xff]  }
   0xa   :  { %984 = vmatpush1.bf16.msra.mxu0 %v2167_v3  ;;  %2150 = vmatpush1.bf16.msra.mxu1 %v2167_v3  ;;  %v2194_v24 = vld [vmem:[%s3111_s1 + $0x88] sm:$0xff]   ;;  %v2195_v28 = vld [vmem:[%s3112_s0 + $0x34] ss:$12 sps:$4 sm:$0xff]   ;;  %v2208_v30 = vld [vmem:[%s3111_s1 + $0x98] sm:$0xff]  }
   0xb   :  { %985 = vmatprep.subr.bf16.mxu0 %v2317_v0  ;;  %2135 = vmatprep.subr.bf16.mxu1 %v2317_v0  ;;  %v2197_v29 = vld [vmem:[%s3112_s0 + $0x274] ss:$12 sps:$4 sm:$0xff]   ;;  %v2200_v33 = vld [vmem:[%s3112_s0 + $0x270] ss:$12 sps:$4 sm:$0xff]   ;;  %v2202_v34 = vld [vmem:[%s3112_s0 + $0x4c] ss:$12 sps:$4 sm:$0xff]  }
   0xc   :  { %v2215_v32 = vld [vmem:[%s3111_s1 + $0xa0] sm:$0xff]   ;;  %v2204_v35 = vld [vmem:[%s3112_s0 + $0x28c] ss:$12 sps:$4 sm:$0xff]   ;;  %v2206_v37 = vld [vmem:[%s3112_s0 + $0x48] ss:$12 sps:$4 sm:$0xff]  }
   0xd   :  { %v2222_v36 = vld [vmem:[%s3111_s1 + $0xa8] sm:$0xff]   ;;  %v2209_v39 = vld [vmem:[%s3112_s0 + $0x64] ss:$12 sps:$4 sm:$0xff]   ;;  %v2236_v42 = vld [vmem:[%s3111_s1 + $0xb8] sm:$0xff]  }
   0xe   :  { %986 = vmatpush1.bf16.msra.mxu0 %v2168_v4  ;;  %2151 = vmatpush1.bf16.msra.mxu1 %v2168_v4  ;;  %v2207_v38 = vld [vmem:[%s3112_s0 + $0x288] ss:$12 sps:$4 sm:$0xff]   ;;  %v2211_v40 = vld [vmem:[%s3112_s0 + $0x2a4] ss:$12 sps:$4 sm:$0xff]   ;;  %v2213_v43 = vld [vmem:[%s3112_s0 + $0x60] ss:$12 sps:$4 sm:$0xff]  }
   0xf   :  { %987 = vmatprep.subr.bf16.mxu0 %v2317_v0  ;;  %2136 = vmatprep.subr.bf16.mxu1 %v2317_v0  ;;  %v2229_v41 = vld [vmem:[%s3111_s1 + $0xb0] sm:$0xff]   ;;  %v2214_v44 = vld [vmem:[%s3112_s0 + $0x2a0] ss:$12 sps:$4 sm:$0xff]   ;;  %v2216_v45 = vld [vmem:[%s3112_s0 + $0x7c] ss:$12 sps:$4 sm:$0xff]  }
  0x10   :  { %v2218_v46 = vld [vmem:[%s3112_s0 + $0x2bc] ss:$12 sps:$4 sm:$0xff]   ;;  %v2220_v47 = vld [vmem:[%s3112_s0 + $0x78] ss:$12 sps:$4 sm:$0xff]   ;;  %v2223_v49 = vld [vmem:[%s3112_s0 + $0x94] ss:$12 sps:$4 sm:$0xff]  }
  0x11   :  { %v2221_v48 = vld [vmem:[%s3112_s0 + $0x2b8] ss:$12 sps:$4 sm:$0xff]   ;;  %v2225_v50 = vld [vmem:[%s3112_s0 + $0x2d4] ss:$12 sps:$4 sm:$0xff]   ;;  %v2227_v51 = vld [vmem:[%s3112_s0 + $0x90] ss:$12 sps:$4 sm:$0xff]  }
  0x12   :  { %988 = vmatpush1.bf16.msra.mxu0 %v2169_v5  ;;  %2152 = vmatpush1.bf16.msra.mxu1 %v2169_v5  ;;  %v2228_v52 = vld [vmem:[%s3112_s0 + $0x2d0] ss:$12 sps:$4 sm:$0xff]   ;;  %v2230_v53 = vld [vmem:[%s3112_s0 + $0xac] ss:$12 sps:$4 sm:$0xff]   ;;  %v2234_v55 = vld [vmem:[%s3112_s0 + $0xa8] ss:$12 sps:$4 sm:$0xff]  }
  0x13   :  { %989 = vmatprep.subr.bf16.mxu0 %v2317_v0  ;;  %2137 = vmatprep.subr.bf16.mxu1 %v2317_v0  ;;  %v2232_v54 = vld [vmem:[%s3112_s0 + $0x2ec] ss:$12 sps:$4 sm:$0xff]   ;;  %v2235_v56 = vld [vmem:[%s3112_s0 + $0x2e8] ss:$12 sps:$4 sm:$0xff]   ;;  %v2237_v57 = vld [vmem:[%s3112_s0 + $0xc4] ss:$12 sps:$4 sm:$0xff]  }
  0x14   :  { %v2239_v58 = vld [vmem:[%s3112_s0 + $0x8] ss:$12 sps:$4 sm:$0xff]   ;;  %v2240_v59 = vld [vmem:[%s3112_s0 + $0xc0] ss:$12 sps:$4 sm:$0xff]   ;;  %v2244_v62 = vld [vmem:[%s3112_s0 + $0x38] ss:$12 sps:$4 sm:$0xff]  }
  0x15   :  { %v2241_v60 = vld [vmem:[%s3112_s0 + $0x20] ss:$12 sps:$4 sm:$0xff]   ;;  %v2242_v61 = vld [vmem:[%s3112_s0 + $0xdc] ss:$12 sps:$4 sm:$0xff]   ;;  %v2245_v63 = vld [vmem:[%s3112_s0 + $0xd8] ss:$12 sps:$4 sm:$0xff]  }
  0x16   :  { %990 = vmatpush1.bf16.msra.mxu0 %v2170_v7  ;;  %2153 = vmatpush1.bf16.msra.mxu1 %v2170_v7  ;;  %v2247_v1 = vld [vmem:[%s3112_s0 + $0xf4] ss:$12 sps:$4 sm:$0xff]   ;;  %v2250_v3 = vld [vmem:[%s3112_s0 + $0xf0] ss:$12 sps:$4 sm:$0xff]   ;;  %v2252_v5 = vld [vmem:[%s3112_s0 + $0x10c] ss:$12 sps:$4 sm:$0xff]  }
  0x17   :  { %991 = vmatprep.subr.bf16.mxu0 %v2317_v0  ;;  %2138 = vmatprep.subr.bf16.mxu1 %v2317_v0  ;;  %v2249_v2 = vld [vmem:[%s3112_s0 + $0x68] ss:$12 sps:$4 sm:$0xff]   ;;  %v2251_v4 = vld [vmem:[%s3112_s0 + $0x80] ss:$12 sps:$4 sm:$0xff]   ;;  %v2254_v6 = vld [vmem:[%s3112_s0 + $0x98] ss:$12 sps:$4 sm:$0xff]  }
  0x18   :  { %v2255_v7 = vld [vmem:[%s3112_s0 + $0x108] ss:$12 sps:$4 sm:$0xff]   ;;  %v2256_v8 = vld [vmem:[%s3112_s0 + $0xb0] ss:$12 sps:$4 sm:$0xff]  }
  0x1a   :  { %992 = vmatpush1.bf16.msra.mxu0 %v2171_v9  ;;  %2154 = vmatpush1.bf16.msra.mxu1 %v2171_v9  ;;  %v2257_v9 = vld [vmem:[%s3112_s0 + $0x124] ss:$12 sps:$4 sm:$0xff]  }
  0x1b   :  { %993 = vmatprep.subr.bf16.mxu0 %v2317_v0  ;;  %2139 = vmatprep.subr.bf16.mxu1 %v2317_v0 }
  0x1e   :  { %994 = vmatpush1.bf16.msra.mxu0 %v2172_v10  ;;  %2155 = vmatpush1.bf16.msra.mxu1 %v2172_v10  ;;  %v2259_v10 = vld [vmem:[%s3112_s0 + $0xc8] ss:$12 sps:$4 sm:$0xff]  }
  0x1f   :  { %995 = vmatprep.subr.bf16.mxu0 %v2317_v0  ;;  %2140 = vmatprep.subr.bf16.mxu1 %v2317_v0 }
  0x22   :  { %996 = vmatpush1.bf16.msra.mxu0 %v2173_v11  ;;  %2156 = vmatpush1.bf16.msra.mxu1 %v2173_v11  ;;  %v2260_v11 = vld [vmem:[%s3112_s0 + $0x120] ss:$12 sps:$4 sm:$0xff]  }
  0x23   :  { %997 = vmatprep.subr.bf16.mxu0 %v2317_v0  ;;  %2141 = vmatprep.subr.bf16.mxu1 %v2317_v0 }
  0x26   :  { %998 = vmatpush1.bf16.msra.mxu0 %v2174_v12  ;;  %2157 = vmatpush1.bf16.msra.mxu1 %v2174_v12  ;;  %v2261_v12 = vld [vmem:[%s3112_s0 + $0xe0] ss:$12 sps:$4 sm:$0xff]  }
  0x27   :  { %999 = vmatprep.subr.bf16.mxu0 %v2317_v0  ;;  %2142 = vmatprep.subr.bf16.mxu1 %v2317_v0 }
  0x2a   :  { %1000 = vmatpush1.bf16.msra.mxu0 %v2175_v13  ;;  %2158 = vmatpush1.bf16.msra.mxu1 %v2175_v13  ;;  %v2262_v13 = vld [vmem:[%s3112_s0 + $0x13c] ss:$12 sps:$4 sm:$0xff]  }
  0x2b   :  { %1001 = vmatprep.subr.bf16.mxu0 %v2317_v0  ;;  %2143 = vmatprep.subr.bf16.mxu1 %v2317_v0 }
  0x2e   :  { %1002 = vmatpush1.bf16.msra.mxu0 %v2176_v14  ;;  %2159 = vmatpush1.bf16.msra.mxu1 %v2176_v14  ;;  %v2264_v14 = vld [vmem:[%s3112_s0 + $0xf8] ss:$12 sps:$4 sm:$0xff]  }
  0x2f   :  { %1003 = vmatprep.subr.bf16.mxu0 %v2317_v0  ;;  %2144 = vmatprep.subr.bf16.mxu1 %v2317_v0 }
  0x32   :  { %1004 = vmatpush1.bf16.msra.mxu0 %v2177_v15  ;;  %2160 = vmatpush1.bf16.msra.mxu1 %v2177_v15  ;;  %v2265_v15 = vld [vmem:[%s3112_s0 + $0x138] ss:$12 sps:$4 sm:$0xff]  }
  0x33   :  { %1005 = vmatprep.subr.bf16.mxu0 %v2317_v0  ;;  %2145 = vmatprep.subr.bf16.mxu1 %v2317_v0 }
  0x36   :  { %1006 = vmatpush1.bf16.msra.mxu0 %v2178_v16  ;;  %2161 = vmatpush1.bf16.msra.mxu1 %v2178_v16  ;;  %v2266_v16 = vld [vmem:[%s3112_s0 + $0x110] ss:$12 sps:$4 sm:$0xff]  }
  0x37   :  { %1007 = vmatprep.subr.bf16.mxu0 %v2317_v0  ;;  %2146 = vmatprep.subr.bf16.mxu1 %v2317_v0 }
  0x3a   :  { %1008 = vmatpush1.bf16.msra.mxu0 %v2179_v17  ;;  %2162 = vmatpush1.bf16.msra.mxu1 %v2179_v17  ;;  %v2267_v17 = vld [vmem:[%s3112_s0 + $0x154] ss:$12 sps:$4 sm:$0xff]  }
  0x3b   :  { %1009 = vmatprep.subr.bf16.mxu0 %v2317_v0  ;;  %2147 = vmatprep.subr.bf16.mxu1 %v2317_v0  ;;  %v2246_v0 = vld [vmem:[%s3112_s0 + $0x50] ss:$12 sps:$4 sm:$0xff]  }
  0x3e   :  { %1010 = vmatpush1.bf16.msra.mxu0 %v2180_v18  ;;  %2163 = vmatpush1.bf16.msra.mxu1 %v2180_v18  ;;  %v2269_v18 = vld [vmem:[%s3112_s0 + $0x128] ss:$12 sps:$4 sm:$0xff]  }
  0x3f   :  { %2052 = vmatprep.subr.bf16.mxu1 %v2187_v19 }
  0x41   :  { %1012 = vmatmul.mubr.bf16.vlgmr.msra.gmra.mrb[0].mxu0 %v2181_v20  ;;  %1204 = vmatmul.mubr.bf16.vlgmr.msra.gmra.mrb[0].mxu1 %v2184_v21  ;;  %v2271_v20 = vld [vmem:[%s3112_s0 + $0x140] ss:$12 sps:$4 sm:$0xff]  }
  0x42   :  { %2053 = vmatpush3.bf16.msra.mxu1 %v2187_v19  ;;  %1019 = vmatprep.mubr.bf16.mxu0 %v2188_v22  ;;  %v2270_v19 = vld [vmem:[%s3112_s0 + $0x150] ss:$12 sps:$4 sm:$0xff]   ;;  %v2272_v21 = vld [vmem:[%s3112_s0 + $0x16c] ss:$12 sps:$4 sm:$0xff]  }
  0x43   :  { %1211 = vmatprep.mubr.bf16.mxu1 %v2190_v23  ;;  %2054 = vmatprep.subr.bf16.mxu1 %v2194_v24  ;;  %v2274_v22 = vld [vmem:[%s3112_s0 + $0x158] ss:$12 sps:$4 sm:$0xff]   ;;  %v2275_v23 = vld [vmem:[%s3112_s0 + $0x168] ss:$12 sps:$4 sm:$0xff]  }
  0x46   :  { %2055 = vmatpush3.bf16.msra.mxu1 %v2194_v24  ;;  %v2276_v24 = vld [vmem:[%s3112_s0 + $0x170] ss:$12 sps:$4 sm:$0xff]  }
  0x47   :  { %2056 = vmatprep.subr.bf16.mxu1 %v2201_v25 }
  0x49   :  { %1020 = vmatmul.mubr.bf16.gmra.mrb[4].mxu0 %v2192_v26  ;;  %1212 = vmatmul.mubr.bf16.gmra.mrb[4].mxu1 %v2193_v27  ;;  %v2279_v26 = vld [vmem:[%s3112_s0 + $0x188] ss:$12 sps:$4 sm:$0xff]   ;;  %v2280_v27 = vld [vmem:[%s3112_s0 + $0x180] ss:$12 sps:$4 sm:$0xff]  }
  0x4a   :  { %1027 = vmatprep.mubr.bf16.mxu0 %v2195_v28  ;;  %1219 = vmatprep.mubr.bf16.mxu1 %v2197_v29  ;;  %v2281_v28 = vld [vmem:[%s3112_s0 + $0x1a0] ss:$12 sps:$4 sm:$0xff]   ;;  %v2282_v29 = vld [vmem:[%s3112_s0 + $0x19c] ss:$12 sps:$4 sm:$0xff]  }
  0x4b   :  { %2057 = vmatpush3.bf16.msra.mxu1 %v2201_v25  ;;  %v2277_v25 = vld [vmem:[%s3112_s0 + $0x184] ss:$12 sps:$4 sm:$0xff]  }
  0x4c   :  { %2058 = vmatprep.subr.bf16.mxu1 %v2208_v30 }
  0x4f   :  { %2059 = vmatpush3.bf16.msra.mxu1 %v2208_v30  ;;  %v2284_v30 = vld [vmem:[%s3112_s0 + $0x1b8] ss:$12 sps:$4 sm:$0xff]  }
  0x50   :  { %2060 = vmatprep.subr.bf16.mxu1 %v2215_v32 }
  0x51   :  { %1028 = vmatmul.mubr.bf16.gmra.mrb[8].mxu0 %v2199_v31  ;;  %1220 = vmatmul.mubr.bf16.gmra.mrb[8].mxu1 %v2200_v33  ;;  %v2285_v31 = vld [vmem:[%s3112_s0 + $0x198] ss:$12 sps:$4 sm:$0xff]   ;;  %v2287_v33 = vld [vmem:[%s3112_s0 + $0x1b4] ss:$12 sps:$4 sm:$0xff]  }
  0x52   :  { %1035 = vmatprep.mubr.bf16.mxu0 %v2202_v34  ;;  %1227 = vmatprep.mubr.bf16.mxu1 %v2204_v35  ;;  %v2289_v34 = vld [vmem:[%s3112_s0 + $0x1e8] ss:$12 sps:$4 sm:$0xff]   ;;  %v2290_v35 = vld [vmem:[%s3112_s0 + $0x1b0] ss:$12 sps:$4 sm:$0xff]  }
  0x53   :  { %2061 = vmatpush3.bf16.msra.mxu1 %v2215_v32  ;;  %v2286_v32 = vld [vmem:[%s3112_s0 + $0x1d0] ss:$12 sps:$4 sm:$0xff]  }
  0x54   :  { %2062 = vmatprep.subr.bf16.mxu1 %v2222_v36 }
  0x57   :  { %2063 = vmatpush3.bf16.msra.mxu1 %v2222_v36  ;;  %v2291_v36 = vld [vmem:[%s3112_s0 + $0x200] ss:$12 sps:$4 sm:$0xff]  }
  0x58   :  { %2064 = vmatprep.subr.bf16.mxu1 %v2229_v41 }
  0x59   :  { %1036 = vmatmul.mubr.bf16.gmra.mrb[12].mxu0 %v2206_v37  ;;  %1228 = vmatmul.mubr.bf16.gmra.mrb[12].mxu1 %v2207_v38  ;;  %v2292_v37 = vld [vmem:[%s3112_s0 + $0x1cc] ss:$12 sps:$4 sm:$0xff]  }
  0x5a   :  { %1043 = vmatprep.mubr.bf16.mxu0 %v2209_v39  ;;  %1235 = vmatprep.mubr.bf16.mxu1 %v2211_v40  ;;  %v2294_v38 = vld [vmem:[%s3112_s0 + $0x218] ss:$12 sps:$4 sm:$0xff]   ;;  %v2295_v39 = vld [vmem:[%s3112_s0 + $0x1c8] ss:$12 sps:$4 sm:$0xff]   ;;  %v2296_v40 = vld [vmem:[%s3112_s0 + $0x230] ss:$12 sps:$4 sm:$0xff]  }
  0x5b   :  { %2065 = vmatpush3.bf16.msra.mxu1 %v2229_v41  ;;  %v2297_v41 = vld [vmem:[%s3112_s0 + $0x1e4] ss:$12 sps:$4 sm:$0xff]  }
  0x5c   :  { %2066 = vmatprep.subr.bf16.mxu1 %v2236_v42 }
  0x5f   :  { %2067 = vmatpush3.bf16.msra.mxu1 %v2236_v42  ;;  %v2299_v42 = vld [vmem:[%s3112_s0 + $0x248] ss:$12 sps:$4 sm:$0xff]  }
  0x61   :  { %1044 = vmatmul.mubr.bf16.gmra.mrb[16].mxu0 %v2213_v43  ;;  %1236 = vmatmul.mubr.bf16.gmra.mrb[16].mxu1 %v2214_v44  ;;  %v2300_v43 = vld [vmem:[%s3112_s0 + $0x1e0] ss:$12 sps:$4 sm:$0xff]  }
  0x62   :  { %1051 = vmatprep.mubr.bf16.mxu0 %v2216_v45  ;;  %1243 = vmatprep.mubr.bf16.mxu1 %v2218_v46  ;;  %v2301_v44 = vld [vmem:[%s3112_s0 + $0x260] ss:$12 sps:$4 sm:$0xff]   ;;  %v2302_v45 = vld [vmem:[%s3112_s0 + $0x1fc] ss:$12 sps:$4 sm:$0xff]   ;;  %v2304_v46 = vld [vmem:[%s3112_s0 + $0x278] ss:$12 sps:$4 sm:$0xff]  }
  0x69   :  { %1052 = vmatmul.mubr.bf16.gmra.mrb[20].mxu0 %v2220_v47  ;;  %1244 = vmatmul.mubr.bf16.gmra.mrb[20].mxu1 %v2221_v48  ;;  %v2305_v47 = vld [vmem:[%s3112_s0 + $0x1f8] ss:$12 sps:$4 sm:$0xff]   ;;  %v2306_v48 = vld [vmem:[%s3112_s0 + $0x290] ss:$12 sps:$4 sm:$0xff]  }
  0x6a   :  { %1059 = vmatprep.mubr.bf16.mxu0 %v2223_v49  ;;  %1251 = vmatprep.mubr.bf16.mxu1 %v2225_v50  ;;  %v2307_v49 = vld [vmem:[%s3112_s0 + $0x214] ss:$12 sps:$4 sm:$0xff]  }
  0x6b   :  { %v2309_v50 = vld [vmem:[%s3112_s0 + $0x2a8] ss:$12 sps:$4 sm:$0xff]  }
  0x71   :  { %1060 = vmatmul.mubr.bf16.gmra.mrb[24].mxu0 %v2227_v51  ;;  %1252 = vmatmul.mubr.bf16.gmra.mrb[24].mxu1 %v2228_v52  ;;  %v2310_v51 = vld [vmem:[%s3112_s0 + $0x210] ss:$12 sps:$4 sm:$0xff]   ;;  %v2311_v52 = vld [vmem:[%s3112_s0 + $0x2c0] ss:$12 sps:$4 sm:$0xff]  }
  0x72   :  { %1067 = vmatprep.mubr.bf16.mxu0 %v2230_v53  ;;  %1259 = vmatprep.mubr.bf16.mxu1 %v2232_v54  ;;  %v2312_v53 = vld [vmem:[%s3112_s0 + $0x22c] ss:$12 sps:$4 sm:$0xff]  }
  0x73   :  { %v2314_v54 = vld [vmem:[%s3112_s0 + $0x2d8] ss:$12 sps:$4 sm:$0xff]  }
  0x79   :  { %1068 = vmatmul.mubr.bf16.gmra.mrb[28].mxu0 %v2234_v55  ;;  %1260 = vmatmul.mubr.bf16.gmra.mrb[28].mxu1 %v2235_v56  ;;  %v2315_v55 = vld [vmem:[%s3112_s0 + $0x228] ss:$12 sps:$4 sm:$0xff]   ;;  %v2316_v56 = vld [vmem:[%s3112_s0 + $0x2f0] ss:$12 sps:$4 sm:$0xff]  }
  0x7a   :  { %1075 = vmatprep.mubr.bf16.mxu0 %v2237_v57  ;;  %2068 = vmatprep.mubr.bf16.mxu1 %v2239_v58 }
  0x81   :  { %1076 = vmatmul.mubr.bf16.gmra.mrb[32].mxu0 %v2240_v59  ;;  %2069 = vmatmul.mubr.bf16.vlgmr.msra.gmra.mrb[32].mxu1 %v2241_v60 }
  0x82   :  { %1083 = vmatprep.mubr.bf16.mxu0 %v2242_v61  ;;  %2072 = vmatprep.mubr.bf16.mxu1 %v2244_v62 }
  0x89   :  { %1084 = vmatmul.mubr.bf16.gmra.mrb[36].mxu0 %v2245_v63  ;;  %2073 = vmatmul.mubr.bf16.gmra.mrb[36].mxu1 %v2246_v0 }
  0x8a   :  { %1091 = vmatprep.mubr.bf16.mxu0 %v2247_v1  ;;  %2076 = vmatprep.mubr.bf16.mxu1 %v2249_v2 }
  0x91   :  { %1092 = vmatmul.mubr.bf16.gmra.mrb[40].mxu0 %v2250_v3  ;;  %2077 = vmatmul.mubr.bf16.gmra.mrb[40].mxu1 %v2251_v4 }
  0x92   :  { %1099 = vmatprep.mubr.bf16.mxu0 %v2252_v5  ;;  %2080 = vmatprep.mubr.bf16.mxu1 %v2254_v6 }
  0x99   :  { %1100 = vmatmul.mubr.bf16.gmra.mrb[44].mxu0 %v2255_v7  ;;  %2081 = vmatmul.mubr.bf16.gmra.mrb[44].mxu1 %v2256_v8 }
  0x9a   :  { %1107 = vmatprep.mubr.bf16.mxu0 %v2257_v9  ;;  %2084 = vmatprep.mubr.bf16.mxu1 %v2259_v10 }
  0xa1   :  { %1108 = vmatmul.mubr.bf16.gmra.mrb[48].mxu0 %v2260_v11  ;;  %2085 = vmatmul.mubr.bf16.gmra.mrb[48].mxu1 %v2261_v12 }
  0xa2   :  { %1115 = vmatprep.mubr.bf16.mxu0 %v2262_v13  ;;  %2088 = vmatprep.mubr.bf16.mxu1 %v2264_v14 }
  0xa9   :  { %1116 = vmatmul.mubr.bf16.gmra.mrb[52].mxu0 %v2265_v15  ;;  %2089 = vmatmul.mubr.bf16.gmra.mrb[52].mxu1 %v2266_v16 }
  0xaa   :  { %1123 = vmatprep.mubr.bf16.mxu0 %v2267_v17  ;;  %2092 = vmatprep.mubr.bf16.mxu1 %v2269_v18 }
  0xb1   :  { %1124 = vmatmul.mubr.bf16.gmra.mrb[56].mxu0 %v2270_v19  ;;  %2093 = vmatmul.mubr.bf16.gmra.mrb[56].mxu1 %v2271_v20 }
  0xb2   :  { %1131 = vmatprep.mubr.bf16.mxu0 %v2272_v21  ;;  %2096 = vmatprep.mubr.bf16.mxu1 %v2274_v22 }
  0xb9   :  { %1132 = vmatmul.mubr.bf16.gmra.mrb[60].mxu0 %v2275_v23  ;;  %2097 = vmatmul.mubr.bf16.gmra.mrb[60].mxu1 %v2276_v24 }
  0xba   :  { %1139 = vmatprep.mubr.bf16.mxu0 %v2277_v25  ;;  %2100 = vmatprep.mubr.bf16.mxu1 %v2279_v26 }
  0xc1   :  { %1140 = vmatmul.mubr.bf16.gmra.mrb[64].mxu0 %v2280_v27  ;;  %2101 = vmatmul.mubr.bf16.gmra.mrb[64].mxu1 %v2281_v28 }
  0xc2   :  { %1147 = vmatprep.mubr.bf16.mxu0 %v2282_v29  ;;  %2104 = vmatprep.mubr.bf16.mxu1 %v2284_v30 }
  0xc9   :  { %1148 = vmatmul.mubr.bf16.gmra.mrb[68].mxu0 %v2285_v31  ;;  %2105 = vmatmul.mubr.bf16.gmra.mrb[68].mxu1 %v2286_v32 }
  0xca   :  { %1155 = vmatprep.mubr.bf16.mxu0 %v2287_v33  ;;  %2108 = vmatprep.mubr.bf16.mxu1 %v2289_v34 }
  0xd1   :  { %1156 = vmatmul.mubr.bf16.gmra.mrb[72].mxu0 %v2290_v35  ;;  %2109 = vmatmul.mubr.bf16.gmra.mrb[72].mxu1 %v2291_v36 }
  0xd2   :  { %1163 = vmatprep.mubr.bf16.mxu0 %v2292_v37  ;;  %2112 = vmatprep.mubr.bf16.mxu1 %v2294_v38 }
  0xd9   :  { %1164 = vmatmul.mubr.bf16.gmra.mrb[76].mxu0 %v2295_v39  ;;  %2113 = vmatmul.mubr.bf16.gmra.mrb[76].mxu1 %v2296_v40 }
  0xda   :  { %1171 = vmatprep.mubr.bf16.mxu0 %v2297_v41  ;;  %2116 = vmatprep.mubr.bf16.mxu1 %v2299_v42 }
  0xe1   :  { %1172 = vmatmul.mubr.bf16.gmra.mrb[80].mxu0 %v2300_v43  ;;  %2117 = vmatmul.mubr.bf16.gmra.mrb[80].mxu1 %v2301_v44 }
  0xe2   :  { %1179 = vmatprep.mubr.bf16.mxu0 %v2302_v45  ;;  %2120 = vmatprep.mubr.bf16.mxu1 %v2304_v46 }
  0xe9   :  { %1180 = vmatmul.mubr.bf16.gmra.mrb[84].mxu0 %v2305_v47  ;;  %2121 = vmatmul.mubr.bf16.gmra.mrb[84].mxu1 %v2306_v48 }
  0xea   :  { %1187 = vmatprep.mubr.bf16.mxu0 %v2307_v49  ;;  %2124 = vmatprep.mubr.bf16.mxu1 %v2309_v50 }
  0xf1   :  { %1188 = vmatmul.mubr.bf16.gmra.mrb[88].mxu0 %v2310_v51  ;;  %2125 = vmatmul.mubr.bf16.gmra.mrb[88].mxu1 %v2311_v52 }
  0xf2   :  { %1195 = vmatprep.mubr.bf16.mxu0 %v2312_v53  ;;  %2128 = vmatprep.mubr.bf16.mxu1 %v2314_v54 }
  0xf9   :  { %1196 = vmatmul.mubr.bf16.gmra.mrb[92].mxu0 %v2315_v55  ;;  %2129 = vmatmul.mubr.bf16.gmra.mrb[92].mxu1 %v2316_v56 }
 0x114   :  { %v2730_v57 = vpop.f32.mrb[0].mxu0  ;;  %v2732_v58 = vpop.f32.mrb[0].mxu1 }
 0x115   :  { %v1015_v59 = vpop.f32.mrb[1].mxu0  ;;  %v1207_v60 = vpop.f32.mrb[1].mxu1 }
 0x116   :  { %v2734_v61 = vpop.f32.mrb[2].mxu0  ;;  %v2736_v62 = vpop.f32.mrb[2].mxu1 }
 0x117   :  { %v1018_v63 = vpop.f32.mrb[3].mxu0  ;;  %v1210_v0 = vpop.f32.mrb[3].mxu1 }
 0x118   :  { %v2797_v63 = vld [vmem:[%s3113_s2] ss:$0 sm:$0xff] }
 0x11c   :  { %v1021_v1 = vpop.f32.mrb[4].mxu0  ;;  %v2738_v2 = vpop.f32.mrb[4].mxu1 }
 0x11d   :  { %v1023_v3 = vpop.f32.mrb[5].mxu0  ;;  %v1215_v4 = vpop.f32.mrb[5].mxu1 }
 0x11e   :  { %v2740_v5 = vpop.f32.mrb[6].mxu0  ;;  %v2742_v6 = vpop.f32.mrb[6].mxu1 }
 0x11f   :  { %v1026_v7 = vpop.f32.mrb[7].mxu0  ;;  %v1218_v8 = vpop.f32.mrb[7].mxu1 }
 0x124   :  { %v2744_v9 = vpop.f32.mrb[8].mxu0  ;;  %v2746_v10 = vpop.f32.mrb[8].mxu1 }
 0x125   :  { %v1031_v11 = vpop.f32.mrb[9].mxu0  ;;  %v1223_v12 = vpop.f32.mrb[9].mxu1 }
 0x126   :  { %v2748_v13 = vpop.f32.mrb[10].mxu0  ;;  %v2750_v14 = vpop.f32.mrb[10].mxu1 }
 0x127   :  { %v1034_v15 = vpop.f32.mrb[11].mxu0  ;;  %v1226_v16 = vpop.f32.mrb[11].mxu1 }
 0x12c   :  { %v2752_v17 = vpop.f32.mrb[12].mxu0  ;;  %v2754_v18 = vpop.f32.mrb[12].mxu1 }
 0x12d   :  { %v1039_v19 = vpop.f32.mrb[13].mxu0  ;;  %v1231_v20 = vpop.f32.mrb[13].mxu1 }
 0x12e   :  { %v2756_v21 = vpop.f32.mrb[14].mxu0  ;;  %v2758_v22 = vpop.f32.mrb[14].mxu1 }
 0x12f   :  { %v1042_v23 = vpop.f32.mrb[15].mxu0  ;;  %v1234_v24 = vpop.f32.mrb[15].mxu1 }
 0x134   :  { %v2760_v25 = vpop.f32.mrb[16].mxu0  ;;  %v2762_v26 = vpop.f32.mrb[16].mxu1 }
 0x135   :  { %v1047_v27 = vpop.f32.mrb[17].mxu0  ;;  %v1239_v28 = vpop.f32.mrb[17].mxu1 }
 0x136   :  { %v2764_v29 = vpop.f32.mrb[18].mxu0  ;;  %v2766_v30 = vpop.f32.mrb[18].mxu1 }
 0x137   :  { %v1050_v31 = vpop.f32.mrb[19].mxu0  ;;  %v1242_v32 = vpop.f32.mrb[19].mxu1 }
 0x13c   :  { %v2768_v33 = vpop.f32.mrb[20].mxu0  ;;  %v2770_v34 = vpop.f32.mrb[20].mxu1 }
 0x13d   :  { %v1055_v35 = vpop.f32.mrb[21].mxu0  ;;  %v1247_v36 = vpop.f32.mrb[21].mxu1 }
 0x13e   :  { %v2772_v37 = vpop.f32.mrb[22].mxu0  ;;  %v2774_v38 = vpop.f32.mrb[22].mxu1 }
 0x13f   :  { %v1058_v39 = vpop.f32.mrb[23].mxu0  ;;  %v1250_v40 = vpop.f32.mrb[23].mxu1 }
 0x144   :  { %v2776_v41 = vpop.f32.mrb[24].mxu0  ;;  %v2778_v42 = vpop.f32.mrb[24].mxu1 }
 0x145   :  { %v1063_v43 = vpop.f32.mrb[25].mxu0  ;;  %v1255_v44 = vpop.f32.mrb[25].mxu1 }
 0x146   :  { %v2780_v45 = vpop.f32.mrb[26].mxu0  ;;  %v2782_v46 = vpop.f32.mrb[26].mxu1 }
 0x147   :  { %v1066_v47 = vpop.f32.mrb[27].mxu0  ;;  %v1258_v48 = vpop.f32.mrb[27].mxu1 }
 0x14c   :  { %v2784_v49 = vpop.f32.mrb[28].mxu0  ;;  %v2786_v50 = vpop.f32.mrb[28].mxu1 }
 0x14d   :  { %v1071_v51 = vpop.f32.mrb[29].mxu0  ;;  %v1263_v52 = vpop.f32.mrb[29].mxu1 }
 0x14e   :  { %v2788_v53 = vpop.f32.mrb[30].mxu0  ;;  %v2790_v54 = vpop.f32.mrb[30].mxu1 }
 0x14f   :  { %v1074_v55 = vpop.f32.mrb[31].mxu0  ;;  %v1266_v56 = vpop.f32.mrb[31].mxu1 }
 0x154   :  { %v2792_v59 = vpop.f32.mrb[32].mxu0  ;;  %v2070_v60 = vpop.f32.mrb[32].mxu1 }
 0x155   :  { %v1311_v0 = vadd.f32 %v2070_v60, %v1021_v1  ;;  %v1079_v3 = vpop.f32.mrb[33].mxu0  ;;  %v1302_v4 = vpop.f32.mrb[33].mxu1 }
 0x156   :  { %v1303_v7 = vadd.f32 %v1302_v4, %v2730_v57  ;;  %v2800_v8 = vpop.f32.mrb[34].mxu0  ;;  %v2071_v11 = vpop.f32.mrb[34].mxu1 }
 0x157   :  { %v1761_v12 = vadd.f32 %v2797_v63, %v1311_v0  ;;  %v1314_v15 = vadd.f32 %v2071_v11, %v2740_v5  ;;  %v1082_v16 = vpop.f32.mrb[35].mxu0  ;;  %v1305_v19 = vpop.f32.mrb[35].mxu1 }
 0x158   :  { %v1759_v20 = vadd.f32 %v2797_v63, %v1303_v7  ;;  %v1306_v23 = vadd.f32 %v1305_v19, %v2734_v61 }
 0x159   :  { %1825 = vst [vmem:[%s3114_s3 + $0x10] sm:$0xff] %v1761_v12  ;;  %v1762_v1 = vadd.f32 %v2797_v63, %v1314_v15 }
 0x15a   :  { %1823 = vst [vmem:[%s3114_s3] sm:$0xff] %v1759_v20  ;;  %v1760_v57 = vadd.f32 %v2797_v63, %v1306_v23 }
 0x15b   :  { %1826 = vst [vmem:[%s3114_s3 + $0x18] sm:$0xff] %v1762_v1 }
 0x15c   :  { %1824 = vst [vmem:[%s3114_s3 + $0x8] sm:$0xff] %v1760_v57  ;;  %v1085_v61 = vpop.f32.mrb[36].mxu0  ;;  %v2074_v5 = vpop.f32.mrb[36].mxu1 }
 0x15d   :  { %v1327_v24 = vadd.f32 %v2074_v5, %v2752_v17  ;;  %v1087_v27 = vpop.f32.mrb[37].mxu0  ;;  %v1318_v28 = vpop.f32.mrb[37].mxu1 }
 0x15e   :  { %v1319_v31 = vadd.f32 %v1318_v28, %v2744_v9  ;;  %v2822_v32 = vpop.f32.mrb[38].mxu0  ;;  %v2075_v35 = vpop.f32.mrb[38].mxu1 }
 0x15f   :  { %v1765_v36 = vadd.f32 %v2797_v63, %v1327_v24  ;;  %v1330_v39 = vadd.f32 %v2075_v35, %v2756_v21  ;;  %v1090_v40 = vpop.f32.mrb[39].mxu0  ;;  %v1321_v43 = vpop.f32.mrb[39].mxu1 }
 0x160   :  { %v1763_v44 = vadd.f32 %v2797_v63, %v1319_v31  ;;  %v1322_v47 = vadd.f32 %v1321_v43, %v2748_v13 }
 0x161   :  { %1829 = vst [vmem:[%s3114_s3 + $0x30] sm:$0xff] %v1765_v36  ;;  %v1766_v17 = vadd.f32 %v2797_v63, %v1330_v39 }
 0x162   :  { %1827 = vst [vmem:[%s3114_s3 + $0x20] sm:$0xff] %v1763_v44  ;;  %v1764_v9 = vadd.f32 %v2797_v63, %v1322_v47 }
 0x163   :  { %1830 = vst [vmem:[%s3114_s3 + $0x38] sm:$0xff] %v1766_v17 }
 0x164   :  { %1828 = vst [vmem:[%s3114_s3 + $0x28] sm:$0xff] %v1764_v9  ;;  %v2842_v13 = vpop.f32.mrb[40].mxu0  ;;  %v2078_v21 = vpop.f32.mrb[40].mxu1 }
 0x165   :  { %v1343_v48 = vadd.f32 %v2078_v21, %v2768_v33  ;;  %v1095_v51 = vpop.f32.mrb[41].mxu0  ;;  %v1334_v52 = vpop.f32.mrb[41].mxu1 }
 0x166   :  { %v1335_v55 = vadd.f32 %v1334_v52, %v2760_v25  ;;  %v2846_v56 = vpop.f32.mrb[42].mxu0  ;;  %v2079_v60 = vpop.f32.mrb[42].mxu1 }
 0x167   :  { %v1769_v0 = vadd.f32 %v2797_v63, %v1343_v48  ;;  %v1346_v3 = vadd.f32 %v2079_v60, %v2772_v37  ;;  %v1098_v4 = vpop.f32.mrb[43].mxu0  ;;  %v1337_v7 = vpop.f32.mrb[43].mxu1 }
 0x168   :  { %v1767_v11 = vadd.f32 %v2797_v63, %v1335_v55  ;;  %v1338_v12 = vadd.f32 %v1337_v7, %v2764_v29 }
 0x169   :  { %1833 = vst [vmem:[%s3114_s3 + $0x50] sm:$0xff] %v1769_v0  ;;  %v1770_v33 = vadd.f32 %v2797_v63, %v1346_v3 }
 0x16a   :  { %1831 = vst [vmem:[%s3114_s3 + $0x40] sm:$0xff] %v1767_v11  ;;  %v1768_v25 = vadd.f32 %v2797_v63, %v1338_v12 }
 0x16b   :  { %1834 = vst [vmem:[%s3114_s3 + $0x58] sm:$0xff] %v1770_v33 }
 0x16c   :  { %1832 = vst [vmem:[%s3114_s3 + $0x48] sm:$0xff] %v1768_v25  ;;  %v1101_v29 = vpop.f32.mrb[44].mxu0  ;;  %v2082_v37 = vpop.f32.mrb[44].mxu1 }
 0x16d   :  { %v1359_v15 = vadd.f32 %v2082_v37, %v2784_v49  ;;  %v1103_v16 = vpop.f32.mrb[45].mxu0  ;;  %v1350_v19 = vpop.f32.mrb[45].mxu1 }
 0x16e   :  { %v1351_v20 = vadd.f32 %v1350_v19, %v2776_v41  ;;  %v1104_v23 = vpop.f32.mrb[46].mxu0  ;;  %v2083_v1 = vpop.f32.mrb[46].mxu1 }
 0x16f   :  { %v1773_v57 = vadd.f32 %v2797_v63, %v1359_v15  ;;  %v1362_v5 = vadd.f32 %v2083_v1, %v2788_v53  ;;  %v1106_v24 = vpop.f32.mrb[47].mxu0  ;;  %v1353_v27 = vpop.f32.mrb[47].mxu1 }
 0x170   :  { %v1771_v28 = vadd.f32 %v2797_v63, %v1351_v20  ;;  %v1354_v31 = vadd.f32 %v1353_v27, %v2780_v45 }
 0x171   :  { %1837 = vst [vmem:[%s3114_s3 + $0x70] sm:$0xff] %v1773_v57  ;;  %v1774_v49 = vadd.f32 %v2797_v63, %v1362_v5 }
 0x172   :  { %1835 = vst [vmem:[%s3114_s3 + $0x60] sm:$0xff] %v1771_v28  ;;  %v1772_v41 = vadd.f32 %v2797_v63, %v1354_v31 }
 0x173   :  { %1838 = vst [vmem:[%s3114_s3 + $0x78] sm:$0xff] %v1774_v49 }
 0x174   :  { %1836 = vst [vmem:[%s3114_s3 + $0x68] sm:$0xff] %v1772_v41  ;;  %v1109_v45 = vpop.f32.mrb[48].mxu0  ;;  %v2086_v53 = vpop.f32.mrb[48].mxu1 }
 0x175   :  { %v1375_v35 = vadd.f32 %v2086_v53, %v1085_v61  ;;  %v1111_v36 = vpop.f32.mrb[49].mxu0  ;;  %v1366_v39 = vpop.f32.mrb[49].mxu1 }
 0x176   :  { %v1367_v40 = vadd.f32 %v1366_v39, %v2792_v59  ;;  %v1112_v43 = vpop.f32.mrb[50].mxu0  ;;  %v2087_v44 = vpop.f32.mrb[50].mxu1 }
 0x177   :  { %v1777_v47 = vadd.f32 %v2797_v63, %v1375_v35  ;;  %v1378_v17 = vadd.f32 %v2087_v44, %v2822_v32  ;;  %v1114_v9 = vpop.f32.mrb[51].mxu0  ;;  %v1369_v21 = vpop.f32.mrb[51].mxu1 }
 0x178   :  { %v1775_v48 = vadd.f32 %v2797_v63, %v1367_v40  ;;  %v1370_v51 = vadd.f32 %v1369_v21, %v2800_v8 }
 0x179   :  { %1841 = vst [vmem:[%s3114_s3 + $0x90] sm:$0xff] %v1777_v47  ;;  %v1778_v61 = vadd.f32 %v2797_v63, %v1378_v17 }
 0x17a   :  { %1839 = vst [vmem:[%s3114_s3 + $0x80] sm:$0xff] %v1775_v48  ;;  %v1776_v59 = vadd.f32 %v2797_v63, %v1370_v51 }
 0x17b   :  { %1842 = vst [vmem:[%s3114_s3 + $0x98] sm:$0xff] %v1778_v61 }
 0x17c   :  { %1840 = vst [vmem:[%s3114_s3 + $0x88] sm:$0xff] %v1776_v59  ;;  %v1117_v8 = vpop.f32.mrb[52].mxu0  ;;  %v2090_v32 = vpop.f32.mrb[52].mxu1 }
 0x17d   :  { %v1391_v52 = vadd.f32 %v2090_v32, %v1101_v29  ;;  %v1119_v55 = vpop.f32.mrb[53].mxu0  ;;  %v1382_v60 = vpop.f32.mrb[53].mxu1 }
 0x17e   :  { %v1383_v0 = vadd.f32 %v1382_v60, %v2842_v13  ;;  %v1120_v3 = vpop.f32.mrb[54].mxu0  ;;  %v2091_v4 = vpop.f32.mrb[54].mxu1 }
 0x17f   :  { %v1781_v7 = vadd.f32 %v2797_v63, %v1391_v52  ;;  %v1394_v11 = vadd.f32 %v2091_v4, %v1104_v23  ;;  %v1122_v12 = vpop.f32.mrb[55].mxu0  ;;  %v1385_v33 = vpop.f32.mrb[55].mxu1 }
 0x180   :  { %v1779_v25 = vadd.f32 %v2797_v63, %v1383_v0  ;;  %v1386_v37 = vadd.f32 %v1385_v33, %v2846_v56 }
 0x181   :  { %1845 = vst [vmem:[%s3114_s3 + $0xb0] sm:$0xff] %v1781_v7  ;;  %v1782_v29 = vadd.f32 %v2797_v63, %v1394_v11 }
 0x182   :  { %1843 = vst [vmem:[%s3114_s3 + $0xa0] sm:$0xff] %v1779_v25  ;;  %v1780_v13 = vadd.f32 %v2797_v63, %v1386_v37 }
 0x183   :  { %1846 = vst [vmem:[%s3114_s3 + $0xb8] sm:$0xff] %v1782_v29 }
 0x184   :  { %1844 = vst [vmem:[%s3114_s3 + $0xa8] sm:$0xff] %v1780_v13  ;;  %v1125_v56 = vpop.f32.mrb[56].mxu0  ;;  %v2094_v15 = vpop.f32.mrb[56].mxu1 }
 0x185   :  { %v1407_v16 = vadd.f32 %v2094_v15, %v1117_v8  ;;  %v1127_v19 = vpop.f32.mrb[57].mxu0  ;;  %v1398_v20 = vpop.f32.mrb[57].mxu1 }
 0x186   :  { %v1399_v23 = vadd.f32 %v1398_v20, %v1109_v45  ;;  %v1128_v1 = vpop.f32.mrb[58].mxu0  ;;  %v2095_v57 = vpop.f32.mrb[58].mxu1 }
 0x187   :  { %v1785_v5 = vadd.f32 %v2797_v63, %v1407_v16  ;;  %v1410_v24 = vadd.f32 %v2095_v57, %v1120_v3  ;;  %v1130_v27 = vpop.f32.mrb[59].mxu0  ;;  %v1401_v28 = vpop.f32.mrb[59].mxu1 }
 0x188   :  { %v1783_v31 = vadd.f32 %v2797_v63, %v1399_v23  ;;  %v1402_v49 = vadd.f32 %v1401_v28, %v1112_v43 }
 0x189   :  { %1849 = vst [vmem:[%s3114_s3 + $0xd0] sm:$0xff] %v1785_v5  ;;  %v1786_v41 = vadd.f32 %v2797_v63, %v1410_v24 }
 0x18a   :  { %1847 = vst [vmem:[%s3114_s3 + $0xc0] sm:$0xff] %v1783_v31  ;;  %v1784_v45 = vadd.f32 %v2797_v63, %v1402_v49 }
 0x18b   :  { %1850 = vst [vmem:[%s3114_s3 + $0xd8] sm:$0xff] %v1786_v41 }
 0x18c   :  { %1848 = vst [vmem:[%s3114_s3 + $0xc8] sm:$0xff] %v1784_v45  ;;  %v1133_v53 = vpop.f32.mrb[60].mxu0  ;;  %v2098_v35 = vpop.f32.mrb[60].mxu1 }
 0x18d   :  { %v1423_v36 = vadd.f32 %v2098_v35, %v1133_v53  ;;  %v1135_v39 = vpop.f32.mrb[61].mxu0  ;;  %v1414_v40 = vpop.f32.mrb[61].mxu1 }
 0x18e   :  { %v1415_v43 = vadd.f32 %v1414_v40, %v1125_v56  ;;  %v1136_v44 = vpop.f32.mrb[62].mxu0  ;;  %v2099_v47 = vpop.f32.mrb[62].mxu1 }
 0x18f   :  { %v1789_v17 = vadd.f32 %v2797_v63, %v1423_v36  ;;  %v1426_v9 = vadd.f32 %v2099_v47, %v1136_v44  ;;  %v1138_v21 = vpop.f32.mrb[63].mxu0  ;;  %v1417_v48 = vpop.f32.mrb[63].mxu1 }
 0x190   :  { %v1787_v51 = vadd.f32 %v2797_v63, %v1415_v43  ;;  %v1418_v61 = vadd.f32 %v1417_v48, %v1128_v1 }
 0x191   :  { %1853 = vst [vmem:[%s3114_s3 + $0xf0] sm:$0xff] %v1789_v17  ;;  %v1790_v59 = vadd.f32 %v2797_v63, %v1426_v9 }
 0x192   :  { %1851 = vst [vmem:[%s3114_s3 + $0xe0] sm:$0xff] %v1787_v51  ;;  %v1788_v8 = vadd.f32 %v2797_v63, %v1418_v61 }
 0x193   :  { %1854 = vst [vmem:[%s3114_s3 + $0xf8] sm:$0xff] %v1790_v59 }
 0x194   :  { %1852 = vst [vmem:[%s3114_s3 + $0xe8] sm:$0xff] %v1788_v8  ;;  %v1141_v32 = vpop.f32.mrb[64].mxu0  ;;  %v2102_v52 = vpop.f32.mrb[64].mxu1 }
 0x195   :  { %v1143_v55 = vpop.f32.mrb[65].mxu0  ;;  %v1430_v60 = vpop.f32.mrb[65].mxu1 }
 0x196   :  { %v1431_v0 = vadd.f32 %v1430_v60, %v1141_v32  ;;  %v1144_v3 = vpop.f32.mrb[66].mxu0  ;;  %v2103_v4 = vpop.f32.mrb[66].mxu1 }
 0x197   :  { %v1146_v7 = vpop.f32.mrb[67].mxu0  ;;  %v1433_v11 = vpop.f32.mrb[67].mxu1 }
 0x198   :  { %v1791_v12 = vadd.f32 %v2797_v63, %v1431_v0  ;;  %v1434_v33 = vadd.f32 %v1433_v11, %v1144_v3 }
 0x19a   :  { %1855 = vst [vmem:[%s3114_s3 + $0x100] sm:$0xff] %v1791_v12  ;;  %v1792_v25 = vadd.f32 %v2797_v63, %v1434_v33 }
 0x19c   :  { %1856 = vst [vmem:[%s3114_s3 + $0x108] sm:$0xff] %v1792_v25  ;;  %v1149_v37 = vpop.f32.mrb[68].mxu0  ;;  %v2106_v29 = vpop.f32.mrb[68].mxu1 }
 0x19d   :  { %v1439_v13 = vadd.f32 %v2102_v52, %v1149_v37  ;;  %v1151_v56 = vpop.f32.mrb[69].mxu0  ;;  %v1446_v15 = vpop.f32.mrb[69].mxu1 }
 0x19e   :  { %v1152_v16 = vpop.f32.mrb[70].mxu0  ;;  %v2107_v19 = vpop.f32.mrb[70].mxu1 }
 0x19f   :  { %v1793_v20 = vadd.f32 %v2797_v63, %v1439_v13  ;;  %v1442_v23 = vadd.f32 %v2103_v4, %v1152_v16  ;;  %v1154_v1 = vpop.f32.mrb[71].mxu0  ;;  %v1449_v57 = vpop.f32.mrb[71].mxu1 }
 0x1a1   :  { %1857 = vst [vmem:[%s3114_s3 + $0x110] sm:$0xff] %v1793_v20  ;;  %v1794_v5 = vadd.f32 %v2797_v63, %v1442_v23 }
 0x1a3   :  { %1858 = vst [vmem:[%s3114_s3 + $0x118] sm:$0xff] %v1794_v5 }
 0x1a4   :  { %v1157_v24 = vpop.f32.mrb[72].mxu0  ;;  %v2110_v27 = vpop.f32.mrb[72].mxu1 }
 0x1a5   :  { %v1447_v28 = vadd.f32 %v1446_v15, %v1157_v24  ;;  %v1159_v31 = vpop.f32.mrb[73].mxu0  ;;  %v1462_v49 = vpop.f32.mrb[73].mxu1 }
 0x1a6   :  { %v1160_v41 = vpop.f32.mrb[74].mxu0  ;;  %v2111_v45 = vpop.f32.mrb[74].mxu1 }
 0x1a7   :  { %v1795_v53 = vadd.f32 %v2797_v63, %v1447_v28  ;;  %v1450_v35 = vadd.f32 %v1449_v57, %v1160_v41  ;;  %v1162_v36 = vpop.f32.mrb[75].mxu0  ;;  %v1465_v39 = vpop.f32.mrb[75].mxu1 }
 0x1a9   :  { %1859 = vst [vmem:[%s3114_s3 + $0x120] sm:$0xff] %v1795_v53  ;;  %v1796_v40 = vadd.f32 %v2797_v63, %v1450_v35 }
 0x1ab   :  { %1860 = vst [vmem:[%s3114_s3 + $0x128] sm:$0xff] %v1796_v40 }
 0x1ac   :  { %v1165_v43 = vpop.f32.mrb[76].mxu0  ;;  %v2979_v44 = vpop.f32.mrb[76].mxu1 }
 0x1ad   :  { %v1455_v47 = vadd.f32 %v2106_v29, %v1165_v43  ;;  %v1167_v17 = vpop.f32.mrb[77].mxu0  ;;  %v2981_v9 = vpop.f32.mrb[77].mxu1 }
 0x1ae   :  { %v1168_v21 = vpop.f32.mrb[78].mxu0  ;;  %v2983_v48 = vpop.f32.mrb[78].mxu1 }
 0x1af   :  { %v1797_v51 = vadd.f32 %v2797_v63, %v1455_v47  ;;  %v1458_v61 = vadd.f32 %v2107_v19, %v1168_v21  ;;  %v1170_v59 = vpop.f32.mrb[79].mxu0  ;;  %v2986_v8 = vpop.f32.mrb[79].mxu1 }
 0x1b1   :  { %1861 = vst [vmem:[%s3114_s3 + $0x130] sm:$0xff] %v1797_v51  ;;  %v1798_v32 = vadd.f32 %v2797_v63, %v1458_v61 }
 0x1b3   :  { %1862 = vst [vmem:[%s3114_s3 + $0x138] sm:$0xff] %v1798_v32 }
 0x1b4   :  { %v1173_v52 = vpop.f32.mrb[80].mxu0  ;;  %v2118_v55 = vpop.f32.mrb[80].mxu1 }
 0x1b5   :  { %v1463_v60 = vadd.f32 %v1462_v49, %v1173_v52  ;;  %v1503_v0 = vadd.f32 %v2118_v55, %v2738_v2  ;;  %v1175_v3 = vpop.f32.mrb[81].mxu0  ;;  %v1494_v4 = vpop.f32.mrb[81].mxu1 }
 0x1b6   :  { %v1495_v7 = vadd.f32 %v1494_v4, %v2732_v58  ;;  %v1176_v11 = vpop.f32.mrb[82].mxu0  ;;  %v2119_v12 = vpop.f32.mrb[82].mxu1 }
 0x1b7   :  { %v1799_v33 = vadd.f32 %v2797_v63, %v1463_v60  ;;  %v1809_v25 = vadd.f32 %v2797_v63, %v1503_v0  ;;  %v1466_v37 = vadd.f32 %v1465_v39, %v1176_v11  ;;  %v1506_v29 = vadd.f32 %v2119_v12, %v2742_v6  ;;  %v1178_v13 = vpop.f32.mrb[83].mxu0  ;;  %v1497_v56 = vpop.f32.mrb[83].mxu1 }
 0x1b8   :  { %v1807_v15 = vadd.f32 %v2797_v63, %v1495_v7  ;;  %v1498_v16 = vadd.f32 %v1497_v56, %v2736_v62 }
 0x1b9   :  { %1863 = vst [vmem:[%s3114_s3 + $0x140] sm:$0xff] %v1799_v33  ;;  %1873 = vst [vmem:[%s3114_s3 + $0x190] sm:$0xff] %v1809_v25  ;;  %v1800_v58 = vadd.f32 %v2797_v63, %v1466_v37  ;;  %v1810_v2 = vadd.f32 %v2797_v63, %v1506_v29 }
 0x1ba   :  { %1871 = vst [vmem:[%s3114_s3 + $0x180] sm:$0xff] %v1807_v15  ;;  %v1808_v6 = vadd.f32 %v2797_v63, %v1498_v16 }
 0x1bb   :  { %1864 = vst [vmem:[%s3114_s3 + $0x148] sm:$0xff] %v1800_v58  ;;  %1874 = vst [vmem:[%s3114_s3 + $0x198] sm:$0xff] %v1810_v2 }
 0x1bc   :  { %1872 = vst [vmem:[%s3114_s3 + $0x188] sm:$0xff] %v1808_v6  ;;  %v1181_v62 = vpop.f32.mrb[84].mxu0  ;;  %v2122_v19 = vpop.f32.mrb[84].mxu1 }
 0x1bd   :  { %v1471_v20 = vadd.f32 %v2110_v27, %v1181_v62  ;;  %v1519_v23 = vadd.f32 %v2122_v19, %v2754_v18  ;;  %v1183_v1 = vpop.f32.mrb[85].mxu0  ;;  %v1510_v57 = vpop.f32.mrb[85].mxu1 }
 0x1be   :  { %v1511_v5 = vadd.f32 %v1510_v57, %v2746_v10  ;;  %v1184_v24 = vpop.f32.mrb[86].mxu0  ;;  %v2123_v28 = vpop.f32.mrb[86].mxu1 }
 0x1bf   :  { %v1801_v31 = vadd.f32 %v2797_v63, %v1471_v20  ;;  %v1813_v49 = vadd.f32 %v2797_v63, %v1519_v23  ;;  %v1474_v41 = vadd.f32 %v2111_v45, %v1184_v24  ;;  %v1522_v53 = vadd.f32 %v2123_v28, %v2758_v22  ;;  %v1186_v35 = vpop.f32.mrb[87].mxu0  ;;  %v1513_v36 = vpop.f32.mrb[87].mxu1 }
 0x1c0   :  { %v1811_v39 = vadd.f32 %v2797_v63, %v1511_v5  ;;  %v1514_v27 = vadd.f32 %v1513_v36, %v2750_v14 }
 0x1c1   :  { %1865 = vst [vmem:[%s3114_s3 + $0x150] sm:$0xff] %v1801_v31  ;;  %1877 = vst [vmem:[%s3114_s3 + $0x1b0] sm:$0xff] %v1813_v49  ;;  %v1802_v10 = vadd.f32 %v2797_v63, %v1474_v41  ;;  %v1814_v18 = vadd.f32 %v2797_v63, %v1522_v53 }
 0x1c2   :  { %1875 = vst [vmem:[%s3114_s3 + $0x1a0] sm:$0xff] %v1811_v39  ;;  %v1812_v22 = vadd.f32 %v2797_v63, %v1514_v27 }
 0x1c3   :  { %1866 = vst [vmem:[%s3114_s3 + $0x158] sm:$0xff] %v1802_v10  ;;  %1878 = vst [vmem:[%s3114_s3 + $0x1b8] sm:$0xff] %v1814_v18 }
 0x1c4   :  { %1876 = vst [vmem:[%s3114_s3 + $0x1a8] sm:$0xff] %v1812_v22  ;;  %v1189_v14 = vpop.f32.mrb[88].mxu0  ;;  %v2126_v45 = vpop.f32.mrb[88].mxu1 }
 0x1c5   :  { %v1479_v40 = vadd.f32 %v2981_v9, %v1189_v14  ;;  %v1535_v43 = vadd.f32 %v2126_v45, %v2770_v34  ;;  %v1191_v47 = vpop.f32.mrb[89].mxu0  ;;  %v1526_v17 = vpop.f32.mrb[89].mxu1 }
 0x1c6   :  { %v1527_v21 = vadd.f32 %v1526_v17, %v2762_v26  ;;  %v1192_v51 = vpop.f32.mrb[90].mxu0  ;;  %v2127_v61 = vpop.f32.mrb[90].mxu1 }
 0x1c7   :  { %v1803_v59 = vadd.f32 %v2797_v63, %v1479_v40  ;;  %v1817_v32 = vadd.f32 %v2797_v63, %v1535_v43  ;;  %v1482_v52 = vadd.f32 %v2986_v8, %v1192_v51  ;;  %v1538_v55 = vadd.f32 %v2127_v61, %v2774_v38  ;;  %v1194_v60 = vpop.f32.mrb[91].mxu0  ;;  %v1529_v0 = vpop.f32.mrb[91].mxu1 }
 0x1c8   :  { %v1815_v9 = vadd.f32 %v2797_v63, %v1527_v21  ;;  %v1530_v34 = vadd.f32 %v1529_v0, %v2766_v30 }
 0x1c9   :  { %1867 = vst [vmem:[%s3114_s3 + $0x160] sm:$0xff] %v1803_v59  ;;  %1881 = vst [vmem:[%s3114_s3 + $0x1d0] sm:$0xff] %v1817_v32  ;;  %v1804_v26 = vadd.f32 %v2797_v63, %v1482_v52  ;;  %v1818_v8 = vadd.f32 %v2797_v63, %v1538_v55 }
 0x1ca   :  { %1879 = vst [vmem:[%s3114_s3 + $0x1c0] sm:$0xff] %v1815_v9  ;;  %v1816_v38 = vadd.f32 %v2797_v63, %v1530_v34 }
 0x1cb   :  { %1868 = vst [vmem:[%s3114_s3 + $0x168] sm:$0xff] %v1804_v26  ;;  %1882 = vst [vmem:[%s3114_s3 + $0x1d8] sm:$0xff] %v1818_v8 }
 0x1cc   :  { %1880 = vst [vmem:[%s3114_s3 + $0x1c8] sm:$0xff] %v1816_v38  ;;  %v1197_v30 = vpop.f32.mrb[92].mxu0  ;;  %v2130_v3 = vpop.f32.mrb[92].mxu1 }
 0x1cd   :  { %v1487_v4 = vadd.f32 %v2979_v44, %v1197_v30  ;;  %v1551_v7 = vadd.f32 %v2130_v3, %v2786_v50  ;;  %v1199_v11 = vpop.f32.mrb[93].mxu0  ;;  %v1542_v12 = vpop.f32.mrb[93].mxu1 }
 0x1ce   :  { %v1543_v33 = vadd.f32 %v1542_v12, %v2778_v42  ;;  %v1200_v25 = vpop.f32.mrb[94].mxu0  ;;  %v2131_v37 = vpop.f32.mrb[94].mxu1 }
 0x1cf   :  { %v1805_v29 = vadd.f32 %v2797_v63, %v1487_v4  ;;  %v1821_v13 = vadd.f32 %v2797_v63, %v1551_v7  ;;  %v1490_v56 = vadd.f32 %v2983_v48, %v1200_v25  ;;  %v1554_v15 = vadd.f32 %v2131_v37, %v2790_v54  ;;  %v1202_v16 = vpop.f32.mrb[95].mxu0  ;;  %v1545_v58 = vpop.f32.mrb[95].mxu1 }
 0x1d0   :  { %v1819_v44 = vadd.f32 %v2797_v63, %v1543_v33  ;;  %v1546_v50 = vadd.f32 %v1545_v58, %v2782_v46 }
 0x1d1   :  { %1869 = vst [vmem:[%s3114_s3 + $0x170] sm:$0xff] %v1805_v29  ;;  %1885 = vst [vmem:[%s3114_s3 + $0x1f0] sm:$0xff] %v1821_v13  ;;  %v1806_v42 = vadd.f32 %v2797_v63, %v1490_v56  ;;  %v1822_v48 = vadd.f32 %v2797_v63, %v1554_v15 }
 0x1d2   :  { %1883 = vst [vmem:[%s3114_s3 + $0x1e0] sm:$0xff] %v1819_v44  ;;  %v1820_v54 = vadd.f32 %v2797_v63, %v1546_v50 }
 0x1d3   :  { %1870 = vst [vmem:[%s3114_s3 + $0x178] sm:$0xff] %v1806_v42  ;;  %1886 = vst [vmem:[%s3114_s3 + $0x1f8] sm:$0xff] %v1822_v48 }
 0x1d4   :  { %1884 = vst [vmem:[%s3114_s3 + $0x1e8] sm:$0xff] %v1820_v54 }

</bundles_post_ra>
